<compile_context>
chip_gen: v7x
topology: tpu7x:2x2x1
jax: 0.10.0
libtpu: 0.0.40
codegen_flags: <defaults>
</compile_context>

<pallas_src>
import functools

import jax
import jax.numpy as jnp
from jax.experimental import pallas as pl
from jax.experimental.pallas import tpu as pltpu


def _round_up(x, m):
    return ((x + m - 1) // m) * m


# ----------------------------- Pallas kernels ----------------------------- #
def _matmul_bias_kernel(x_ref, w_ref, b_ref, o_ref, *, relu):
    # x: [TM, K] f32, w: [K, N] bf16 (resident), b: [1, N] f32, o: [TM, N] f32
    acc = jnp.dot(x_ref[...].astype(jnp.bfloat16), w_ref[...],
                  preferred_element_type=jnp.float32)
    acc = acc + b_ref[...]
    if relu:
        acc = jnp.maximum(acc, 0.0)
    o_ref[...] = acc.astype(o_ref.dtype)


def matmul_bias(x, w, b, *, relu, tm=512):
    """Fused (x @ w + b) (+ReLU); gridded/pipelined over rows, weight resident."""
    M, K = x.shape
    K2, N = w.shape
    assert K == K2, (K, K2)
    tm = min(tm, _round_up(M, 8))        # tm is a multiple of 8
    Mp = _round_up(M, tm)                # pad so every grid block is full
    if Mp != M:
        x = jnp.pad(x, ((0, Mp - M), (0, 0)))
    grid = (Mp // tm,)
    cost = pl.CostEstimate(
        flops=2 * Mp * K * N,
        transcendentals=0,
        bytes_accessed=Mp * K * x.dtype.itemsize + K * N * w.dtype.itemsize
        + N * 4 + Mp * N * 4,
    )
    out = pl.pallas_call(
        functools.partial(_matmul_bias_kernel, relu=relu),
        out_shape=jax.ShapeDtypeStruct((Mp, N), jnp.float32),
        grid=grid,
        in_specs=[
            pl.BlockSpec((tm, K), lambda i: (i, 0)),   # row tile (pipelined)
            pl.BlockSpec((K, N), lambda i: (0, 0)),    # weight (resident)
            pl.BlockSpec((1, N), lambda i: (0, 0)),    # bias (resident)
        ],
        out_specs=pl.BlockSpec((tm, N), lambda i: (i, 0)),
        compiler_params=pltpu.CompilerParams(
            dimension_semantics=("parallel",)),
        cost_estimate=cost,
    )(x, w, b.reshape(1, N))
    return out[:M] if Mp != M else out


def _head_kernel(x_ref, w1_ref, b1_ref, w2_ref, b2_ref, o_ref):
    # Fused lin1(+ReLU)+lin2: single launch, w1 read once, bf16 MXU / f32 acc.
    h = jnp.dot(x_ref[...].astype(jnp.bfloat16), w1_ref[...],
                preferred_element_type=jnp.float32)
    h = jnp.maximum(h + b1_ref[...], 0.0)
    q = jnp.dot(h.astype(jnp.bfloat16), w2_ref[...],
                preferred_element_type=jnp.float32)
    o_ref[...] = (q + b2_ref[...]).astype(o_ref.dtype)


def linear_head(x, w1, b1, w2, b2, *, tm=256):
    M, K1 = x.shape
    _, N1 = w1.shape
    _, N2 = w2.shape
    tm = min(tm, _round_up(M, 8))
    Mp = _round_up(M, tm)
    if Mp != M:
        x = jnp.pad(x, ((0, Mp - M), (0, 0)))
    grid = (Mp // tm,)
    cost = pl.CostEstimate(
        flops=2 * Mp * K1 * N1 + 2 * Mp * N1 * N2,
        transcendentals=0,
        bytes_accessed=Mp * K1 * x.dtype.itemsize + K1 * N1 * 2 + N1 * 4
        + N1 * N2 * 2 + N2 * 4 + Mp * N2 * 4,
    )
    out = pl.pallas_call(
        _head_kernel,
        out_shape=jax.ShapeDtypeStruct((Mp, N2), jnp.float32),
        grid=grid,
        in_specs=[
            pl.BlockSpec((tm, K1), lambda i: (i, 0)),
            pl.BlockSpec((K1, N1), lambda i: (0, 0)),
            pl.BlockSpec((1, N1), lambda i: (0, 0)),
            pl.BlockSpec((N1, N2), lambda i: (0, 0)),
            pl.BlockSpec((1, N2), lambda i: (0, 0)),
        ],
        out_specs=pl.BlockSpec((tm, N2), lambda i: (i, 0)),
        compiler_params=pltpu.CompilerParams(
            dimension_semantics=("parallel",)),
        cost_estimate=cost,
    )(x, w1, b1.reshape(1, N1), w2, b2.reshape(1, N2))
    return out[:M] if Mp != M else out


# ------------------------------- conv glue -------------------------------- #
def _im2col_nhwc(x, k, s):
    """im2col via static strided slices (no gather). Column order (kh, kw, C)."""
    B, H, W, C = x.shape
    OH = (H - k) // s + 1
    OW = (W - k) // s + 1
    cols = []
    for i in range(k):
        for j in range(k):
            cols.append(jax.lax.slice(
                x, (0, i, j, 0),
                (B, i + s * (OH - 1) + 1, j + s * (OW - 1) + 1, C),
                (1, s, s, 1)))                         # [B, OH, OW, C]
    cols = jnp.concatenate(cols, axis=-1)              # [B, OH, OW, k*k*C]
    return cols.reshape(B * OH * OW, k * k * C), OH, OW


def conv2d_relu_nhwc(x, w_mat, b, k, stride):
    """PyTorch Conv2d (padding=0) + ReLU on NHWC input; w_mat is [k*k*C, O]."""
    B = x.shape[0]
    cols, OH, OW = _im2col_nhwc(x, k, stride)          # [B*OH*OW, k*k*C]
    out = matmul_bias(cols, w_mat, b, relu=True)       # [B*OH*OW, O]
    return out.reshape(B, OH, OW, w_mat.shape[1])      # NHWC (no transpose)


# --------------------------------- model ---------------------------------- #
def init_dqn_params(key, n_actions):
    """PyTorch-layout parameters (same init scheme as nn.Conv2d / nn.Linear)."""
    ks = jax.random.split(key, 8)

    def uniform(k, shape, fan_in):
        bound = 1.0 / jnp.sqrt(fan_in)
        return jax.random.uniform(k, shape, jnp.float32, -bound, bound)

    return {
        "conv1_w": uniform(ks[0], (16, 4, 8, 8), 4 * 8 * 8),
        "conv1_b": uniform(ks[1], (16,), 4 * 8 * 8),
        "conv2_w": uniform(ks[2], (32, 16, 4, 4), 16 * 4 * 4),
        "conv2_b": uniform(ks[3], (32,), 16 * 4 * 4),
        "lin1_w": uniform(ks[4], (256, 2592), 2592),
        "lin1_b": uniform(ks[5], (256,), 2592),
        "lin2_w": uniform(ks[6], (n_actions, 256), 256),
        "lin2_b": uniform(ks[7], (n_actions,), 256),
    }


def prepare_params(p):
    """One-time re-layout of PyTorch-format weights for the NHWC kernels."""
    def conv_w(w):  # [O, C, kh, kw] -> [kh*kw*C, O], bf16 MXU operand
        _, C, kh, kw = w.shape
        return (jnp.transpose(w, (2, 3, 1, 0))
                .reshape(kh * kw * C, -1).astype(jnp.bfloat16))

    # lin1 consumes the conv2 feature map; PyTorch flattens (C,H,W), we flatten
    # NHWC (H,W,C) -> permute lin1_w columns once to compensate.
    l1 = p["lin1_w"].reshape(256, 32, 9, 9)
    l1 = jnp.transpose(l1, (0, 2, 3, 1)).reshape(256, 32 * 9 * 9)

    return {
        "conv1_w": conv_w(p["conv1_w"]), "conv1_b": p["conv1_b"],
        "conv2_w": conv_w(p["conv2_w"]), "conv2_b": p["conv2_b"],
        "lin1_w": l1.T.astype(jnp.bfloat16), "lin1_b": p["lin1_b"],
        "lin2_w": p["lin2_w"].T.astype(jnp.bfloat16), "lin2_b": p["lin2_b"],
    }


def dqn_forward(params, x):
    """x: [B, 4, 84, 84] or [4, 84, 84] (NCHW, like PyTorch). Returns Q-values."""
    batched = x.ndim == 4
    if not batched:                        # mirror the 3-D (unbatched) branch
        x = x[None]
    x = jnp.transpose(x, (0, 2, 3, 1))     # NCHW -> NHWC, once per call
    h = conv2d_relu_nhwc(x, params["conv1_w"], params["conv1_b"], 8, 4)  # [B,20,20,16]
    h = conv2d_relu_nhwc(h, params["conv2_w"], params["conv2_b"], 4, 2)  # [B,9,9,32]
    h = h.reshape(h.shape[0], -1)          # [B, 2592] in (H,W,C) order
    q = linear_head(h, params["lin1_w"], params["lin1_b"],
                    params["lin2_w"], params["lin2_b"])                  # [B, nA]
    if not batched:
        q = q[0]
    return q


# ----------------------------- pure-JAX reference -------------------------- #
def dqn_reference(p, x):
    """f32 NCHW reference that mirrors the PyTorch module exactly."""
    h = jax.lax.conv_general_dilated(
        x, p["conv1_w"], (4, 4), "VALID",
        dimension_numbers=("NCHW", "OIHW", "NCHW"))
    h = jax.nn.relu(h + p["conv1_b"][None, :, None, None])
    h = jax.lax.conv_general_dilated(
        h, p["conv2_w"], (2, 2), "VALID",
        dimension_numbers=("NCHW", "OIHW", "NCHW"))
    h = jax.nn.relu(h + p["conv2_b"][None, :, None, None])
    h = h.reshape(h.shape[0], -1)
    h = jax.nn.relu(h @ p["lin1_w"].T + p["lin1_b"])
    return h @ p["lin2_w"].T + p["lin2_b"]


if __name__ == "__main__":
    n_actions = 6
    key = jax.random.PRNGKey(0)
    k_param, k_x = jax.random.split(key)
    raw_params = init_dqn_params(k_param, n_actions)
    params = prepare_params(raw_params)
    # 84x84 spatial is required by the module (linearLayer1 expects 2592 = 32*9*9).
    x = jax.random.normal(k_x, (2, 4, 84, 84), dtype=jnp.float32)

    fwd = jax.jit(dqn_forward)
    q = fwd(params, x)
    jax.block_until_ready(q)
    assert q.shape == (2, n_actions), q.shape

    q_ref = dqn_reference(raw_params, x)
    assert jnp.allclose(q, q_ref, rtol=1e-1, atol=1e-1), (
        float(jnp.max(jnp.abs(q - q_ref))))
    print("KERNEL_OK")
</pallas_src>

<mosaic_0001>
module attributes {stable_mosaic.version = 11 : i64} {
  func.func @_matmul_bias_kernel(%arg0: i32, %arg1: memref<512x256xf32, #tpu.memory_space<vmem>>, %arg2: memref<256x16xbf16, #tpu.memory_space<vmem>>, %arg3: memref<1x16xf32, #tpu.memory_space<vmem>>, %arg4: memref<512x16xf32, #tpu.memory_space<vmem>>) attributes {dimension_semantics = [#tpu.dimension_semantics<parallel>], iteration_bounds = array<i64: 2>, scalar_prefetch = 0 : i64, scratch_operands = 0 : i64, tpu.core_type = #tpu.core_type<tc>, window_params = [{transform_indices = @transform_0, window_bounds = array<i64: 512, 256>}, {pipeline_mode = #tpu.pipeline_mode<synchronous>, transform_indices = @transform_1, window_bounds = array<i64: 256, 16>}, {pipeline_mode = #tpu.pipeline_mode<synchronous>, transform_indices = @transform_2, window_bounds = array<i64: 1, 16>}, {transform_indices = @transform_3, window_bounds = array<i64: 512, 16>}]} {
    %c0 = arith.constant 0 : index
    %c0_0 = arith.constant 0 : index
    %0 = vector.load %arg1[%c0, %c0_0] : memref<512x256xf32, #tpu.memory_space<vmem>>, vector<512x256xf32>
    %1 = arith.truncf %0 : vector<512x256xf32> to vector<512x256xbf16>
    %c0_1 = arith.constant 0 : index
    %c0_2 = arith.constant 0 : index
    %2 = vector.load %arg2[%c0_1, %c0_2] : memref<256x16xbf16, #tpu.memory_space<vmem>>, vector<256x16xbf16>
    %cst = arith.constant dense<0.000000e+00> : vector<512x16xf32>
    %3 = tpu.matmul %1, %2, %cst {dimension_numbers = #tpu.dot_dimension_numbers<[1], [0], [0], [1], [0, 0, 1, 1], [], []>} : vector<512x256xbf16>, vector<256x16xbf16>, vector<512x16xf32> -> vector<512x16xf32>
    %c0_3 = arith.constant 0 : index
    %c0_4 = arith.constant 0 : index
    %4 = vector.load %arg3[%c0_3, %c0_4] : memref<1x16xf32, #tpu.memory_space<vmem>>, vector<1x16xf32>
    %5 = vector.broadcast %4 : vector<1x16xf32> to vector<512x16xf32>
    %6 = arith.addf %3, %5 : vector<512x16xf32>
    %cst_5 = arith.constant 0.000000e+00 : f32
    %7 = vector.broadcast %cst_5 : f32 to vector<512x16xf32>
    %8 = arith.maximumf %6, %7 : vector<512x16xf32>
    %c0_6 = arith.constant 0 : index
    %c0_7 = arith.constant 0 : index
    %9 = vector.load %arg4[%c0_6, %c0_7] : memref<512x16xf32, #tpu.memory_space<vmem>>, vector<512x16xf32>
    tpu.vector_store %arg4[%c0_6, %c0_7], %8 {strides = array<i32>} : memref<512x16xf32, #tpu.memory_space<vmem>>, vector<512x16xf32>,
    return
  }
  func.func @transform_0(%arg0: i32) -> (i32, i32) {
    %c0_i32 = arith.constant 0 : i32
    %c0_i32_0 = arith.constant 0 : i32
    return %arg0, %c0_i32 : i32, i32
  }
  func.func @transform_1(%arg0: i32) -> (i32, i32) {
    %c0_i32 = arith.constant 0 : i32
    %c0_i32_0 = arith.constant 0 : i32
    %c0_i32_1 = arith.constant 0 : i32
    return %c0_i32, %c0_i32_0 : i32, i32
  }
  func.func @transform_2(%arg0: i32) -> (i32, i32) {
    %c0_i32 = arith.constant 0 : i32
    %c0_i32_0 = arith.constant 0 : i32
    %c0_i32_1 = arith.constant 0 : i32
    return %c0_i32, %c0_i32_0 : i32, i32
  }
  func.func @transform_3(%arg0: i32) -> (i32, i32) {
    %c0_i32 = arith.constant 0 : i32
    %c0_i32_0 = arith.constant 0 : i32
    return %arg0, %c0_i32 : i32, i32
  }
}

module attributes {stable_mosaic.version = 11 : i64} {
  func.func @_matmul_bias_kernel(%arg0: i32, %arg1: memref<168x256xf32, #tpu.memory_space<vmem>>, %arg2: memref<256x32xbf16, #tpu.memory_space<vmem>>, %arg3: memref<1x32xf32, #tpu.memory_space<vmem>>, %arg4: memref<168x32xf32, #tpu.memory_space<vmem>>) attributes {dimension_semantics = [#tpu.dimension_semantics<parallel>], iteration_bounds = array<i64: 1>, scalar_prefetch = 0 : i64, scratch_operands = 0 : i64, tpu.core_type = #tpu.core_type<tc>, window_params = [{transform_indices = @transform_0, window_bounds = array<i64: 168, 256>}, {pipeline_mode = #tpu.pipeline_mode<synchronous>, transform_indices = @transform_1, window_bounds = array<i64: 256, 32>}, {pipeline_mode = #tpu.pipeline_mode<synchronous>, transform_indices = @transform_2, window_bounds = array<i64: 1, 32>}, {transform_indices = @transform_3, window_bounds = array<i64: 168, 32>}]} {
    %c0 = arith.constant 0 : index
    %c0_0 = arith.constant 0 : index
    %0 = vector.load %arg1[%c0, %c0_0] : memref<168x256xf32, #tpu.memory_space<vmem>>, vector<168x256xf32>
    %1 = arith.truncf %0 : vector<168x256xf32> to vector<168x256xbf16>
    %c0_1 = arith.constant 0 : index
    %c0_2 = arith.constant 0 : index
    %2 = vector.load %arg2[%c0_1, %c0_2] : memref<256x32xbf16, #tpu.memory_space<vmem>>, vector<256x32xbf16>
    %cst = arith.constant dense<0.000000e+00> : vector<168x32xf32>
    %3 = tpu.matmul %1, %2, %cst {dimension_numbers = #tpu.dot_dimension_numbers<[1], [0], [0], [1], [0, 0, 1, 1], [], []>} : vector<168x256xbf16>, vector<256x32xbf16>, vector<168x32xf32> -> vector<168x32xf32>
    %c0_3 = arith.constant 0 : index
    %c0_4 = arith.constant 0 : index
    %4 = vector.load %arg3[%c0_3, %c0_4] : memref<1x32xf32, #tpu.memory_space<vmem>>, vector<1x32xf32>
    %5 = vector.broadcast %4 : vector<1x32xf32> to vector<168x32xf32>
    %6 = arith.addf %3, %5 : vector<168x32xf32>
    %cst_5 = arith.constant 0.000000e+00 : f32
    %7 = vector.broadcast %cst_5 : f32 to vector<168x32xf32>
    %8 = arith.maximumf %6, %7 : vector<168x32xf32>
    %c0_6 = arith.constant 0 : index
    %c0_7 = arith.constant 0 : index
    %9 = vector.load %arg4[%c0_6, %c0_7] : memref<168x32xf32, #tpu.memory_space<vmem>>, vector<168x32xf32>
    tpu.vector_store %arg4[%c0_6, %c0_7], %8 {strides = array<i32>} : memref<168x32xf32, #tpu.memory_space<vmem>>, vector<168x32xf32>,
    return
  }
  func.func @transform_0(%arg0: i32) -> (i32, i32) {
    %c0_i32 = arith.constant 0 : i32
    %c0_i32_0 = arith.constant 0 : i32
    return %arg0, %c0_i32 : i32, i32
  }
  func.func @transform_1(%arg0: i32) -> (i32, i32) {
    %c0_i32 = arith.constant 0 : i32
    %c0_i32_0 = arith.constant 0 : i32
    %c0_i32_1 = arith.constant 0 : i32
    return %c0_i32, %c0_i32_0 : i32, i32
  }
  func.func @transform_2(%arg0: i32) -> (i32, i32) {
    %c0_i32 = arith.constant 0 : i32
    %c0_i32_0 = arith.constant 0 : i32
    %c0_i32_1 = arith.constant 0 : i32
    return %c0_i32, %c0_i32_0 : i32, i32
  }
  func.func @transform_3(%arg0: i32) -> (i32, i32) {
    %c0_i32 = arith.constant 0 : i32
    %c0_i32_0 = arith.constant 0 : i32
    return %arg0, %c0_i32 : i32, i32
  }
}

module attributes {stable_mosaic.version = 11 : i64} {
  func.func @_head_kernel(%arg0: i32, %arg1: memref<8x2592xf32, #tpu.memory_space<vmem>>, %arg2: memref<2592x256xbf16, #tpu.memory_space<vmem>>, %arg3: memref<1x256xf32, #tpu.memory_space<vmem>>, %arg4: memref<256x6xbf16, #tpu.memory_space<vmem>>, %arg5: memref<1x6xf32, #tpu.memory_space<vmem>>, %arg6: memref<8x6xf32, #tpu.memory_space<vmem>>) attributes {dimension_semantics = [#tpu.dimension_semantics<parallel>], iteration_bounds = array<i64: 1>, scalar_prefetch = 0 : i64, scratch_operands = 0 : i64, tpu.core_type = #tpu.core_type<tc>, window_params = [{transform_indices = @transform_0, window_bounds = array<i64: 8, 2592>}, {pipeline_mode = #tpu.pipeline_mode<synchronous>, transform_indices = @transform_1, window_bounds = array<i64: 2592, 256>}, {pipeline_mode = #tpu.pipeline_mode<synchronous>, transform_indices = @transform_2, window_bounds = array<i64: 1, 256>}, {pipeline_mode = #tpu.pipeline_mode<synchronous>, transform_indices = @transform_3, window_bounds = array<i64: 256, 6>}, {pipeline_mode = #tpu.pipeline_mode<synchronous>, transform_indices = @transform_4, window_bounds = array<i64: 1, 6>}, {transform_indices = @transform_5, window_bounds = array<i64: 8, 6>}]} {
    %c0 = arith.constant 0 : index
    %c0_0 = arith.constant 0 : index
    %0 = vector.load %arg1[%c0, %c0_0] : memref<8x2592xf32, #tpu.memory_space<vmem>>, vector<8x2592xf32>
    %1 = arith.truncf %0 : vector<8x2592xf32> to vector<8x2592xbf16>
    %c0_1 = arith.constant 0 : index
    %c0_2 = arith.constant 0 : index
    %2 = vector.load %arg2[%c0_1, %c0_2] : memref<2592x256xbf16, #tpu.memory_space<vmem>>, vector<2592x256xbf16>
    %cst = arith.constant dense<0.000000e+00> : vector<8x256xf32>
    %3 = tpu.matmul %1, %2, %cst {dimension_numbers = #tpu.dot_dimension_numbers<[1], [0], [0], [1], [0, 0, 1, 1], [], []>} : vector<8x2592xbf16>, vector<2592x256xbf16>, vector<8x256xf32> -> vector<8x256xf32>
    %c0_3 = arith.constant 0 : index
    %c0_4 = arith.constant 0 : index
    %4 = vector.load %arg3[%c0_3, %c0_4] : memref<1x256xf32, #tpu.memory_space<vmem>>, vector<1x256xf32>
    %5 = vector.broadcast %4 : vector<1x256xf32> to vector<8x256xf32>
    %6 = arith.addf %3, %5 : vector<8x256xf32>
    %cst_5 = arith.constant 0.000000e+00 : f32
    %7 = vector.broadcast %cst_5 : f32 to vector<8x256xf32>
    %8 = arith.maximumf %6, %7 : vector<8x256xf32>
    %9 = arith.truncf %8 : vector<8x256xf32> to vector<8x256xbf16>
    %c0_6 = arith.constant 0 : index
    %c0_7 = arith.constant 0 : index
    %10 = vector.load %arg4[%c0_6, %c0_7] : memref<256x6xbf16, #tpu.memory_space<vmem>>, vector<256x6xbf16>
    %cst_8 = arith.constant dense<0.000000e+00> : vector<8x6xf32>
    %11 = tpu.matmul %9, %10, %cst_8 {dimension_numbers = #tpu.dot_dimension_numbers<[1], [0], [0], [1], [0, 0, 1, 1], [], []>} : vector<8x256xbf16>, vector<256x6xbf16>, vector<8x6xf32> -> vector<8x6xf32>
    %c0_9 = arith.constant 0 : index
    %c0_10 = arith.constant 0 : index
    %12 = vector.load %arg5[%c0_9, %c0_10] : memref<1x6xf32, #tpu.memory_space<vmem>>, vector<1x6xf32>
    %13 = vector.broadcast %12 : vector<1x6xf32> to vector<8x6xf32>
    %14 = arith.addf %11, %13 : vector<8x6xf32>
    %c0_11 = arith.constant 0 : index
    %c0_12 = arith.constant 0 : index
    %15 = vector.load %arg6[%c0_11, %c0_12] : memref<8x6xf32, #tpu.memory_space<vmem>>, vector<8x6xf32>
    tpu.vector_store %arg6[%c0_11, %c0_12], %14 {strides = array<i32>} : memref<8x6xf32, #tpu.memory_space<vmem>>, vector<8x6xf32>,
    return
  }
  func.func @transform_0(%arg0: i32) -> (i32, i32) {
    %c0_i32 = arith.constant 0 : i32
    %c0_i32_0 = arith.constant 0 : i32
    return %arg0, %c0_i32 : i32, i32
  }
  func.func @transform_1(%arg0: i32) -> (i32, i32) {
    %c0_i32 = arith.constant 0 : i32
    %c0_i32_0 = arith.constant 0 : i32
    %c0_i32_1 = arith.constant 0 : i32
    return %c0_i32, %c0_i32_0 : i32, i32
  }
  func.func @transform_2(%arg0: i32) -> (i32, i32) {
    %c0_i32 = arith.constant 0 : i32
    %c0_i32_0 = arith.constant 0 : i32
    %c0_i32_1 = arith.constant 0 : i32
    return %c0_i32, %c0_i32_0 : i32, i32
  }
  func.func @transform_3(%arg0: i32) -> (i32, i32) {
    %c0_i32 = arith.constant 0 : i32
    %c0_i32_0 = arith.constant 0 : i32
    %c0_i32_1 = arith.constant 0 : i32
    return %c0_i32, %c0_i32_0 : i32, i32
  }
  func.func @transform_4(%arg0: i32) -> (i32, i32) {
    %c0_i32 = arith.constant 0 : i32
    %c0_i32_0 = arith.constant 0 : i32
    %c0_i32_1 = arith.constant 0 : i32
    return %c0_i32, %c0_i32_0 : i32, i32
  }
  func.func @transform_5(%arg0: i32) -> (i32, i32) {
    %c0_i32 = arith.constant 0 : i32
    %c0_i32_0 = arith.constant 0 : i32
    return %arg0, %c0_i32 : i32, i32
  }
}

</mosaic_0001>

<bundles_post_ra>
// kernel: dqn_forward.3
= control target key start
LH: loop header
LB: loop body
LE: loop exit
PB: predicated region body
PF: predicated region fallthrough
CT: control target
= control target key end

     0   :  { %s1095_s12 = smov 0   ;;  %s1525_s0 = inlined_call_operand.vmem [shape: f32[1024,256], index: 0, kind: input, shape index: {}]   ;;  %s1526_s1 = inlined_call_operand.vmem [shape: bf16[256,16], index: 1, kind: input, shape index: {}]   ;;  %s1527_s2 = inlined_call_operand.vmem [shape: f32[1,16], index: 2, kind: input, shape index: {}]   ;;  %s1528_s3 = inlined_call_operand.vmem [shape: f32[1024,16], index: 3, kind: output, shape index: {}]  }
   0x1 LB: > { %s979_s13 = sadd.s32 4294967295, %s1072_s12   ;;  %p983_p0 = scmp.ge.s32.totalorder %s1072_s12, 1  ;;  %s1072_s12 = sphi %s1095_s12, %s13_s12  }
   0x2   : > { %p139_p1 = scmp.lt.s32.totalorder %s1072_s12, 3 }
   0x4   : > { %p140_p2 = pnand %p983_p0, %p139_p1 }
   0x5   : > { %v1050_v0 = vld [vmem:[%s1526_s1] sm:$0xff] (!%p140_p2)   ;;  %v1074_v1 = vmov (!%p140_p2), 0   ;;  %s984_s16 = sshll.u32 (!%p140_p2), %s979_s13, 6  ;;  %v1051_v2 = vld [vmem:[%s1526_s1 + $0x8] sm:$0xff] (!%p140_p2)   ;;  %v1052_v3 = vld [vmem:[%s1526_s1 + $0x10] sm:$0xff] (!%p140_p2)   ;;  %vm858_vm0 = vcmask (!%p140_p2), 130048  }
   0x6   : > { %143 = sbr.rel (%p140_p2) target bundleno = 409 (0x199), region = 32  ;;  %505 = vmatprep.subr.bf16.mxu0 (!%p140_p2), %v1074_v1  ;;  %1009 = vmatprep.subr.bf16.mxu1 (!%p140_p2), %v1074_v1  ;;  %p165_p3 = scmp.lt.s32.totalorder (!%p140_p2), %s984_s16, 127  ;;  %v1053_v4 = vld [vmem:[%s1526_s1 + $0x18] sm:$0xff] (!%p140_p2)   ;;  %v1054_v5 = vld [vmem:[%s1526_s1 + $0x20] sm:$0xff] (!%p140_p2)   ;;  %v1055_v11 = vld [vmem:[%s1526_s1 + $0x28] sm:$0xff] (!%p140_p2)  }
   0x7   : > { %506 = vmatpush1.bf16.msra.mxu0 (!%p140_p2), %v1050_v0  ;;  %1025 = vmatpush1.bf16.msra.mxu1 (!%p140_p2), %v1050_v0  ;;  %v1056_v13 = vld [vmem:[%s1526_s1 + $0x30] sm:$0xff] (!%p140_p2)   ;;  %v1057_v14 = vld [vmem:[%s1526_s1 + $0x38] sm:$0xff] (!%p140_p2)   ;;  %v1058_v15 = vld [vmem:[%s1526_s1 + $0x40] sm:$0xff] (!%p140_p2)  }
   0x8   : > { %507 = vmatprep.subr.bf16.mxu0 (!%p140_p2), %v1074_v1  ;;  %1010 = vmatprep.subr.bf16.mxu1 (!%p140_p2), %v1074_v1  ;;  %v1059_v16 = vld [vmem:[%s1526_s1 + $0x48] sm:$0xff] (!%p140_p2)   ;;  %v1060_v17 = vld [vmem:[%s1526_s1 + $0x50] sm:$0xff] (!%p140_p2)   ;;  %v1061_v18 = vld [vmem:[%s1526_s1 + $0x58] sm:$0xff] (!%p140_p2)  }
   0x9   : > { %v1062_v19 = vld [vmem:[%s1526_s1 + $0x60] sm:$0xff] (!%p140_p2)   ;;  %v1063_v20 = vld [vmem:[%s1526_s1 + $0x68] sm:$0xff] (!%p140_p2)   ;;  %v1064_v21 = vld [vmem:[%s1526_s1 + $0x70] sm:$0xff] (!%p140_p2)  }
   0xa   : > { %v1065_v22 = vld [vmem:[%s1526_s1 + $0x78] sm:$0xff] (!%p140_p2)  }
   0xb   : > { %508 = vmatpush1.bf16.msra.mxu0 (!%p140_p2), %v1051_v2  ;;  %1026 = vmatpush1.bf16.msra.mxu1 (!%p140_p2), %v1051_v2 }
   0xc   : > { %509 = vmatprep.subr.bf16.mxu0 (!%p140_p2), %v1074_v1  ;;  %1011 = vmatprep.subr.bf16.mxu1 (!%p140_p2), %v1074_v1 }
   0xd   : > { %s1530_s16 = smov (!%p165_p3, %s984_s16), 127 }
   0xe   : > { %s1008_s23 = sshll.u32 %s1530_s16, 4  ;;  %s988_s29 = sshll.u32 %s1530_s16, 3 }
   0xf   : > { %510 = vmatpush1.bf16.msra.mxu0 %v1052_v3  ;;  %1027 = vmatpush1.bf16.msra.mxu1 %v1052_v3  ;;  %s1129_s26 = scalar_lea.vmem %s1525_s0, %s1008_s23  ;;  %s1330_s4 = scalar_lea.vmem %s1528_s3, %s988_s29 }
  0x10   : > { %511 = vmatprep.subr.bf16.mxu0 %v1074_v1  ;;  %1012 = vmatprep.subr.bf16.mxu1 %v1074_v1  ;;  %v179_v6 = vld [vmem:[%s1129_s26 + $0x8] sm:$0xff]  ;;  %v181_v7 = vld [vmem:[%s1129_s26 + $0x18] sm:$0xff]  ;;  %v178_v23 = vld [vmem:[%s1129_s26] sm:$0xff] }
  0x11   : > { %v243_v8 = vld [vmem:[%s1129_s26 + $0x208] sm:$0xff]  ;;  %v307_v9 = vpack.c.bf16 %v181_v7, %v179_v6  ;;  %v245_v10 = vld [vmem:[%s1129_s26 + $0x218] sm:$0xff]  ;;  %v180_v24 = vld [vmem:[%s1129_s26 + $0x10] sm:$0xff] }
  0x12   : > { %v339_v12 = vpack.c.bf16 %v245_v10, %v243_v8  ;;  %v242_v25 = vld [vmem:[%s1129_s26 + $0x200] sm:$0xff]  ;;  %v244_v26 = vld [vmem:[%s1129_s26 + $0x210] sm:$0xff]  ;;  %v183_v27 = vld [vmem:[%s1129_s26 + $0x28] sm:$0xff]  ;;  %v306_v31 = vpack.c.bf16 %v180_v24, %v178_v23 }
  0x13   : > { %512 = vmatpush1.bf16.msra.mxu0 %v1053_v4  ;;  %1028 = vmatpush1.bf16.msra.mxu1 %v1053_v4  ;;  %v185_v28 = vld [vmem:[%s1129_s26 + $0x38] sm:$0xff]  ;;  %v247_v29 = vld [vmem:[%s1129_s26 + $0x228] sm:$0xff]  ;;  %v338_v32 = vpack.c.bf16 %v244_v26, %v242_v25  ;;  %v182_v35 = vld [vmem:[%s1129_s26 + $0x20] sm:$0xff] }
  0x14   : > { %513 = vmatprep.subr.bf16.mxu0 %v1074_v1  ;;  %1013 = vmatprep.subr.bf16.mxu1 %v1074_v1  ;;  %v249_v30 = vld [vmem:[%s1129_s26 + $0x238] sm:$0xff]  ;;  %v309_v33 = vpack.c.bf16 %v185_v28, %v183_v27  ;;  %v184_v36 = vld [vmem:[%s1129_s26 + $0x30] sm:$0xff]  ;;  %v246_v37 = vld [vmem:[%s1129_s26 + $0x220] sm:$0xff] }
  0x15   : > { %537 = vmatprep.mubr.bf16.mxu0 %v307_v9  ;;  %665 = vmatprep.mubr.bf16.mxu1 %v339_v12  ;;  %v341_v34 = vpack.c.bf16 %v249_v30, %v247_v29  ;;  %v248_v38 = vld [vmem:[%s1129_s26 + $0x230] sm:$0xff]  ;;  %v187_v39 = vld [vmem:[%s1129_s26 + $0x48] sm:$0xff]  ;;  %v189_v40 = vld [vmem:[%s1129_s26 + $0x58] sm:$0xff]  ;;  %v308_v43 = vpack.c.bf16 %v184_v36, %v182_v35 }
  0x16   : > { %v251_v41 = vld [vmem:[%s1129_s26 + $0x248] sm:$0xff]  ;;  %v253_v42 = vld [vmem:[%s1129_s26 + $0x258] sm:$0xff]  ;;  %v340_v44 = vpack.c.bf16 %v248_v38, %v246_v37  ;;  %v311_v45 = vpack.c.bf16 %v189_v40, %v187_v39  ;;  %v186_v47 = vld [vmem:[%s1129_s26 + $0x40] sm:$0xff] }
  0x17   : > { %514 = vmatpush1.bf16.msra.mxu0 %v1054_v5  ;;  %1029 = vmatpush1.bf16.msra.mxu1 %v1054_v5  ;;  %v343_v46 = vpack.c.bf16 %v253_v42, %v251_v41  ;;  %v188_v48 = vld [vmem:[%s1129_s26 + $0x50] sm:$0xff]  ;;  %v250_v49 = vld [vmem:[%s1129_s26 + $0x240] sm:$0xff]  ;;  %v191_v51 = vld [vmem:[%s1129_s26 + $0x68] sm:$0xff] }
  0x18   : > { %515 = vmatprep.subr.bf16.mxu0 %v1074_v1  ;;  %1014 = vmatprep.subr.bf16.mxu1 %v1074_v1  ;;  %v252_v50 = vld [vmem:[%s1129_s26 + $0x250] sm:$0xff]  ;;  %v193_v52 = vld [vmem:[%s1129_s26 + $0x78] sm:$0xff]  ;;  %v255_v53 = vld [vmem:[%s1129_s26 + $0x268] sm:$0xff]  ;;  %v310_v55 = vpack.c.bf16 %v188_v48, %v186_v47 }
  0x19   : > { %v257_v54 = vld [vmem:[%s1129_s26 + $0x278] sm:$0xff]  ;;  %v342_v56 = vpack.c.bf16 %v252_v50, %v250_v49  ;;  %v313_v57 = vpack.c.bf16 %v193_v52, %v191_v51  ;;  %v190_v59 = vld [vmem:[%s1129_s26 + $0x60] sm:$0xff]  ;;  %v192_v60 = vld [vmem:[%s1129_s26 + $0x70] sm:$0xff] }
  0x1a   : > { %v345_v58 = vpack.c.bf16 %v257_v54, %v255_v53  ;;  %v254_v61 = vld [vmem:[%s1129_s26 + $0x260] sm:$0xff]  ;;  %v256_v62 = vld [vmem:[%s1129_s26 + $0x270] sm:$0xff]  ;;  %v195_v63 = vld [vmem:[%s1129_s26 + $0x88] sm:$0xff]  ;;  %v312_v3 = vpack.c.bf16 %v192_v60, %v190_v59 }
  0x1b   : > { %516 = vmatpush1.bf16.msra.mxu0 %v1055_v11  ;;  %1030 = vmatpush1.bf16.msra.mxu1 %v1055_v11  ;;  %v197_v0 = vld [vmem:[%s1129_s26 + $0x98] sm:$0xff]  ;;  %v344_v4 = vpack.c.bf16 %v256_v62, %v254_v61  ;;  %v194_v7 = vld [vmem:[%s1129_s26 + $0x80] sm:$0xff]  ;;  %v196_v8 = vld [vmem:[%s1129_s26 + $0x90] sm:$0xff] }
  0x1c   : > { %517 = vmatprep.subr.bf16.mxu0 %v1074_v1  ;;  %1015 = vmatprep.subr.bf16.mxu1 %v1074_v1  ;;  %v261_v2 = vld [vmem:[%s1129_s26 + $0x298] sm:$0xff]  ;;  %v315_v5 = vpack.c.bf16 %v197_v0, %v195_v63  ;;  %v258_v9 = vld [vmem:[%s1129_s26 + $0x280] sm:$0xff]  ;;  %v260_v10 = vld [vmem:[%s1129_s26 + $0x290] sm:$0xff] }
  0x1d   : > { %v199_v11 = vld [vmem:[%s1129_s26 + $0xa8] sm:$0xff]  ;;  %v201_v12 = vld [vmem:[%s1129_s26 + $0xb8] sm:$0xff] }
  0x1e   : > { %v203_v23 = vld [vmem:[%s1129_s26 + $0xc8] sm:$0xff]  ;;  %v205_v24 = vld [vmem:[%s1129_s26 + $0xd8] sm:$0xff] }
  0x1f   : > { %518 = vmatpush1.bf16.msra.mxu0 %v1056_v13  ;;  %1031 = vmatpush1.bf16.msra.mxu1 %v1056_v13  ;;  %v263_v13 = vld [vmem:[%s1129_s26 + $0x2a8] sm:$0xff]  ;;  %v269_v26 = vld [vmem:[%s1129_s26 + $0x2d8] sm:$0xff]  ;;  %v319_v29 = vpack.c.bf16 %v205_v24, %v203_v23 }
  0x20   : > { %519 = vmatprep.subr.bf16.mxu0 %v1074_v1  ;;  %1016 = vmatprep.subr.bf16.mxu1 %v1074_v1  ;;  %v267_v25 = vld [vmem:[%s1129_s26 + $0x2c8] sm:$0xff]  ;;  %v209_v36 = vld [vmem:[%s1129_s26 + $0xf8] sm:$0xff] }
  0x21   : > { %v351_v30 = vpack.c.bf16 %v269_v26, %v267_v25  ;;  %v207_v35 = vld [vmem:[%s1129_s26 + $0xe8] sm:$0xff]  ;;  %v273_v38 = vld [vmem:[%s1129_s26 + $0x2f8] sm:$0xff] }
  0x22   : > { %v271_v37 = vld [vmem:[%s1129_s26 + $0x2e8] sm:$0xff]  ;;  %v321_v41 = vpack.c.bf16 %v209_v36, %v207_v35  ;;  %v213_v48 = vld [vmem:[%s1129_s26 + $0x118] sm:$0xff] }
  0x23   : > { %520 = vmatpush1.bf16.msra.mxu0 %v1057_v14  ;;  %1032 = vmatpush1.bf16.msra.mxu1 %v1057_v14  ;;  %v265_v14 = vld [vmem:[%s1129_s26 + $0x2b8] sm:$0xff]  ;;  %v353_v42 = vpack.c.bf16 %v273_v38, %v271_v37  ;;  %v211_v47 = vld [vmem:[%s1129_s26 + $0x108] sm:$0xff] }
  0x24   : > { %521 = vmatprep.subr.bf16.mxu0 %v1074_v1  ;;  %1017 = vmatprep.subr.bf16.mxu1 %v1074_v1  ;;  %v275_v49 = vld [vmem:[%s1129_s26 + $0x308] sm:$0xff]  ;;  %v277_v50 = vld [vmem:[%s1129_s26 + $0x318] sm:$0xff]  ;;  %v323_v53 = vpack.c.bf16 %v213_v48, %v211_v47 }
  0x25   : > { %v355_v54 = vpack.c.bf16 %v277_v50, %v275_v49  ;;  %v215_v59 = vld [vmem:[%s1129_s26 + $0x128] sm:$0xff]  ;;  %v217_v60 = vld [vmem:[%s1129_s26 + $0x138] sm:$0xff] }
  0x26   : > { %v279_v61 = vld [vmem:[%s1129_s26 + $0x328] sm:$0xff]  ;;  %v281_v62 = vld [vmem:[%s1129_s26 + $0x338] sm:$0xff] }
  0x27   : > { %522 = vmatpush1.bf16.msra.mxu0 %v1058_v15  ;;  %1033 = vmatpush1.bf16.msra.mxu1 %v1058_v15  ;;  %v314_v15 = vpack.c.bf16 %v196_v8, %v194_v7  ;;  %v219_v7 = vld [vmem:[%s1129_s26 + $0x148] sm:$0xff]  ;;  %v221_v8 = vld [vmem:[%s1129_s26 + $0x158] sm:$0xff] }
  0x28   : > { %523 = vmatprep.subr.bf16.mxu0 %v1074_v1  ;;  %1018 = vmatprep.subr.bf16.mxu1 %v1074_v1 }
  0x2b   : > { %524 = vmatpush1.bf16.msra.mxu0 %v1059_v16  ;;  %1034 = vmatpush1.bf16.msra.mxu1 %v1059_v16  ;;  %v346_v16 = vpack.c.bf16 %v260_v10, %v258_v9  ;;  %v283_v9 = vld [vmem:[%s1129_s26 + $0x348] sm:$0xff]  ;;  %v285_v10 = vld [vmem:[%s1129_s26 + $0x358] sm:$0xff] }
  0x2c   : > { %525 = vmatprep.subr.bf16.mxu0 %v1074_v1  ;;  %1019 = vmatprep.subr.bf16.mxu1 %v1074_v1 }
  0x2f   : > { %526 = vmatpush1.bf16.msra.mxu0 %v1060_v17  ;;  %1035 = vmatpush1.bf16.msra.mxu1 %v1060_v17  ;;  %v317_v17 = vpack.c.bf16 %v201_v12, %v199_v11 }
  0x30   : > { %527 = vmatprep.subr.bf16.mxu0 %v1074_v1  ;;  %1020 = vmatprep.subr.bf16.mxu1 %v1074_v1 }
  0x33   : > { %528 = vmatpush1.bf16.msra.mxu0 %v1061_v18  ;;  %1036 = vmatpush1.bf16.msra.mxu1 %v1061_v18  ;;  %v349_v18 = vpack.c.bf16 %v265_v14, %v263_v13  ;;  %v327_v13 = vpack.c.bf16 %v221_v8, %v219_v7  ;;  %v359_v14 = vpack.c.bf16 %v285_v10, %v283_v9 }
  0x34   : > { %529 = vmatprep.subr.bf16.mxu0 %v1074_v1  ;;  %1021 = vmatprep.subr.bf16.mxu1 %v1074_v1 }
  0x37   : > { %530 = vmatpush1.bf16.msra.mxu0 %v1062_v19  ;;  %1037 = vmatpush1.bf16.msra.mxu1 %v1062_v19  ;;  %v198_v19 = vld [vmem:[%s1129_s26 + $0xa0] sm:$0xff] }
  0x38   : > { %531 = vmatprep.subr.bf16.mxu0 %v1074_v1  ;;  %1022 = vmatprep.subr.bf16.mxu1 %v1074_v1 }
  0x3b   : > { %532 = vmatpush1.bf16.msra.mxu0 %v1063_v20  ;;  %1038 = vmatpush1.bf16.msra.mxu1 %v1063_v20  ;;  %v200_v20 = vld [vmem:[%s1129_s26 + $0xb0] sm:$0xff] }
  0x3c   : > { %533 = vmatprep.subr.bf16.mxu0 %v1074_v1  ;;  %1023 = vmatprep.subr.bf16.mxu1 %v1074_v1  ;;  %v316_v27 = vpack.c.bf16 %v200_v20, %v198_v19  ;;  %v223_v19 = vld [vmem:[%s1129_s26 + $0x168] sm:$0xff]  ;;  %v225_v20 = vld [vmem:[%s1129_s26 + $0x178] sm:$0xff] }
  0x3d   : > { %v329_v25 = vpack.c.bf16 %v225_v20, %v223_v19 }
  0x3f   : > { %534 = vmatpush1.bf16.msra.mxu0 %v1064_v21  ;;  %1039 = vmatpush1.bf16.msra.mxu1 %v1064_v21  ;;  %v262_v21 = vld [vmem:[%s1129_s26 + $0x2a0] sm:$0xff] }
  0x40   : > { %535 = vmatprep.subr.bf16.mxu0 %v1074_v1  ;;  %1024 = vmatprep.subr.bf16.mxu1 %v1074_v1  ;;  %v259_v1 = vld [vmem:[%s1129_s26 + $0x288] sm:$0xff] }
  0x41   : > { %v347_v6 = vpack.c.bf16 %v261_v2, %v259_v1  ;;  %v325_v1 = vpack.c.bf16 %v217_v60, %v215_v59  ;;  %v357_v2 = vpack.c.bf16 %v281_v62, %v279_v61 }
  0x43   : > { %536 = vmatpush1.bf16.msra.mxu0 %v1065_v22  ;;  %1040 = vmatpush1.bf16.msra.mxu1 %v1065_v22  ;;  %v264_v22 = vld [vmem:[%s1129_s26 + $0x2b0] sm:$0xff] }
  0x44   : > { %v348_v28 = vpack.c.bf16 %v264_v22, %v262_v21  ;;  %v287_v21 = vld [vmem:[%s1129_s26 + $0x368] sm:$0xff]  ;;  %v289_v22 = vld [vmem:[%s1129_s26 + $0x378] sm:$0xff] }
  0x45   : > { %v361_v26 = vpack.c.bf16 %v289_v22, %v287_v21 }
  0x46   : > { %538 = vmatmul.mubr.bf16.vlgmr.msra.gmra.mrb[0].mxu0 %v306_v31  ;;  %666 = vmatmul.mubr.bf16.vlgmr.msra.gmra.mrb[0].mxu1 %v338_v32  ;;  %v202_v31 = vld [vmem:[%s1129_s26 + $0xc0] sm:$0xff]  ;;  %v204_v32 = vld [vmem:[%s1129_s26 + $0xd0] sm:$0xff] }
  0x47   : > { %545 = vmatprep.mubr.bf16.mxu0 %v309_v33  ;;  %673 = vmatprep.mubr.bf16.mxu1 %v341_v34  ;;  %v266_v33 = vld [vmem:[%s1129_s26 + $0x2c0] sm:$0xff]  ;;  %v268_v34 = vld [vmem:[%s1129_s26 + $0x2d0] sm:$0xff]  ;;  %v318_v39 = vpack.c.bf16 %v204_v32, %v202_v31  ;;  %v227_v31 = vld [vmem:[%s1129_s26 + $0x188] sm:$0xff] }
  0x48   : > { %v350_v40 = vpack.c.bf16 %v268_v34, %v266_v33  ;;  %v229_v32 = vld [vmem:[%s1129_s26 + $0x198] sm:$0xff]  ;;  %v291_v33 = vld [vmem:[%s1129_s26 + $0x388] sm:$0xff] }
  0x49   : > { %v293_v34 = vld [vmem:[%s1129_s26 + $0x398] sm:$0xff]  ;;  %v331_v37 = vpack.c.bf16 %v229_v32, %v227_v31 }
  0x4a   : > { %v363_v38 = vpack.c.bf16 %v293_v34, %v291_v33 }
  0x4e   : > { %546 = vmatmul.mubr.bf16.gmra.mrb[4].mxu0 %v308_v43  ;;  %674 = vmatmul.mubr.bf16.gmra.mrb[4].mxu1 %v340_v44  ;;  %v206_v43 = vld [vmem:[%s1129_s26 + $0xe0] sm:$0xff]  ;;  %v208_v44 = vld [vmem:[%s1129_s26 + $0xf0] sm:$0xff] }
  0x4f   : > { %553 = vmatprep.mubr.bf16.mxu0 %v311_v45  ;;  %681 = vmatprep.mubr.bf16.mxu1 %v343_v46  ;;  %v270_v45 = vld [vmem:[%s1129_s26 + $0x2e0] sm:$0xff]  ;;  %v272_v46 = vld [vmem:[%s1129_s26 + $0x2f0] sm:$0xff]  ;;  %v320_v51 = vpack.c.bf16 %v208_v44, %v206_v43  ;;  %v231_v43 = vld [vmem:[%s1129_s26 + $0x1a8] sm:$0xff] }
  0x50   : > { %v352_v52 = vpack.c.bf16 %v272_v46, %v270_v45  ;;  %v233_v44 = vld [vmem:[%s1129_s26 + $0x1b8] sm:$0xff]  ;;  %v295_v45 = vld [vmem:[%s1129_s26 + $0x3a8] sm:$0xff] }
  0x51   : > { %v297_v46 = vld [vmem:[%s1129_s26 + $0x3b8] sm:$0xff]  ;;  %v333_v49 = vpack.c.bf16 %v233_v44, %v231_v43 }
  0x52   : > { %v365_v50 = vpack.c.bf16 %v297_v46, %v295_v45 }
  0x56   : > { %554 = vmatmul.mubr.bf16.gmra.mrb[8].mxu0 %v310_v55  ;;  %682 = vmatmul.mubr.bf16.gmra.mrb[8].mxu1 %v342_v56  ;;  %v210_v55 = vld [vmem:[%s1129_s26 + $0x100] sm:$0xff]  ;;  %v212_v56 = vld [vmem:[%s1129_s26 + $0x110] sm:$0xff] }
  0x57   : > { %561 = vmatprep.mubr.bf16.mxu0 %v313_v57  ;;  %689 = vmatprep.mubr.bf16.mxu1 %v345_v58  ;;  %v274_v57 = vld [vmem:[%s1129_s26 + $0x300] sm:$0xff]  ;;  %v276_v58 = vld [vmem:[%s1129_s26 + $0x310] sm:$0xff]  ;;  %v322_v63 = vpack.c.bf16 %v212_v56, %v210_v55  ;;  %v235_v55 = vld [vmem:[%s1129_s26 + $0x1c8] sm:$0xff] }
  0x58   : > { %v354_v0 = vpack.c.bf16 %v276_v58, %v274_v57  ;;  %v237_v56 = vld [vmem:[%s1129_s26 + $0x1d8] sm:$0xff]  ;;  %v299_v57 = vld [vmem:[%s1129_s26 + $0x3c8] sm:$0xff] }
  0x59   : > { %v301_v58 = vld [vmem:[%s1129_s26 + $0x3d8] sm:$0xff]  ;;  %v335_v61 = vpack.c.bf16 %v237_v56, %v235_v55 }
  0x5a   : > { %v367_v62 = vpack.c.bf16 %v301_v58, %v299_v57 }
  0x5e   : > { %562 = vmatmul.mubr.bf16.gmra.mrb[12].mxu0 %v312_v3  ;;  %690 = vmatmul.mubr.bf16.gmra.mrb[12].mxu1 %v344_v4  ;;  %v214_v3 = vld [vmem:[%s1129_s26 + $0x120] sm:$0xff]  ;;  %v216_v4 = vld [vmem:[%s1129_s26 + $0x130] sm:$0xff] }
  0x5f   : > { %569 = vmatprep.mubr.bf16.mxu0 %v315_v5  ;;  %697 = vmatprep.mubr.bf16.mxu1 %v347_v6  ;;  %v278_v5 = vld [vmem:[%s1129_s26 + $0x320] sm:$0xff]  ;;  %v280_v6 = vld [vmem:[%s1129_s26 + $0x330] sm:$0xff]  ;;  %v324_v11 = vpack.c.bf16 %v216_v4, %v214_v3  ;;  %v239_v3 = vld [vmem:[%s1129_s26 + $0x1e8] sm:$0xff] }
  0x60   : > { %v356_v12 = vpack.c.bf16 %v280_v6, %v278_v5  ;;  %v241_v4 = vld [vmem:[%s1129_s26 + $0x1f8] sm:$0xff]  ;;  %v303_v5 = vld [vmem:[%s1129_s26 + $0x3e8] sm:$0xff] }
  0x61   : > { %v305_v6 = vld [vmem:[%s1129_s26 + $0x3f8] sm:$0xff]  ;;  %v337_v9 = vpack.c.bf16 %v241_v4, %v239_v3 }
  0x62   : > { %v369_v10 = vpack.c.bf16 %v305_v6, %v303_v5 }
  0x66   : > { %570 = vmatmul.mubr.bf16.gmra.mrb[16].mxu0 %v314_v15  ;;  %698 = vmatmul.mubr.bf16.gmra.mrb[16].mxu1 %v346_v16  ;;  %v218_v15 = vld [vmem:[%s1129_s26 + $0x140] sm:$0xff]  ;;  %v220_v16 = vld [vmem:[%s1129_s26 + $0x150] sm:$0xff] }
  0x67   : > { %577 = vmatprep.mubr.bf16.mxu0 %v317_v17  ;;  %705 = vmatprep.mubr.bf16.mxu1 %v349_v18  ;;  %v282_v17 = vld [vmem:[%s1129_s26 + $0x340] sm:$0xff]  ;;  %v284_v18 = vld [vmem:[%s1129_s26 + $0x350] sm:$0xff]  ;;  %v326_v23 = vpack.c.bf16 %v220_v16, %v218_v15 }
  0x68   : > { %v358_v24 = vpack.c.bf16 %v284_v18, %v282_v17  ;;  %v1322_v17 = vld [vmem:[%s1527_s2] ss:$0 sm:$0xff] }
  0x6e   : > { %578 = vmatmul.mubr.bf16.gmra.mrb[20].mxu0 %v316_v27  ;;  %706 = vmatmul.mubr.bf16.gmra.mrb[20].mxu1 %v348_v28  ;;  %v222_v27 = vld [vmem:[%s1129_s26 + $0x160] sm:$0xff]  ;;  %v224_v28 = vld [vmem:[%s1129_s26 + $0x170] sm:$0xff] }
  0x6f   : > { %585 = vmatprep.mubr.bf16.mxu0 %v319_v29  ;;  %713 = vmatprep.mubr.bf16.mxu1 %v351_v30  ;;  %v286_v29 = vld [vmem:[%s1129_s26 + $0x360] sm:$0xff]  ;;  %v288_v30 = vld [vmem:[%s1129_s26 + $0x370] sm:$0xff]  ;;  %v328_v35 = vpack.c.bf16 %v224_v28, %v222_v27 }
  0x70   : > { %v360_v36 = vpack.c.bf16 %v288_v30, %v286_v29 }
  0x76   : > { %586 = vmatmul.mubr.bf16.gmra.mrb[24].mxu0 %v318_v39  ;;  %714 = vmatmul.mubr.bf16.gmra.mrb[24].mxu1 %v350_v40  ;;  %v226_v39 = vld [vmem:[%s1129_s26 + $0x180] sm:$0xff]  ;;  %v228_v40 = vld [vmem:[%s1129_s26 + $0x190] sm:$0xff] }
  0x77   : > { %593 = vmatprep.mubr.bf16.mxu0 %v321_v41  ;;  %721 = vmatprep.mubr.bf16.mxu1 %v353_v42  ;;  %v290_v41 = vld [vmem:[%s1129_s26 + $0x380] sm:$0xff]  ;;  %v292_v42 = vld [vmem:[%s1129_s26 + $0x390] sm:$0xff]  ;;  %v330_v47 = vpack.c.bf16 %v228_v40, %v226_v39 }
  0x78   : > { %v362_v48 = vpack.c.bf16 %v292_v42, %v290_v41 }
  0x7e   : > { %594 = vmatmul.mubr.bf16.gmra.mrb[28].mxu0 %v320_v51  ;;  %722 = vmatmul.mubr.bf16.gmra.mrb[28].mxu1 %v352_v52  ;;  %v230_v51 = vld [vmem:[%s1129_s26 + $0x1a0] sm:$0xff]  ;;  %v232_v52 = vld [vmem:[%s1129_s26 + $0x1b0] sm:$0xff] }
  0x7f   : > { %601 = vmatprep.mubr.bf16.mxu0 %v323_v53  ;;  %729 = vmatprep.mubr.bf16.mxu1 %v355_v54  ;;  %v294_v53 = vld [vmem:[%s1129_s26 + $0x3a0] sm:$0xff]  ;;  %v296_v54 = vld [vmem:[%s1129_s26 + $0x3b0] sm:$0xff]  ;;  %v332_v59 = vpack.c.bf16 %v232_v52, %v230_v51 }
  0x80   : > { %v364_v60 = vpack.c.bf16 %v296_v54, %v294_v53 }
  0x86   : > { %602 = vmatmul.mubr.bf16.gmra.mrb[32].mxu0 %v322_v63  ;;  %730 = vmatmul.mubr.bf16.gmra.mrb[32].mxu1 %v354_v0  ;;  %v234_v63 = vld [vmem:[%s1129_s26 + $0x1c0] sm:$0xff]  ;;  %v236_v0 = vld [vmem:[%s1129_s26 + $0x1d0] sm:$0xff] }
  0x87   : > { %609 = vmatprep.mubr.bf16.mxu0 %v325_v1  ;;  %737 = vmatprep.mubr.bf16.mxu1 %v357_v2  ;;  %v298_v1 = vld [vmem:[%s1129_s26 + $0x3c0] sm:$0xff]  ;;  %v300_v2 = vld [vmem:[%s1129_s26 + $0x3d0] sm:$0xff]  ;;  %v334_v7 = vpack.c.bf16 %v236_v0, %v234_v63 }
  0x88   : > { %v366_v8 = vpack.c.bf16 %v300_v2, %v298_v1 }
  0x8e   : > { %610 = vmatmul.mubr.bf16.gmra.mrb[36].mxu0 %v324_v11  ;;  %738 = vmatmul.mubr.bf16.gmra.mrb[36].mxu1 %v356_v12  ;;  %v238_v11 = vld [vmem:[%s1129_s26 + $0x1e0] sm:$0xff]  ;;  %v240_v12 = vld [vmem:[%s1129_s26 + $0x1f0] sm:$0xff] }
  0x8f   : > { %617 = vmatprep.mubr.bf16.mxu0 %v327_v13  ;;  %745 = vmatprep.mubr.bf16.mxu1 %v359_v14  ;;  %v302_v13 = vld [vmem:[%s1129_s26 + $0x3e0] sm:$0xff]  ;;  %v304_v14 = vld [vmem:[%s1129_s26 + $0x3f0] sm:$0xff]  ;;  %v336_v15 = vpack.c.bf16 %v240_v12, %v238_v11 }
  0x90   : > { %v368_v16 = vpack.c.bf16 %v304_v14, %v302_v13 }
  0x96   : > { %618 = vmatmul.mubr.bf16.gmra.mrb[40].mxu0 %v326_v23  ;;  %746 = vmatmul.mubr.bf16.gmra.mrb[40].mxu1 %v358_v24 }
  0x97   : > { %625 = vmatprep.mubr.bf16.mxu0 %v329_v25  ;;  %753 = vmatprep.mubr.bf16.mxu1 %v361_v26 }
  0x9e   : > { %626 = vmatmul.mubr.bf16.gmra.mrb[44].mxu0 %v328_v35  ;;  %754 = vmatmul.mubr.bf16.gmra.mrb[44].mxu1 %v360_v36 }
  0x9f   : > { %633 = vmatprep.mubr.bf16.mxu0 %v331_v37  ;;  %761 = vmatprep.mubr.bf16.mxu1 %v363_v38 }
  0xa6   : > { %634 = vmatmul.mubr.bf16.gmra.mrb[48].mxu0 %v330_v47  ;;  %762 = vmatmul.mubr.bf16.gmra.mrb[48].mxu1 %v362_v48 }
  0xa7   : > { %641 = vmatprep.mubr.bf16.mxu0 %v333_v49  ;;  %769 = vmatprep.mubr.bf16.mxu1 %v365_v50 }
  0xae   : > { %642 = vmatmul.mubr.bf16.gmra.mrb[52].mxu0 %v332_v59  ;;  %770 = vmatmul.mubr.bf16.gmra.mrb[52].mxu1 %v364_v60 }
  0xaf   : > { %649 = vmatprep.mubr.bf16.mxu0 %v335_v61  ;;  %777 = vmatprep.mubr.bf16.mxu1 %v367_v62 }
  0xb6   : > { %650 = vmatmul.mubr.bf16.gmra.mrb[56].mxu0 %v334_v7  ;;  %778 = vmatmul.mubr.bf16.gmra.mrb[56].mxu1 %v366_v8 }
  0xb7   : > { %657 = vmatprep.mubr.bf16.mxu0 %v337_v9  ;;  %785 = vmatprep.mubr.bf16.mxu1 %v369_v10 }
  0xbe   : > { %658 = vmatmul.mubr.bf16.gmra.mrb[60].mxu0 %v336_v15  ;;  %786 = vmatmul.mubr.bf16.gmra.mrb[60].mxu1 %v368_v16 }
 0x119   : > { %v539_v18 = vpop.f32.mrb[0].mxu0  ;;  %v667_v19 = vpop.f32.mrb[0].mxu1 }
 0x11a   : > { %v540_v20 = vadd.f32 %v1322_v17, %v539_v18  ;;  %v668_v21 = vadd.f32 %v1322_v17, %v667_v19  ;;  %v541_v22 = vpop.f32.mrb[1].mxu0  ;;  %v669_v23 = vpop.f32.mrb[1].mxu1 }
 0x11b   : > { %v542_v24 = vpop.f32.mrb[2].mxu0  ;;  %v670_v25 = vpop.f32.mrb[2].mxu1 }
 0x11c   : > { %v794_v26 = vmax.f32 %v540_v20, 0.0  ;;  %v826_v27 = vmax.f32 %v668_v21, 0.0  ;;  %v543_v28 = vadd.f32 %v1322_v17, %v542_v24  ;;  %v671_v29 = vadd.f32 %v1322_v17, %v670_v25  ;;  %v544_v30 = vpop.f32.mrb[3].mxu0  ;;  %v672_v31 = vpop.f32.mrb[3].mxu1 }
 0x11e   : > { %859 = vst.msk [vmem:[%s1330_s4] sm:$0xff] %vm858_vm0, %v794_v26  ;;  %891 = vst.msk [vmem:[%s1330_s4 + $0x100] sm:$0xff] %vm858_vm0, %v826_v27  ;;  %v795_v32 = vmax.f32 %v543_v28, 0.0  ;;  %v827_v33 = vmax.f32 %v671_v29, 0.0 }
 0x120   : > { %860 = vst.msk [vmem:[%s1330_s4 + $0x8] sm:$0xff] %vm858_vm0, %v795_v32  ;;  %892 = vst.msk [vmem:[%s1330_s4 + $0x108] sm:$0xff] %vm858_vm0, %v827_v33 }
 0x121   : > { %v547_v34 = vpop.f32.mrb[4].mxu0  ;;  %v675_v35 = vpop.f32.mrb[4].mxu1 }
 0x122   : > { %v548_v36 = vadd.f32 %v1322_v17, %v547_v34  ;;  %v676_v37 = vadd.f32 %v1322_v17, %v675_v35  ;;  %v549_v38 = vpop.f32.mrb[5].mxu0  ;;  %v677_v39 = vpop.f32.mrb[5].mxu1 }
 0x123   : > { %v550_v40 = vpop.f32.mrb[6].mxu0  ;;  %v678_v41 = vpop.f32.mrb[6].mxu1 }
 0x124   : > { %v796_v42 = vmax.f32 %v548_v36, 0.0  ;;  %v828_v43 = vmax.f32 %v676_v37, 0.0  ;;  %v551_v44 = vadd.f32 %v1322_v17, %v550_v40  ;;  %v679_v45 = vadd.f32 %v1322_v17, %v678_v41  ;;  %v552_v46 = vpop.f32.mrb[7].mxu0  ;;  %v680_v47 = vpop.f32.mrb[7].mxu1 }
 0x126   : > { %861 = vst.msk [vmem:[%s1330_s4 + $0x10] sm:$0xff] %vm858_vm0, %v796_v42  ;;  %893 = vst.msk [vmem:[%s1330_s4 + $0x110] sm:$0xff] %vm858_vm0, %v828_v43  ;;  %v797_v48 = vmax.f32 %v551_v44, 0.0  ;;  %v829_v49 = vmax.f32 %v679_v45, 0.0 }
 0x128   : > { %862 = vst.msk [vmem:[%s1330_s4 + $0x18] sm:$0xff] %vm858_vm0, %v797_v48  ;;  %894 = vst.msk [vmem:[%s1330_s4 + $0x118] sm:$0xff] %vm858_vm0, %v829_v49 }
 0x129   : > { %v555_v50 = vpop.f32.mrb[8].mxu0  ;;  %v683_v51 = vpop.f32.mrb[8].mxu1 }
 0x12a   : > { %v556_v52 = vadd.f32 %v1322_v17, %v555_v50  ;;  %v684_v53 = vadd.f32 %v1322_v17, %v683_v51  ;;  %v557_v54 = vpop.f32.mrb[9].mxu0  ;;  %v685_v55 = vpop.f32.mrb[9].mxu1 }
 0x12b   : > { %v558_v56 = vpop.f32.mrb[10].mxu0  ;;  %v686_v57 = vpop.f32.mrb[10].mxu1 }
 0x12c   : > { %v798_v58 = vmax.f32 %v556_v52, 0.0  ;;  %v830_v59 = vmax.f32 %v684_v53, 0.0  ;;  %v559_v60 = vadd.f32 %v1322_v17, %v558_v56  ;;  %v687_v61 = vadd.f32 %v1322_v17, %v686_v57  ;;  %v560_v62 = vpop.f32.mrb[11].mxu0  ;;  %v688_v63 = vpop.f32.mrb[11].mxu1 }
 0x12e   : > { %863 = vst.msk [vmem:[%s1330_s4 + $0x20] sm:$0xff] %vm858_vm0, %v798_v58  ;;  %895 = vst.msk [vmem:[%s1330_s4 + $0x120] sm:$0xff] %vm858_vm0, %v830_v59  ;;  %v799_v0 = vmax.f32 %v559_v60, 0.0  ;;  %v831_v1 = vmax.f32 %v687_v61, 0.0 }
 0x130   : > { %864 = vst.msk [vmem:[%s1330_s4 + $0x28] sm:$0xff] %vm858_vm0, %v799_v0  ;;  %896 = vst.msk [vmem:[%s1330_s4 + $0x128] sm:$0xff] %vm858_vm0, %v831_v1 }
 0x131   : > { %v563_v2 = vpop.f32.mrb[12].mxu0  ;;  %v691_v3 = vpop.f32.mrb[12].mxu1 }
 0x132   : > { %v564_v4 = vadd.f32 %v1322_v17, %v563_v2  ;;  %v692_v5 = vadd.f32 %v1322_v17, %v691_v3  ;;  %v565_v6 = vpop.f32.mrb[13].mxu0  ;;  %v693_v7 = vpop.f32.mrb[13].mxu1 }
 0x133   : > { %v566_v8 = vpop.f32.mrb[14].mxu0  ;;  %v694_v9 = vpop.f32.mrb[14].mxu1 }
 0x134   : > { %v800_v10 = vmax.f32 %v564_v4, 0.0  ;;  %v832_v11 = vmax.f32 %v692_v5, 0.0  ;;  %v567_v12 = vadd.f32 %v1322_v17, %v566_v8  ;;  %v695_v13 = vadd.f32 %v1322_v17, %v694_v9  ;;  %v568_v14 = vpop.f32.mrb[15].mxu0  ;;  %v696_v15 = vpop.f32.mrb[15].mxu1 }
 0x136   : > { %865 = vst.msk [vmem:[%s1330_s4 + $0x30] sm:$0xff] %vm858_vm0, %v800_v10  ;;  %897 = vst.msk [vmem:[%s1330_s4 + $0x130] sm:$0xff] %vm858_vm0, %v832_v11  ;;  %v801_v16 = vmax.f32 %v567_v12, 0.0  ;;  %v833_v18 = vmax.f32 %v695_v13, 0.0 }
 0x138   : > { %866 = vst.msk [vmem:[%s1330_s4 + $0x38] sm:$0xff] %vm858_vm0, %v801_v16  ;;  %898 = vst.msk [vmem:[%s1330_s4 + $0x138] sm:$0xff] %vm858_vm0, %v833_v18 }
 0x139   : > { %v571_v19 = vpop.f32.mrb[16].mxu0  ;;  %v699_v20 = vpop.f32.mrb[16].mxu1 }
 0x13a   : > { %v572_v21 = vadd.f32 %v1322_v17, %v571_v19  ;;  %v700_v22 = vadd.f32 %v1322_v17, %v699_v20  ;;  %v573_v23 = vpop.f32.mrb[17].mxu0  ;;  %v701_v24 = vpop.f32.mrb[17].mxu1 }
 0x13b   : > { %v574_v25 = vpop.f32.mrb[18].mxu0  ;;  %v702_v26 = vpop.f32.mrb[18].mxu1 }
 0x13c   : > { %v802_v27 = vmax.f32 %v572_v21, 0.0  ;;  %v834_v28 = vmax.f32 %v700_v22, 0.0  ;;  %v575_v29 = vadd.f32 %v1322_v17, %v574_v25  ;;  %v703_v30 = vadd.f32 %v1322_v17, %v702_v26  ;;  %v576_v31 = vpop.f32.mrb[19].mxu0  ;;  %v704_v32 = vpop.f32.mrb[19].mxu1 }
 0x13e   : > { %867 = vst.msk [vmem:[%s1330_s4 + $0x40] sm:$0xff] %vm858_vm0, %v802_v27  ;;  %899 = vst.msk [vmem:[%s1330_s4 + $0x140] sm:$0xff] %vm858_vm0, %v834_v28  ;;  %v803_v33 = vmax.f32 %v575_v29, 0.0  ;;  %v835_v34 = vmax.f32 %v703_v30, 0.0 }
 0x140   : > { %868 = vst.msk [vmem:[%s1330_s4 + $0x48] sm:$0xff] %vm858_vm0, %v803_v33  ;;  %900 = vst.msk [vmem:[%s1330_s4 + $0x148] sm:$0xff] %vm858_vm0, %v835_v34 }
 0x141   : > { %v579_v35 = vpop.f32.mrb[20].mxu0  ;;  %v707_v36 = vpop.f32.mrb[20].mxu1 }
 0x142   : > { %v580_v37 = vadd.f32 %v1322_v17, %v579_v35  ;;  %v708_v38 = vadd.f32 %v1322_v17, %v707_v36  ;;  %v581_v39 = vpop.f32.mrb[21].mxu0  ;;  %v709_v40 = vpop.f32.mrb[21].mxu1 }
 0x143   : > { %v582_v41 = vpop.f32.mrb[22].mxu0  ;;  %v710_v42 = vpop.f32.mrb[22].mxu1 }
 0x144   : > { %v804_v43 = vmax.f32 %v580_v37, 0.0  ;;  %v836_v44 = vmax.f32 %v708_v38, 0.0  ;;  %v583_v45 = vadd.f32 %v1322_v17, %v582_v41  ;;  %v711_v46 = vadd.f32 %v1322_v17, %v710_v42  ;;  %v584_v47 = vpop.f32.mrb[23].mxu0  ;;  %v712_v48 = vpop.f32.mrb[23].mxu1 }
 0x146   : > { %869 = vst.msk [vmem:[%s1330_s4 + $0x50] sm:$0xff] %vm858_vm0, %v804_v43  ;;  %901 = vst.msk [vmem:[%s1330_s4 + $0x150] sm:$0xff] %vm858_vm0, %v836_v44  ;;  %v805_v49 = vmax.f32 %v583_v45, 0.0  ;;  %v837_v50 = vmax.f32 %v711_v46, 0.0 }
 0x148   : > { %870 = vst.msk [vmem:[%s1330_s4 + $0x58] sm:$0xff] %vm858_vm0, %v805_v49  ;;  %902 = vst.msk [vmem:[%s1330_s4 + $0x158] sm:$0xff] %vm858_vm0, %v837_v50 }
 0x149   : > { %v587_v51 = vpop.f32.mrb[24].mxu0  ;;  %v715_v52 = vpop.f32.mrb[24].mxu1 }
 0x14a   : > { %v588_v53 = vadd.f32 %v1322_v17, %v587_v51  ;;  %v716_v54 = vadd.f32 %v1322_v17, %v715_v52  ;;  %v589_v55 = vpop.f32.mrb[25].mxu0  ;;  %v717_v56 = vpop.f32.mrb[25].mxu1 }
 0x14b   : > { %v590_v57 = vpop.f32.mrb[26].mxu0  ;;  %v718_v58 = vpop.f32.mrb[26].mxu1 }
 0x14c   : > { %v806_v59 = vmax.f32 %v588_v53, 0.0  ;;  %v838_v60 = vmax.f32 %v716_v54, 0.0  ;;  %v591_v61 = vadd.f32 %v1322_v17, %v590_v57  ;;  %v719_v62 = vadd.f32 %v1322_v17, %v718_v58  ;;  %v592_v63 = vpop.f32.mrb[27].mxu0  ;;  %v720_v0 = vpop.f32.mrb[27].mxu1 }
 0x14e   : > { %871 = vst.msk [vmem:[%s1330_s4 + $0x60] sm:$0xff] %vm858_vm0, %v806_v59  ;;  %903 = vst.msk [vmem:[%s1330_s4 + $0x160] sm:$0xff] %vm858_vm0, %v838_v60  ;;  %v807_v1 = vmax.f32 %v591_v61, 0.0  ;;  %v839_v2 = vmax.f32 %v719_v62, 0.0 }
 0x150   : > { %872 = vst.msk [vmem:[%s1330_s4 + $0x68] sm:$0xff] %vm858_vm0, %v807_v1  ;;  %904 = vst.msk [vmem:[%s1330_s4 + $0x168] sm:$0xff] %vm858_vm0, %v839_v2 }
 0x151   : > { %v595_v3 = vpop.f32.mrb[28].mxu0  ;;  %v723_v4 = vpop.f32.mrb[28].mxu1 }
 0x152   : > { %v596_v5 = vadd.f32 %v1322_v17, %v595_v3  ;;  %v724_v6 = vadd.f32 %v1322_v17, %v723_v4  ;;  %v597_v7 = vpop.f32.mrb[29].mxu0  ;;  %v725_v8 = vpop.f32.mrb[29].mxu1 }
 0x153   : > { %v598_v9 = vpop.f32.mrb[30].mxu0  ;;  %v726_v10 = vpop.f32.mrb[30].mxu1 }
 0x154   : > { %v808_v11 = vmax.f32 %v596_v5, 0.0  ;;  %v840_v12 = vmax.f32 %v724_v6, 0.0  ;;  %v599_v13 = vadd.f32 %v1322_v17, %v598_v9  ;;  %v727_v14 = vadd.f32 %v1322_v17, %v726_v10  ;;  %v600_v15 = vpop.f32.mrb[31].mxu0  ;;  %v728_v16 = vpop.f32.mrb[31].mxu1 }
 0x156   : > { %873 = vst.msk [vmem:[%s1330_s4 + $0x70] sm:$0xff] %vm858_vm0, %v808_v11  ;;  %905 = vst.msk [vmem:[%s1330_s4 + $0x170] sm:$0xff] %vm858_vm0, %v840_v12  ;;  %v809_v18 = vmax.f32 %v599_v13, 0.0  ;;  %v841_v19 = vmax.f32 %v727_v14, 0.0 }
 0x158   : > { %874 = vst.msk [vmem:[%s1330_s4 + $0x78] sm:$0xff] %vm858_vm0, %v809_v18  ;;  %906 = vst.msk [vmem:[%s1330_s4 + $0x178] sm:$0xff] %vm858_vm0, %v841_v19 }
 0x159   : > { %v603_v20 = vpop.f32.mrb[32].mxu0  ;;  %v731_v21 = vpop.f32.mrb[32].mxu1 }
 0x15a   : > { %v604_v22 = vadd.f32 %v1322_v17, %v603_v20  ;;  %v732_v23 = vadd.f32 %v1322_v17, %v731_v21  ;;  %v605_v24 = vpop.f32.mrb[33].mxu0  ;;  %v733_v25 = vpop.f32.mrb[33].mxu1 }
 0x15b   : > { %v606_v26 = vpop.f32.mrb[34].mxu0  ;;  %v734_v27 = vpop.f32.mrb[34].mxu1 }
 0x15c   : > { %v810_v28 = vmax.f32 %v604_v22, 0.0  ;;  %v842_v29 = vmax.f32 %v732_v23, 0.0  ;;  %v607_v30 = vadd.f32 %v1322_v17, %v606_v26  ;;  %v735_v31 = vadd.f32 %v1322_v17, %v734_v27  ;;  %v608_v32 = vpop.f32.mrb[35].mxu0  ;;  %v736_v33 = vpop.f32.mrb[35].mxu1 }
 0x15e   : > { %875 = vst.msk [vmem:[%s1330_s4 + $0x80] sm:$0xff] %vm858_vm0, %v810_v28  ;;  %907 = vst.msk [vmem:[%s1330_s4 + $0x180] sm:$0xff] %vm858_vm0, %v842_v29  ;;  %v811_v34 = vmax.f32 %v607_v30, 0.0  ;;  %v843_v35 = vmax.f32 %v735_v31, 0.0 }
 0x160   : > { %876 = vst.msk [vmem:[%s1330_s4 + $0x88] sm:$0xff] %vm858_vm0, %v811_v34  ;;  %908 = vst.msk [vmem:[%s1330_s4 + $0x188] sm:$0xff] %vm858_vm0, %v843_v35 }
 0x161   : > { %v611_v36 = vpop.f32.mrb[36].mxu0  ;;  %v739_v37 = vpop.f32.mrb[36].mxu1 }
 0x162   : > { %v612_v38 = vadd.f32 %v1322_v17, %v611_v36  ;;  %v740_v39 = vadd.f32 %v1322_v17, %v739_v37  ;;  %v613_v40 = vpop.f32.mrb[37].mxu0  ;;  %v741_v41 = vpop.f32.mrb[37].mxu1 }
 0x163   : > { %v614_v42 = vpop.f32.mrb[38].mxu0  ;;  %v742_v43 = vpop.f32.mrb[38].mxu1 }
 0x164   : > { %v812_v44 = vmax.f32 %v612_v38, 0.0  ;;  %v844_v45 = vmax.f32 %v740_v39, 0.0  ;;  %v615_v46 = vadd.f32 %v1322_v17, %v614_v42  ;;  %v743_v47 = vadd.f32 %v1322_v17, %v742_v43  ;;  %v616_v48 = vpop.f32.mrb[39].mxu0  ;;  %v744_v49 = vpop.f32.mrb[39].mxu1 }
 0x166   : > { %877 = vst.msk [vmem:[%s1330_s4 + $0x90] sm:$0xff] %vm858_vm0, %v812_v44  ;;  %909 = vst.msk [vmem:[%s1330_s4 + $0x190] sm:$0xff] %vm858_vm0, %v844_v45  ;;  %v813_v50 = vmax.f32 %v615_v46, 0.0  ;;  %v845_v51 = vmax.f32 %v743_v47, 0.0 }
 0x168   : > { %878 = vst.msk [vmem:[%s1330_s4 + $0x98] sm:$0xff] %vm858_vm0, %v813_v50  ;;  %910 = vst.msk [vmem:[%s1330_s4 + $0x198] sm:$0xff] %vm858_vm0, %v845_v51 }
 0x169   : > { %v619_v52 = vpop.f32.mrb[40].mxu0  ;;  %v747_v53 = vpop.f32.mrb[40].mxu1 }
 0x16a   : > { %v620_v54 = vadd.f32 %v1322_v17, %v619_v52  ;;  %v748_v55 = vadd.f32 %v1322_v17, %v747_v53  ;;  %v621_v56 = vpop.f32.mrb[41].mxu0  ;;  %v749_v57 = vpop.f32.mrb[41].mxu1 }
 0x16b   : > { %v622_v58 = vpop.f32.mrb[42].mxu0  ;;  %v750_v59 = vpop.f32.mrb[42].mxu1 }
 0x16c   : > { %v814_v60 = vmax.f32 %v620_v54, 0.0  ;;  %v846_v61 = vmax.f32 %v748_v55, 0.0  ;;  %v623_v62 = vadd.f32 %v1322_v17, %v622_v58  ;;  %v751_v63 = vadd.f32 %v1322_v17, %v750_v59  ;;  %v624_v0 = vpop.f32.mrb[43].mxu0  ;;  %v752_v1 = vpop.f32.mrb[43].mxu1 }
 0x16e   : > { %879 = vst.msk [vmem:[%s1330_s4 + $0xa0] sm:$0xff] %vm858_vm0, %v814_v60  ;;  %911 = vst.msk [vmem:[%s1330_s4 + $0x1a0] sm:$0xff] %vm858_vm0, %v846_v61  ;;  %v815_v2 = vmax.f32 %v623_v62, 0.0  ;;  %v847_v3 = vmax.f32 %v751_v63, 0.0 }
 0x170   : > { %880 = vst.msk [vmem:[%s1330_s4 + $0xa8] sm:$0xff] %vm858_vm0, %v815_v2  ;;  %912 = vst.msk [vmem:[%s1330_s4 + $0x1a8] sm:$0xff] %vm858_vm0, %v847_v3 }
 0x171   : > { %v627_v4 = vpop.f32.mrb[44].mxu0  ;;  %v755_v5 = vpop.f32.mrb[44].mxu1 }
 0x172   : > { %v628_v6 = vadd.f32 %v1322_v17, %v627_v4  ;;  %v756_v7 = vadd.f32 %v1322_v17, %v755_v5  ;;  %v629_v8 = vpop.f32.mrb[45].mxu0  ;;  %v757_v9 = vpop.f32.mrb[45].mxu1 }
 0x173   : > { %v630_v10 = vpop.f32.mrb[46].mxu0  ;;  %v758_v11 = vpop.f32.mrb[46].mxu1 }
 0x174   : > { %v816_v12 = vmax.f32 %v628_v6, 0.0  ;;  %v848_v13 = vmax.f32 %v756_v7, 0.0  ;;  %v631_v14 = vadd.f32 %v1322_v17, %v630_v10  ;;  %v759_v15 = vadd.f32 %v1322_v17, %v758_v11  ;;  %v632_v16 = vpop.f32.mrb[47].mxu0  ;;  %v760_v18 = vpop.f32.mrb[47].mxu1 }
 0x176   : > { %881 = vst.msk [vmem:[%s1330_s4 + $0xb0] sm:$0xff] %vm858_vm0, %v816_v12  ;;  %913 = vst.msk [vmem:[%s1330_s4 + $0x1b0] sm:$0xff] %vm858_vm0, %v848_v13  ;;  %v817_v19 = vmax.f32 %v631_v14, 0.0  ;;  %v849_v20 = vmax.f32 %v759_v15, 0.0 }
 0x178   : > { %882 = vst.msk [vmem:[%s1330_s4 + $0xb8] sm:$0xff] %vm858_vm0, %v817_v19  ;;  %914 = vst.msk [vmem:[%s1330_s4 + $0x1b8] sm:$0xff] %vm858_vm0, %v849_v20 }
 0x179   : > { %v635_v21 = vpop.f32.mrb[48].mxu0  ;;  %v763_v22 = vpop.f32.mrb[48].mxu1 }
 0x17a   : > { %v636_v23 = vadd.f32 %v1322_v17, %v635_v21  ;;  %v764_v24 = vadd.f32 %v1322_v17, %v763_v22  ;;  %v637_v25 = vpop.f32.mrb[49].mxu0  ;;  %v765_v26 = vpop.f32.mrb[49].mxu1 }
 0x17b   : > { %v638_v27 = vpop.f32.mrb[50].mxu0  ;;  %v766_v28 = vpop.f32.mrb[50].mxu1 }
 0x17c   : > { %v818_v29 = vmax.f32 %v636_v23, 0.0  ;;  %v850_v30 = vmax.f32 %v764_v24, 0.0  ;;  %v639_v31 = vadd.f32 %v1322_v17, %v638_v27  ;;  %v767_v32 = vadd.f32 %v1322_v17, %v766_v28  ;;  %v640_v33 = vpop.f32.mrb[51].mxu0  ;;  %v768_v34 = vpop.f32.mrb[51].mxu1 }
 0x17e   : > { %883 = vst.msk [vmem:[%s1330_s4 + $0xc0] sm:$0xff] %vm858_vm0, %v818_v29  ;;  %915 = vst.msk [vmem:[%s1330_s4 + $0x1c0] sm:$0xff] %vm858_vm0, %v850_v30  ;;  %v819_v35 = vmax.f32 %v639_v31, 0.0  ;;  %v851_v36 = vmax.f32 %v767_v32, 0.0 }
 0x180   : > { %884 = vst.msk [vmem:[%s1330_s4 + $0xc8] sm:$0xff] %vm858_vm0, %v819_v35  ;;  %916 = vst.msk [vmem:[%s1330_s4 + $0x1c8] sm:$0xff] %vm858_vm0, %v851_v36 }
 0x181   : > { %v643_v37 = vpop.f32.mrb[52].mxu0  ;;  %v771_v38 = vpop.f32.mrb[52].mxu1 }
 0x182   : > { %v644_v39 = vadd.f32 %v1322_v17, %v643_v37  ;;  %v772_v40 = vadd.f32 %v1322_v17, %v771_v38  ;;  %v645_v41 = vpop.f32.mrb[53].mxu0  ;;  %v773_v42 = vpop.f32.mrb[53].mxu1 }
 0x183   : > { %v646_v43 = vpop.f32.mrb[54].mxu0  ;;  %v774_v44 = vpop.f32.mrb[54].mxu1 }
 0x184   : > { %v820_v45 = vmax.f32 %v644_v39, 0.0  ;;  %v852_v46 = vmax.f32 %v772_v40, 0.0  ;;  %v647_v47 = vadd.f32 %v1322_v17, %v646_v43  ;;  %v775_v48 = vadd.f32 %v1322_v17, %v774_v44  ;;  %v648_v49 = vpop.f32.mrb[55].mxu0  ;;  %v776_v50 = vpop.f32.mrb[55].mxu1 }
 0x186   : > { %885 = vst.msk [vmem:[%s1330_s4 + $0xd0] sm:$0xff] %vm858_vm0, %v820_v45  ;;  %917 = vst.msk [vmem:[%s1330_s4 + $0x1d0] sm:$0xff] %vm858_vm0, %v852_v46  ;;  %v821_v51 = vmax.f32 %v647_v47, 0.0  ;;  %v853_v52 = vmax.f32 %v775_v48, 0.0 }
 0x188   : > { %886 = vst.msk [vmem:[%s1330_s4 + $0xd8] sm:$0xff] %vm858_vm0, %v821_v51  ;;  %918 = vst.msk [vmem:[%s1330_s4 + $0x1d8] sm:$0xff] %vm858_vm0, %v853_v52 }
 0x189   : > { %v651_v53 = vpop.f32.mrb[56].mxu0  ;;  %v779_v54 = vpop.f32.mrb[56].mxu1 }
 0x18a   : > { %v652_v55 = vadd.f32 %v1322_v17, %v651_v53  ;;  %v780_v56 = vadd.f32 %v1322_v17, %v779_v54  ;;  %v653_v57 = vpop.f32.mrb[57].mxu0  ;;  %v781_v58 = vpop.f32.mrb[57].mxu1 }
 0x18b   : > { %v654_v59 = vpop.f32.mrb[58].mxu0  ;;  %v782_v60 = vpop.f32.mrb[58].mxu1 }
 0x18c   : > { %v822_v61 = vmax.f32 %v652_v55, 0.0  ;;  %v854_v62 = vmax.f32 %v780_v56, 0.0  ;;  %v655_v63 = vadd.f32 %v1322_v17, %v654_v59  ;;  %v783_v0 = vadd.f32 %v1322_v17, %v782_v60  ;;  %v656_v1 = vpop.f32.mrb[59].mxu0  ;;  %v784_v2 = vpop.f32.mrb[59].mxu1 }
 0x18e   : > { %887 = vst.msk [vmem:[%s1330_s4 + $0xe0] sm:$0xff] %vm858_vm0, %v822_v61  ;;  %919 = vst.msk [vmem:[%s1330_s4 + $0x1e0] sm:$0xff] %vm858_vm0, %v854_v62  ;;  %v823_v3 = vmax.f32 %v655_v63, 0.0  ;;  %v855_v4 = vmax.f32 %v783_v0, 0.0 }
 0x190   : > { %888 = vst.msk [vmem:[%s1330_s4 + $0xe8] sm:$0xff] %vm858_vm0, %v823_v3  ;;  %920 = vst.msk [vmem:[%s1330_s4 + $0x1e8] sm:$0xff] %vm858_vm0, %v855_v4 }
 0x191   : > { %v659_v5 = vpop.f32.mrb[60].mxu0  ;;  %v787_v6 = vpop.f32.mrb[60].mxu1 }
 0x192   : > { %v660_v7 = vadd.f32 %v1322_v17, %v659_v5  ;;  %v788_v8 = vadd.f32 %v1322_v17, %v787_v6  ;;  %v661_v9 = vpop.f32.mrb[61].mxu0  ;;  %v789_v10 = vpop.f32.mrb[61].mxu1 }
 0x193   : > { %v662_v11 = vpop.f32.mrb[62].mxu0  ;;  %v790_v12 = vpop.f32.mrb[62].mxu1 }
 0x194   : > { %v824_v13 = vmax.f32 %v660_v7, 0.0  ;;  %v856_v14 = vmax.f32 %v788_v8, 0.0  ;;  %v663_v15 = vadd.f32 %v1322_v17, %v662_v11  ;;  %v791_v16 = vadd.f32 %v1322_v17, %v790_v12  ;;  %v664_v18 = vpop.f32.mrb[63].mxu0  ;;  %v792_v19 = vpop.f32.mrb[63].mxu1 }
 0x196   : > { %889 = vst.msk [vmem:[%s1330_s4 + $0xf0] sm:$0xff] %vm858_vm0, %v824_v13  ;;  %921 = vst.msk [vmem:[%s1330_s4 + $0x1f0] sm:$0xff] %vm858_vm0, %v856_v14  ;;  %v825_v20 = vmax.f32 %v663_v15, 0.0  ;;  %v857_v21 = vmax.f32 %v791_v16, 0.0 }
 0x198   : > { %890 = vst.msk [vmem:[%s1330_s4 + $0xf8] sm:$0xff] %vm858_vm0, %v825_v20  ;;  %922 = vst.msk [vmem:[%s1330_s4 + $0x1f8] sm:$0xff] %vm858_vm0, %v857_v21 }
 0x199 PF: > { %s13_s12 = sadd.s32 1, %s1072_s12  }
 0x19a   : > { %p10_p4 = scmp.ge.s32.totalorder %s13_s12, 4  }
 0x19c   :  { %12 = sbr.rel (!%p10_p4) target bundleno = 1 (0x1), region = 62 }

// kernel: dqn_forward.4
= control target key start
LH: loop header
LB: loop body
LE: loop exit
PB: predicated region body
PF: predicated region fallthrough
CT: control target
= control target key end

     0   :  { %vm355_vm0 = vcmask 261120   ;;  %s816_s1 = inlined_call_operand.vmem [shape: bf16[256,32], index: 1, kind: input, shape index: {}]   ;;  %s817_s0 = inlined_call_operand.vmem [shape: f32[168,256], index: 0, kind: input, shape index: {}]   ;;  %s818_s2 = inlined_call_operand.vmem [shape: f32[1,32], index: 2, kind: input, shape index: {}]   ;;  %s819_s3 = inlined_call_operand.vmem [shape: f32[168,32], index: 3, kind: output, shape index: {}]  }
   0x1   :  { %v496_v0 = vld [vmem:[%s816_s1 + $0x40] sm:$0xff]   ;;  %v498_v2 = vld [vmem:[%s816_s1 + $0x48] sm:$0xff]   ;;  %v500_v4 = vld [vmem:[%s816_s1 + $0x50] sm:$0xff]  }
   0x2   :  { %v497_v1 = vld [vmem:[%s816_s1] sm:$0xff]   ;;  %398 = vmatprep.subr.bf16.mxu0 %v496_v0  ;;  %480 = vmatprep.subr.bf16.mxu1 %v496_v0  ;;  %v499_v3 = vld [vmem:[%s816_s1 + $0x8] sm:$0xff]   ;;  %v501_v5 = vld [vmem:[%s816_s1 + $0x10] sm:$0xff]  }
   0x3   :  { %399 = vmatpush3.bf16.msra.mxu0 %v497_v1  ;;  %488 = vmatpush3.bf16.msra.mxu1 %v497_v1  ;;  %v502_v6 = vld [vmem:[%s816_s1 + $0x58] sm:$0xff]   ;;  %v504_v8 = vld [vmem:[%s816_s1 + $0x60] sm:$0xff]   ;;  %v506_v10 = vld [vmem:[%s816_s1 + $0x68] sm:$0xff]  }
   0x4   :  { %400 = vmatprep.subr.bf16.mxu0 %v498_v2  ;;  %481 = vmatprep.subr.bf16.mxu1 %v498_v2  ;;  %v503_v7 = vld [vmem:[%s816_s1 + $0x18] sm:$0xff]   ;;  %v505_v9 = vld [vmem:[%s816_s1 + $0x20] sm:$0xff]   ;;  %v16_v11 = vld [vmem:[%s817_s0 + $0x8] sm:$0xff] }
   0x5   :  { %v18_v12 = vld [vmem:[%s817_s0 + $0x18] sm:$0xff]  ;;  %v40_v14 = vld [vmem:[%s817_s0 + $0xc8] sm:$0xff]  ;;  %v508_v18 = vld [vmem:[%s816_s1 + $0x70] sm:$0xff]  }
   0x6   :  { %v58_v13 = vpack.c.bf16 %v18_v12, %v16_v11  ;;  %v42_v15 = vld [vmem:[%s817_s0 + $0xd8] sm:$0xff]  ;;  %v507_v17 = vld [vmem:[%s816_s1 + $0x28] sm:$0xff]   ;;  %v509_v19 = vld [vmem:[%s816_s1 + $0x30] sm:$0xff]  }
   0x7   :  { %401 = vmatpush3.bf16.msra.mxu0 %v499_v3  ;;  %489 = vmatpush3.bf16.msra.mxu1 %v499_v3  ;;  %v70_v16 = vpack.c.bf16 %v42_v15, %v40_v14  ;;  %v510_v20 = vld [vmem:[%s816_s1 + $0x78] sm:$0xff]   ;;  %v15_v22 = vld [vmem:[%s817_s0] sm:$0xff]  ;;  %v17_v23 = vld [vmem:[%s817_s0 + $0x10] sm:$0xff] }
   0x8   :  { %402 = vmatprep.subr.bf16.mxu0 %v500_v4  ;;  %482 = vmatprep.subr.bf16.mxu1 %v500_v4  ;;  %v511_v21 = vld [vmem:[%s816_s1 + $0x38] sm:$0xff]   ;;  %v20_v24 = vld [vmem:[%s817_s0 + $0x28] sm:$0xff]  ;;  %v39_v25 = vld [vmem:[%s817_s0 + $0xc0] sm:$0xff]  ;;  %v57_v30 = vpack.c.bf16 %v17_v23, %v15_v22 }
   0x9   :  { %246 = vmatprep.mubr.bf16.mxu0 %v58_v13  ;;  %294 = vmatprep.mubr.bf16.mxu1 %v70_v16  ;;  %v41_v26 = vld [vmem:[%s817_s0 + $0xd0] sm:$0xff]  ;;  %v22_v27 = vld [vmem:[%s817_s0 + $0x38] sm:$0xff]  ;;  %v44_v28 = vld [vmem:[%s817_s0 + $0xe8] sm:$0xff] }
   0xa   :  { %v46_v29 = vld [vmem:[%s817_s0 + $0xf8] sm:$0xff]  ;;  %v69_v31 = vpack.c.bf16 %v41_v26, %v39_v25  ;;  %v60_v32 = vpack.c.bf16 %v22_v27, %v20_v24  ;;  %v19_v34 = vld [vmem:[%s817_s0 + $0x20] sm:$0xff]  ;;  %v21_v35 = vld [vmem:[%s817_s0 + $0x30] sm:$0xff] }
   0xb   :  { %403 = vmatpush3.bf16.msra.mxu0 %v501_v5  ;;  %490 = vmatpush3.bf16.msra.mxu1 %v501_v5  ;;  %v72_v33 = vpack.c.bf16 %v46_v29, %v44_v28  ;;  %v24_v36 = vld [vmem:[%s817_s0 + $0x48] sm:$0xff]  ;;  %v43_v37 = vld [vmem:[%s817_s0 + $0xe0] sm:$0xff]  ;;  %v45_v38 = vld [vmem:[%s817_s0 + $0xf0] sm:$0xff]  ;;  %v59_v42 = vpack.c.bf16 %v21_v35, %v19_v34 }
   0xc   :  { %404 = vmatprep.subr.bf16.mxu0 %v502_v6  ;;  %483 = vmatprep.subr.bf16.mxu1 %v502_v6  ;;  %v26_v39 = vld [vmem:[%s817_s0 + $0x58] sm:$0xff]  ;;  %v48_v40 = vld [vmem:[%s817_s0 + $0x108] sm:$0xff]  ;;  %v71_v43 = vpack.c.bf16 %v45_v38, %v43_v37  ;;  %v23_v46 = vld [vmem:[%s817_s0 + $0x40] sm:$0xff] }
   0xd   :  { %v50_v41 = vld [vmem:[%s817_s0 + $0x118] sm:$0xff]  ;;  %v62_v44 = vpack.c.bf16 %v26_v39, %v24_v36  ;;  %v25_v47 = vld [vmem:[%s817_s0 + $0x50] sm:$0xff]  ;;  %v28_v48 = vld [vmem:[%s817_s0 + $0x68] sm:$0xff] }
   0xe   :  { %v74_v45 = vpack.c.bf16 %v50_v41, %v48_v40  ;;  %v47_v49 = vld [vmem:[%s817_s0 + $0x100] sm:$0xff]  ;;  %v49_v50 = vld [vmem:[%s817_s0 + $0x110] sm:$0xff]  ;;  %v30_v51 = vld [vmem:[%s817_s0 + $0x78] sm:$0xff]  ;;  %v61_v54 = vpack.c.bf16 %v25_v47, %v23_v46 }
   0xf   :  { %405 = vmatpush3.bf16.msra.mxu0 %v503_v7  ;;  %491 = vmatpush3.bf16.msra.mxu1 %v503_v7  ;;  %v52_v52 = vld [vmem:[%s817_s0 + $0x128] sm:$0xff]  ;;  %v54_v53 = vld [vmem:[%s817_s0 + $0x138] sm:$0xff]  ;;  %v73_v55 = vpack.c.bf16 %v49_v50, %v47_v49  ;;  %v64_v56 = vpack.c.bf16 %v30_v51, %v28_v48  ;;  %v27_v58 = vld [vmem:[%s817_s0 + $0x60] sm:$0xff] }
  0x10   :  { %406 = vmatprep.subr.bf16.mxu0 %v504_v8  ;;  %484 = vmatprep.subr.bf16.mxu1 %v504_v8  ;;  %v76_v57 = vpack.c.bf16 %v54_v53, %v52_v52  ;;  %v29_v59 = vld [vmem:[%s817_s0 + $0x70] sm:$0xff]  ;;  %v51_v60 = vld [vmem:[%s817_s0 + $0x120] sm:$0xff]  ;;  %v32_v62 = vld [vmem:[%s817_s0 + $0x88] sm:$0xff] }
  0x11   :  { %v53_v61 = vld [vmem:[%s817_s0 + $0x130] sm:$0xff]  ;;  %v34_v63 = vld [vmem:[%s817_s0 + $0x98] sm:$0xff]  ;;  %v56_v0 = vld [vmem:[%s817_s0 + $0x148] sm:$0xff]  ;;  %v63_v1 = vpack.c.bf16 %v29_v59, %v27_v58 }
  0x12   :  { %v75_v2 = vpack.c.bf16 %v53_v61, %v51_v60  ;;  %v66_v3 = vpack.c.bf16 %v34_v63, %v32_v62  ;;  %v78_v4 = vpack.c.bf16 %v56_v0, %v56_v0  ;;  %v31_v5 = vld [vmem:[%s817_s0 + $0x80] sm:$0xff]  ;;  %v33_v6 = vld [vmem:[%s817_s0 + $0x90] sm:$0xff]  ;;  %v36_v8 = vld [vmem:[%s817_s0 + $0xa8] sm:$0xff] }
  0x13   :  { %407 = vmatpush3.bf16.msra.mxu0 %v505_v9  ;;  %492 = vmatpush3.bf16.msra.mxu1 %v505_v9  ;;  %v55_v7 = vld [vmem:[%s817_s0 + $0x140] sm:$0xff]  ;;  %v38_v9 = vld [vmem:[%s817_s0 + $0xb8] sm:$0xff]  ;;  %v37_v14 = vld [vmem:[%s817_s0 + $0xb0] sm:$0xff] }
  0x14   :  { %408 = vmatprep.subr.bf16.mxu0 %v506_v10  ;;  %485 = vmatprep.subr.bf16.mxu1 %v506_v10  ;;  %v65_v10 = vpack.c.bf16 %v33_v6, %v31_v5  ;;  %v77_v11 = vpack.c.bf16 %v55_v7, %v55_v7  ;;  %v68_v12 = vpack.c.bf16 %v38_v9, %v36_v8  ;;  %v35_v13 = vld [vmem:[%s817_s0 + $0xa0] sm:$0xff] }
  0x15   :  { %v67_v15 = vpack.c.bf16 %v37_v14, %v35_v13 }
  0x17   :  { %409 = vmatpush3.bf16.msra.mxu0 %v507_v17  ;;  %493 = vmatpush3.bf16.msra.mxu1 %v507_v17 }
  0x18   :  { %410 = vmatprep.subr.bf16.mxu0 %v508_v18  ;;  %486 = vmatprep.subr.bf16.mxu1 %v508_v18  ;;  %v709_v18 = vld [vmem:[%s818_s2] ss:$0 sm:$0xff] }
  0x1b   :  { %411 = vmatpush3.bf16.msra.mxu0 %v509_v19  ;;  %494 = vmatpush3.bf16.msra.mxu1 %v509_v19 }
  0x1c   :  { %412 = vmatprep.subr.bf16.mxu0 %v510_v20  ;;  %487 = vmatprep.subr.bf16.mxu1 %v510_v20 }
  0x1f   :  { %413 = vmatpush3.bf16.msra.mxu0 %v511_v21  ;;  %495 = vmatpush3.bf16.msra.mxu1 %v511_v21 }
  0x22   :  { %247 = vmatmul.mubr.bf16.vlgmr.msra.gmra.mrb[0].mxu0 %v57_v30  ;;  %295 = vmatmul.mubr.bf16.vlgmr.msra.gmra.mrb[0].mxu1 %v69_v31 }
  0x23   :  { %254 = vmatprep.mubr.bf16.mxu0 %v60_v32  ;;  %302 = vmatprep.mubr.bf16.mxu1 %v72_v33 }
  0x2a   :  { %255 = vmatmul.mubr.bf16.gmra.mrb[4].mxu0 %v59_v42  ;;  %303 = vmatmul.mubr.bf16.gmra.mrb[4].mxu1 %v71_v43 }
  0x2b   :  { %262 = vmatprep.mubr.bf16.mxu0 %v62_v44  ;;  %310 = vmatprep.mubr.bf16.mxu1 %v74_v45 }
  0x32   :  { %263 = vmatmul.mubr.bf16.gmra.mrb[8].mxu0 %v61_v54  ;;  %311 = vmatmul.mubr.bf16.gmra.mrb[8].mxu1 %v73_v55 }
  0x33   :  { %270 = vmatprep.mubr.bf16.mxu0 %v64_v56  ;;  %318 = vmatprep.mubr.bf16.mxu1 %v76_v57 }
  0x3a   :  { %271 = vmatmul.mubr.bf16.gmra.mrb[12].mxu0 %v63_v1  ;;  %319 = vmatmul.mubr.bf16.gmra.mrb[12].mxu1 %v75_v2 }
  0x3b   :  { %278 = vmatprep.mubr.bf16.mxu0 %v66_v3  ;;  %326 = vmatprep.mubr.bf16.mxu1 %v78_v4 }
  0x42   :  { %279 = vmatmul.mubr.bf16.gmra.mrb[16].mxu0 %v65_v10  ;;  %327 = vmatmul.mubr.bf16.gmra.mrb[16].mxu1 %v77_v11 }
  0x43   :  { %286 = vmatprep.mubr.bf16.mxu0 %v68_v12 }
  0x4a   :  { %287 = vmatmul.mubr.bf16.gmra.mrb[20].mxu0 %v67_v15 }
  0xf5   :  { %v414_v16 = vpop.f32.mrb[0].mxu0  ;;  %v450_v17 = vpop.f32.mrb[0].mxu1 }
  0xf6   :  { %v415_v19 = vpop.f32.mrb[1].mxu0  ;;  %v451_v20 = vpop.f32.mrb[1].mxu1 }
  0xf7   :  { %v416_v21 = vadd.f32 %v415_v19, %v414_v16  ;;  %v417_v22 = vpop.f32.mrb[2].mxu0  ;;  %v452_v23 = vadd.f32 %v451_v20, %v450_v17  ;;  %v453_v24 = vpop.f32.mrb[2].mxu1 }
  0xf8   :  { %v418_v25 = vpop.f32.mrb[3].mxu0  ;;  %v454_v26 = vpop.f32.mrb[3].mxu1 }
  0xf9   :  { %v249_v27 = vadd.f32 %v416_v21, %v709_v18  ;;  %v419_v28 = vadd.f32 %v418_v25, %v417_v22  ;;  %v297_v29 = vadd.f32 %v452_v23, %v709_v18  ;;  %v455_v30 = vadd.f32 %v454_v26, %v453_v24 }
  0xfb   :  { %v334_v31 = vmax.f32 %v249_v27, 0.0  ;;  %v252_v32 = vadd.f32 %v419_v28, %v709_v18  ;;  %v346_v33 = vmax.f32 %v297_v29, 0.0  ;;  %v300_v34 = vadd.f32 %v455_v30, %v709_v18 }
  0xfd   :  { %356 = vst.msk [vmem:[%s819_s3] sm:$0xff] %vm355_vm0, %v334_v31  ;;  %v335_v35 = vmax.f32 %v252_v32, 0.0  ;;  %v420_v36 = vpop.f32.mrb[4].mxu0  ;;  %368 = vst.msk [vmem:[%s819_s3 + $0x60] sm:$0xff] %vm355_vm0, %v346_v33  ;;  %v347_v37 = vmax.f32 %v300_v34, 0.0  ;;  %v456_v38 = vpop.f32.mrb[4].mxu1 }
  0xfe   :  { %v421_v39 = vpop.f32.mrb[5].mxu0  ;;  %v457_v40 = vpop.f32.mrb[5].mxu1 }
  0xff   :  { %357 = vst.msk [vmem:[%s819_s3 + $0x8] sm:$0xff] %vm355_vm0, %v335_v35  ;;  %v422_v41 = vadd.f32 %v421_v39, %v420_v36  ;;  %v423_v42 = vpop.f32.mrb[6].mxu0  ;;  %369 = vst.msk [vmem:[%s819_s3 + $0x68] sm:$0xff] %vm355_vm0, %v347_v37  ;;  %v458_v43 = vadd.f32 %v457_v40, %v456_v38  ;;  %v459_v44 = vpop.f32.mrb[6].mxu1 }
 0x100   :  { %v424_v45 = vpop.f32.mrb[7].mxu0  ;;  %v460_v46 = vpop.f32.mrb[7].mxu1 }
 0x101   :  { %v257_v47 = vadd.f32 %v422_v41, %v709_v18  ;;  %v425_v48 = vadd.f32 %v424_v45, %v423_v42  ;;  %v305_v49 = vadd.f32 %v458_v43, %v709_v18  ;;  %v461_v50 = vadd.f32 %v460_v46, %v459_v44 }
 0x103   :  { %v336_v51 = vmax.f32 %v257_v47, 0.0  ;;  %v260_v52 = vadd.f32 %v425_v48, %v709_v18  ;;  %v348_v53 = vmax.f32 %v305_v49, 0.0  ;;  %v308_v54 = vadd.f32 %v461_v50, %v709_v18 }
 0x105   :  { %358 = vst.msk [vmem:[%s819_s3 + $0x10] sm:$0xff] %vm355_vm0, %v336_v51  ;;  %v337_v55 = vmax.f32 %v260_v52, 0.0  ;;  %v426_v56 = vpop.f32.mrb[8].mxu0  ;;  %370 = vst.msk [vmem:[%s819_s3 + $0x70] sm:$0xff] %vm355_vm0, %v348_v53  ;;  %v349_v57 = vmax.f32 %v308_v54, 0.0  ;;  %v462_v58 = vpop.f32.mrb[8].mxu1 }
 0x106   :  { %v427_v59 = vpop.f32.mrb[9].mxu0  ;;  %v463_v60 = vpop.f32.mrb[9].mxu1 }
 0x107   :  { %359 = vst.msk [vmem:[%s819_s3 + $0x18] sm:$0xff] %vm355_vm0, %v337_v55  ;;  %v428_v61 = vadd.f32 %v427_v59, %v426_v56  ;;  %v429_v62 = vpop.f32.mrb[10].mxu0  ;;  %371 = vst.msk [vmem:[%s819_s3 + $0x78] sm:$0xff] %vm355_vm0, %v349_v57  ;;  %v464_v63 = vadd.f32 %v463_v60, %v462_v58  ;;  %v465_v0 = vpop.f32.mrb[10].mxu1 }
 0x108   :  { %v430_v1 = vpop.f32.mrb[11].mxu0  ;;  %v466_v2 = vpop.f32.mrb[11].mxu1 }
 0x109   :  { %v265_v3 = vadd.f32 %v428_v61, %v709_v18  ;;  %v431_v4 = vadd.f32 %v430_v1, %v429_v62  ;;  %v313_v5 = vadd.f32 %v464_v63, %v709_v18  ;;  %v467_v6 = vadd.f32 %v466_v2, %v465_v0 }
 0x10b   :  { %v338_v7 = vmax.f32 %v265_v3, 0.0  ;;  %v268_v8 = vadd.f32 %v431_v4, %v709_v18  ;;  %v350_v9 = vmax.f32 %v313_v5, 0.0  ;;  %v316_v10 = vadd.f32 %v467_v6, %v709_v18 }
 0x10d   :  { %360 = vst.msk [vmem:[%s819_s3 + $0x20] sm:$0xff] %vm355_vm0, %v338_v7  ;;  %v339_v11 = vmax.f32 %v268_v8, 0.0  ;;  %v432_v12 = vpop.f32.mrb[12].mxu0  ;;  %372 = vst.msk [vmem:[%s819_s3 + $0x80] sm:$0xff] %vm355_vm0, %v350_v9  ;;  %v351_v13 = vmax.f32 %v316_v10, 0.0  ;;  %v468_v14 = vpop.f32.mrb[12].mxu1 }
 0x10e   :  { %v433_v15 = vpop.f32.mrb[13].mxu0  ;;  %v469_v16 = vpop.f32.mrb[13].mxu1 }
 0x10f   :  { %361 = vst.msk [vmem:[%s819_s3 + $0x28] sm:$0xff] %vm355_vm0, %v339_v11  ;;  %v434_v17 = vadd.f32 %v433_v15, %v432_v12  ;;  %v435_v19 = vpop.f32.mrb[14].mxu0  ;;  %373 = vst.msk [vmem:[%s819_s3 + $0x88] sm:$0xff] %vm355_vm0, %v351_v13  ;;  %v470_v20 = vadd.f32 %v469_v16, %v468_v14  ;;  %v471_v21 = vpop.f32.mrb[14].mxu1 }
 0x110   :  { %v436_v22 = vpop.f32.mrb[15].mxu0  ;;  %v472_v23 = vpop.f32.mrb[15].mxu1 }
 0x111   :  { %v273_v24 = vadd.f32 %v434_v17, %v709_v18  ;;  %v437_v25 = vadd.f32 %v436_v22, %v435_v19  ;;  %v321_v26 = vadd.f32 %v470_v20, %v709_v18  ;;  %v473_v27 = vadd.f32 %v472_v23, %v471_v21 }
 0x113   :  { %v340_v28 = vmax.f32 %v273_v24, 0.0  ;;  %v276_v29 = vadd.f32 %v437_v25, %v709_v18  ;;  %v352_v30 = vmax.f32 %v321_v26, 0.0  ;;  %v324_v31 = vadd.f32 %v473_v27, %v709_v18 }
 0x115   :  { %362 = vst.msk [vmem:[%s819_s3 + $0x30] sm:$0xff] %vm355_vm0, %v340_v28  ;;  %v341_v32 = vmax.f32 %v276_v29, 0.0  ;;  %v438_v33 = vpop.f32.mrb[16].mxu0  ;;  %374 = vst.msk [vmem:[%s819_s3 + $0x90] sm:$0xff] %vm355_vm0, %v352_v30  ;;  %v353_v34 = vmax.f32 %v324_v31, 0.0  ;;  %v474_v35 = vpop.f32.mrb[16].mxu1 }
 0x116   :  { %v439_v36 = vpop.f32.mrb[17].mxu0  ;;  %v475_v37 = vpop.f32.mrb[17].mxu1 }
 0x117   :  { %363 = vst.msk [vmem:[%s819_s3 + $0x38] sm:$0xff] %vm355_vm0, %v341_v32  ;;  %v440_v38 = vadd.f32 %v439_v36, %v438_v33  ;;  %v441_v39 = vpop.f32.mrb[18].mxu0  ;;  %375 = vst.msk [vmem:[%s819_s3 + $0x98] sm:$0xff] %vm355_vm0, %v353_v34  ;;  %v476_v40 = vadd.f32 %v475_v37, %v474_v35  ;;  %v477_v41 = vpop.f32.mrb[18].mxu1 }
 0x118   :  { %v442_v42 = vpop.f32.mrb[19].mxu0  ;;  %v478_v43 = vpop.f32.mrb[19].mxu1 }
 0x119   :  { %v281_v44 = vadd.f32 %v440_v38, %v709_v18  ;;  %v443_v45 = vadd.f32 %v442_v42, %v441_v39  ;;  %v329_v46 = vadd.f32 %v476_v40, %v709_v18 }
 0x11b   :  { %v342_v47 = vmax.f32 %v281_v44, 0.0  ;;  %v284_v48 = vadd.f32 %v443_v45, %v709_v18  ;;  %v354_v49 = vmax.f32 %v329_v46, 0.0 }
 0x11d   :  { %364 = vst.msk [vmem:[%s819_s3 + $0x40] sm:$0xff] %vm355_vm0, %v342_v47  ;;  %v343_v50 = vmax.f32 %v284_v48, 0.0  ;;  %v444_v51 = vpop.f32.mrb[20].mxu0  ;;  %376 = vst.msk [vmem:[%s819_s3 + $0xa0] sm:$0xff] %vm355_vm0, %v354_v49 }
 0x11e   :  { %v445_v52 = vpop.f32.mrb[21].mxu0 }
 0x11f   :  { %365 = vst.msk [vmem:[%s819_s3 + $0x48] sm:$0xff] %vm355_vm0, %v343_v50  ;;  %v446_v53 = vadd.f32 %v445_v52, %v444_v51  ;;  %v447_v54 = vpop.f32.mrb[22].mxu0 }
 0x120   :  { %v448_v55 = vpop.f32.mrb[23].mxu0 }
 0x121   :  { %v289_v56 = vadd.f32 %v446_v53, %v709_v18  ;;  %v449_v57 = vadd.f32 %v448_v55, %v447_v54 }
 0x123   :  { %v344_v58 = vmax.f32 %v289_v56, 0.0  ;;  %v292_v59 = vadd.f32 %v449_v57, %v709_v18 }
 0x125   :  { %366 = vst.msk [vmem:[%s819_s3 + $0x50] sm:$0xff] %vm355_vm0, %v344_v58  ;;  %v345_v60 = vmax.f32 %v292_v59, 0.0 }
 0x127   :  { %367 = vst.msk [vmem:[%s819_s3 + $0x58] sm:$0xff] %vm355_vm0, %v345_v60 }

// kernel: dqn_forward.5
= control target key start
LH: loop header
LB: loop body
LE: loop exit
PB: predicated region body
PF: predicated region fallthrough
CT: control target
= control target key end

     0   :  { %vm2019_vm0 = vcmask 261120   ;;  %vm2653_vm1 = vcmask 48128   ;;  %s4689_s1 = inlined_call_operand.vmem [shape: bf16[2592,256], index: 1, kind: input, shape index: {}]   ;;  %s4690_s0 = inlined_call_operand.vmem [shape: f32[8,2592], index: 0, kind: input, shape index: {}]   ;;  %s4691_s3 = inlined_call_operand.vmem [shape: bf16[256,6], index: 3, kind: input, shape index: {}]   ;;  %s4692_s2 = inlined_call_operand.vmem [shape: f32[1,256], index: 2, kind: input, shape index: {}]   ;;  %s4693_s4 = inlined_call_operand.vmem [shape: f32[1,6], index: 4, kind: input, shape index: {}]   ;;  %s4694_s5 = inlined_call_operand.vmem [shape: f32[8,6], index: 5, kind: output, shape index: {}]  }
   0x1   :  { %v3064_v0 = vld [vmem:[%s4689_s1 + $0x4] ss:$8 sps:$4 sm:$0xff]   ;;  %v3068_v2 = vld [vmem:[%s4689_s1] ss:$8 sps:$4 sm:$0xff]   ;;  %v3070_v4 = vld [vmem:[%s4689_s1 + $0x14] ss:$8 sps:$4 sm:$0xff]  }
   0x2   :  { %v3066_v1 = vld [vmem:[%s4689_s1 + $0x504] ss:$8 sps:$4 sm:$0xff]   ;;  %2023 = vmatprep.subr.bf16.mxu1 %v3064_v0  ;;  %v3069_v3 = vld [vmem:[%s4689_s1 + $0x500] ss:$8 sps:$4 sm:$0xff]   ;;  %v3072_v5 = vld [vmem:[%s4689_s1 + $0x514] ss:$8 sps:$4 sm:$0xff]  }
   0x3   :  { %2228 = vmatprep.subr.bf16.mxu0 %v3066_v1  ;;  %2024 = vmatpush1.bf16.msra.mxu1 %v3068_v2  ;;  %v3074_v6 = vld [vmem:[%s4689_s1 + $0x10] ss:$8 sps:$4 sm:$0xff]   ;;  %v3076_v8 = vld [vmem:[%s4689_s1 + $0x24] ss:$8 sps:$4 sm:$0xff]   ;;  %v3080_v10 = vld [vmem:[%s4689_s1 + $0x20] ss:$8 sps:$4 sm:$0xff]  }
   0x4   :  { %2229 = vmatpush1.bf16.msra.mxu0 %v3069_v3  ;;  %2025 = vmatprep.subr.bf16.mxu1 %v3070_v4  ;;  %v3075_v7 = vld [vmem:[%s4689_s1 + $0x510] ss:$8 sps:$4 sm:$0xff]   ;;  %v3078_v9 = vld [vmem:[%s4689_s1 + $0x524] ss:$8 sps:$4 sm:$0xff]   ;;  %v3081_v11 = vld [vmem:[%s4689_s1 + $0x520] ss:$8 sps:$4 sm:$0xff]  }
   0x5   :  { %2230 = vmatprep.subr.bf16.mxu0 %v3072_v5  ;;  %v3082_v12 = vld [vmem:[%s4689_s1 + $0x34] ss:$8 sps:$4 sm:$0xff]   ;;  %v3086_v14 = vld [vmem:[%s4689_s1 + $0x30] ss:$8 sps:$4 sm:$0xff]   ;;  %v3088_v16 = vld [vmem:[%s4689_s1 + $0x44] ss:$8 sps:$4 sm:$0xff]  }
   0x6   :  { %v3084_v13 = vld [vmem:[%s4689_s1 + $0x534] ss:$8 sps:$4 sm:$0xff]   ;;  %v3087_v15 = vld [vmem:[%s4689_s1 + $0x530] ss:$8 sps:$4 sm:$0xff]   ;;  %v3090_v17 = vld [vmem:[%s4689_s1 + $0x544] ss:$8 sps:$4 sm:$0xff]  }
   0x7   :  { %2026 = vmatpush1.bf16.msra.mxu1 %v3074_v6  ;;  %v3092_v18 = vld [vmem:[%s4689_s1 + $0x40] ss:$8 sps:$4 sm:$0xff]   ;;  %v3094_v20 = vld [vmem:[%s4689_s1 + $0x54] ss:$8 sps:$4 sm:$0xff]   ;;  %v3098_v22 = vld [vmem:[%s4689_s1 + $0x50] ss:$8 sps:$4 sm:$0xff]  }
   0x8   :  { %2231 = vmatpush1.bf16.msra.mxu0 %v3075_v7  ;;  %2027 = vmatprep.subr.bf16.mxu1 %v3076_v8  ;;  %v3093_v19 = vld [vmem:[%s4689_s1 + $0x540] ss:$8 sps:$4 sm:$0xff]   ;;  %v3096_v21 = vld [vmem:[%s4689_s1 + $0x554] ss:$8 sps:$4 sm:$0xff]   ;;  %v3099_v23 = vld [vmem:[%s4689_s1 + $0x550] ss:$8 sps:$4 sm:$0xff]  }
   0x9   :  { %2232 = vmatprep.subr.bf16.mxu0 %v3078_v9  ;;  %v3100_v24 = vld [vmem:[%s4689_s1 + $0x64] ss:$8 sps:$4 sm:$0xff]   ;;  %v3104_v26 = vld [vmem:[%s4689_s1 + $0x60] ss:$8 sps:$4 sm:$0xff]   ;;  %v3106_v28 = vld [vmem:[%s4689_s1 + $0x74] ss:$8 sps:$4 sm:$0xff]  }
   0xa   :  { %v3102_v25 = vld [vmem:[%s4689_s1 + $0x564] ss:$8 sps:$4 sm:$0xff]   ;;  %v3105_v27 = vld [vmem:[%s4689_s1 + $0x560] ss:$8 sps:$4 sm:$0xff]   ;;  %v3108_v29 = vld [vmem:[%s4689_s1 + $0x574] ss:$8 sps:$4 sm:$0xff]  }
   0xb   :  { %2028 = vmatpush1.bf16.msra.mxu1 %v3080_v10  ;;  %v3110_v30 = vld [vmem:[%s4689_s1 + $0x70] ss:$8 sps:$4 sm:$0xff]   ;;  %v3112_v32 = vld [vmem:[%s4689_s1 + $0x84] ss:$8 sps:$4 sm:$0xff]   ;;  %v3116_v34 = vld [vmem:[%s4689_s1 + $0x80] ss:$8 sps:$4 sm:$0xff]  }
   0xc   :  { %2233 = vmatpush1.bf16.msra.mxu0 %v3081_v11  ;;  %2029 = vmatprep.subr.bf16.mxu1 %v3082_v12  ;;  %v3111_v31 = vld [vmem:[%s4689_s1 + $0x570] ss:$8 sps:$4 sm:$0xff]   ;;  %v3114_v33 = vld [vmem:[%s4689_s1 + $0x584] ss:$8 sps:$4 sm:$0xff]   ;;  %v3117_v35 = vld [vmem:[%s4689_s1 + $0x580] ss:$8 sps:$4 sm:$0xff]  }
   0xd   :  { %2234 = vmatprep.subr.bf16.mxu0 %v3084_v13  ;;  %v3118_v36 = vld [vmem:[%s4689_s1 + $0x94] ss:$8 sps:$4 sm:$0xff]   ;;  %v3122_v38 = vld [vmem:[%s4689_s1 + $0x90] ss:$8 sps:$4 sm:$0xff]   ;;  %v3124_v40 = vld [vmem:[%s4689_s1 + $0xa4] ss:$8 sps:$4 sm:$0xff]  }
   0xe   :  { %v3120_v37 = vld [vmem:[%s4689_s1 + $0x594] ss:$8 sps:$4 sm:$0xff]   ;;  %v3123_v39 = vld [vmem:[%s4689_s1 + $0x590] ss:$8 sps:$4 sm:$0xff]   ;;  %v3126_v41 = vld [vmem:[%s4689_s1 + $0x5a4] ss:$8 sps:$4 sm:$0xff]  }
   0xf   :  { %2030 = vmatpush1.bf16.msra.mxu1 %v3086_v14  ;;  %v3128_v42 = vld [vmem:[%s4689_s1 + $0xa0] ss:$8 sps:$4 sm:$0xff]   ;;  %v3130_v44 = vld [vmem:[%s4689_s1 + $0xb4] ss:$8 sps:$4 sm:$0xff]   ;;  %v3134_v47 = vld [vmem:[%s4689_s1 + $0xb0] ss:$8 sps:$4 sm:$0xff]  }
  0x10   :  { %2235 = vmatpush1.bf16.msra.mxu0 %v3087_v15  ;;  %2031 = vmatprep.subr.bf16.mxu1 %v3088_v16  ;;  %v3129_v43 = vld [vmem:[%s4689_s1 + $0x5a0] ss:$8 sps:$4 sm:$0xff]   ;;  %v3132_v45 = vld [vmem:[%s4689_s1 + $0x5b4] ss:$8 sps:$4 sm:$0xff]   ;;  %v3135_v49 = vld [vmem:[%s4689_s1 + $0x5b0] ss:$8 sps:$4 sm:$0xff]  }
  0x11   :  { %2236 = vmatprep.subr.bf16.mxu0 %v3090_v17  ;;  %v22_v46 = vld [vmem:[%s4690_s0 + $0x8] sm:$0xff]  ;;  %v32_v50 = vld [vmem:[%s4690_s0 + $0x58] sm:$0xff]  ;;  %v21_v5 = vld [vmem:[%s4690_s0] sm:$0xff] }
  0x12   :  { %v43_v48 = vpack.c.bf16 %v22_v46, %v22_v46  ;;  %v3136_v51 = vld [vmem:[%s4689_s1 + $0xc4] ss:$8 sps:$4 sm:$0xff]   ;;  %v53_v53 = vpack.c.bf16 %v32_v50, %v32_v50  ;;  %v3140_v54 = vld [vmem:[%s4689_s1 + $0xc0] ss:$8 sps:$4 sm:$0xff]   ;;  %v3142_v56 = vld [vmem:[%s4689_s1 + $0xd4] ss:$8 sps:$4 sm:$0xff]   ;;  %v42_v10 = vpack.c.bf16 %v21_v5, %v21_v5 }
  0x13   :  { %2032 = vmatpush1.bf16.msra.mxu1 %v3092_v18  ;;  %v3138_v52 = vld [vmem:[%s4689_s1 + $0x5c4] ss:$8 sps:$4 sm:$0xff]   ;;  %v3141_v55 = vld [vmem:[%s4689_s1 + $0x5c0] ss:$8 sps:$4 sm:$0xff]   ;;  %v3144_v57 = vld [vmem:[%s4689_s1 + $0x5d4] ss:$8 sps:$4 sm:$0xff]  }
  0x14   :  { %2237 = vmatpush1.bf16.msra.mxu0 %v3093_v19  ;;  %2033 = vmatprep.subr.bf16.mxu1 %v3094_v20  ;;  %v3146_v58 = vld [vmem:[%s4689_s1 + $0xd0] ss:$8 sps:$4 sm:$0xff]   ;;  %v3148_v60 = vld [vmem:[%s4689_s1 + $0xe4] ss:$8 sps:$4 sm:$0xff]   ;;  %v3152_v62 = vld [vmem:[%s4689_s1 + $0xe0] ss:$8 sps:$4 sm:$0xff]  }
  0x15   :  { %2238 = vmatprep.subr.bf16.mxu0 %v3096_v21  ;;  %2055 = vmatprep.mubr.bf16.mxu1 %v43_v48  ;;  %v3147_v59 = vld [vmem:[%s4689_s1 + $0x5d0] ss:$8 sps:$4 sm:$0xff]   ;;  %v3150_v61 = vld [vmem:[%s4689_s1 + $0x5e4] ss:$8 sps:$4 sm:$0xff]   ;;  %v3153_v63 = vld [vmem:[%s4689_s1 + $0x5e0] ss:$8 sps:$4 sm:$0xff]  }
  0x16   :  { %2260 = vmatprep.mubr.bf16.mxu0 %v53_v53  ;;  %v3154_v0 = vld [vmem:[%s4689_s1 + $0xf4] ss:$8 sps:$4 sm:$0xff]   ;;  %v3158_v2 = vld [vmem:[%s4689_s1 + $0xf0] ss:$8 sps:$4 sm:$0xff]   ;;  %v3162_v4 = vld [vmem:[%s4689_s1 + $0x104] ss:$8 sps:$4 sm:$0xff]  }
  0x17   :  { %2034 = vmatpush1.bf16.msra.mxu1 %v3098_v22  ;;  %v3156_v1 = vld [vmem:[%s4689_s1 + $0x5f4] ss:$8 sps:$4 sm:$0xff]   ;;  %v3159_v3 = vld [vmem:[%s4689_s1 + $0x5f0] ss:$8 sps:$4 sm:$0xff]   ;;  %v3165_v7 = vld [vmem:[%s4689_s1 + $0x604] ss:$8 sps:$4 sm:$0xff]  }
  0x18   :  { %2239 = vmatpush1.bf16.msra.mxu0 %v3099_v23  ;;  %2035 = vmatprep.subr.bf16.mxu1 %v3100_v24  ;;  %v31_v6 = vld [vmem:[%s4690_s0 + $0x50] sm:$0xff]  ;;  %v3160_v8 = vld [vmem:[%s4689_s1 + $0x100] ss:$8 sps:$4 sm:$0xff]   ;;  %v3174_v16 = vld [vmem:[%s4689_s1 + $0x124] ss:$8 sps:$4 sm:$0xff]  }
  0x19   :  { %2240 = vmatprep.subr.bf16.mxu0 %v3102_v25  ;;  %v3163_v9 = vld [vmem:[%s4689_s1 + $0x600] ss:$8 sps:$4 sm:$0xff]   ;;  %v52_v11 = vpack.c.bf16 %v31_v6, %v31_v6  ;;  %v3168_v12 = vld [vmem:[%s4689_s1 + $0x114] ss:$8 sps:$4 sm:$0xff]   ;;  %v3166_v14 = vld [vmem:[%s4689_s1 + $0x110] ss:$8 sps:$4 sm:$0xff]  }
  0x1a   :  { %v3171_v13 = vld [vmem:[%s4689_s1 + $0x614] ss:$8 sps:$4 sm:$0xff]   ;;  %v3169_v15 = vld [vmem:[%s4689_s1 + $0x610] ss:$8 sps:$4 sm:$0xff]   ;;  %v3177_v17 = vld [vmem:[%s4689_s1 + $0x624] ss:$8 sps:$4 sm:$0xff]  }
  0x1b   :  { %2036 = vmatpush1.bf16.msra.mxu1 %v3104_v26  ;;  %v3172_v18 = vld [vmem:[%s4689_s1 + $0x120] ss:$8 sps:$4 sm:$0xff]   ;;  %v3180_v20 = vld [vmem:[%s4689_s1 + $0x134] ss:$8 sps:$4 sm:$0xff]   ;;  %v3178_v22 = vld [vmem:[%s4689_s1 + $0x130] ss:$8 sps:$4 sm:$0xff]  }
  0x1c   :  { %2241 = vmatpush1.bf16.msra.mxu0 %v3105_v27  ;;  %2037 = vmatprep.subr.bf16.mxu1 %v3106_v28  ;;  %v3175_v19 = vld [vmem:[%s4689_s1 + $0x620] ss:$8 sps:$4 sm:$0xff]   ;;  %v3183_v21 = vld [vmem:[%s4689_s1 + $0x634] ss:$8 sps:$4 sm:$0xff]   ;;  %v3181_v23 = vld [vmem:[%s4689_s1 + $0x630] ss:$8 sps:$4 sm:$0xff]  }
  0x1d   :  { %2242 = vmatprep.subr.bf16.mxu0 %v3108_v29  ;;  %v3186_v24 = vld [vmem:[%s4689_s1 + $0x144] ss:$8 sps:$4 sm:$0xff]   ;;  %v3184_v26 = vld [vmem:[%s4689_s1 + $0x140] ss:$8 sps:$4 sm:$0xff]   ;;  %v3192_v28 = vld [vmem:[%s4689_s1 + $0x154] ss:$8 sps:$4 sm:$0xff]  }
  0x1e   :  { %v3189_v25 = vld [vmem:[%s4689_s1 + $0x644] ss:$8 sps:$4 sm:$0xff]   ;;  %v3187_v27 = vld [vmem:[%s4689_s1 + $0x640] ss:$8 sps:$4 sm:$0xff]   ;;  %v3195_v29 = vld [vmem:[%s4689_s1 + $0x654] ss:$8 sps:$4 sm:$0xff]  }
  0x1f   :  { %2038 = vmatpush1.bf16.msra.mxu1 %v3110_v30  ;;  %v3190_v30 = vld [vmem:[%s4689_s1 + $0x150] ss:$8 sps:$4 sm:$0xff]   ;;  %v3208_v46 = vld [vmem:[%s4689_s1 + $0x180] ss:$8 sps:$4 sm:$0xff]   ;;  %v3216_v48 = vld [vmem:[%s4689_s1 + $0x194] ss:$8 sps:$4 sm:$0xff]  }
  0x20   :  { %2243 = vmatpush1.bf16.msra.mxu0 %v3111_v31  ;;  %2039 = vmatprep.subr.bf16.mxu1 %v3112_v32  ;;  %v3193_v31 = vld [vmem:[%s4689_s1 + $0x650] ss:$8 sps:$4 sm:$0xff]   ;;  %v3198_v32 = vld [vmem:[%s4689_s1 + $0x164] ss:$8 sps:$4 sm:$0xff]   ;;  %v3244_v6 = vld [vmem:[%s4689_s1 + $0x1e0] ss:$8 sps:$4 sm:$0xff]  }
  0x21   :  { %2244 = vmatprep.subr.bf16.mxu0 %v3114_v33  ;;  %v3201_v33 = vld [vmem:[%s4689_s1 + $0x664] ss:$8 sps:$4 sm:$0xff]   ;;  %v3214_v50 = vld [vmem:[%s4689_s1 + $0x190] ss:$8 sps:$4 sm:$0xff]  }
  0x22   :  { %v3225_v53 = vld [vmem:[%s4689_s1 + $0x6a4] ss:$8 sps:$4 sm:$0xff]  }
  0x23   :  { %2040 = vmatpush1.bf16.msra.mxu1 %v3116_v34  ;;  %v24_v34 = vld [vmem:[%s4690_s0 + $0x18] sm:$0xff]  ;;  %v3249_v5 = vld [vmem:[%s4689_s1 + $0x6e4] ss:$8 sps:$4 sm:$0xff]  }
  0x24   :  { %2245 = vmatpush1.bf16.msra.mxu0 %v3117_v35  ;;  %2041 = vmatprep.subr.bf16.mxu1 %v3118_v36  ;;  %v3196_v35 = vld [vmem:[%s4689_s1 + $0x160] ss:$8 sps:$4 sm:$0xff]   ;;  %v45_v36 = vpack.c.bf16 %v24_v34, %v24_v34  ;;  %v3274_v34 = vld [vmem:[%s4689_s1 + $0x230] ss:$8 sps:$4 sm:$0xff]  }
  0x25   :  { %2246 = vmatprep.subr.bf16.mxu0 %v3120_v37  ;;  %v3199_v37 = vld [vmem:[%s4689_s1 + $0x660] ss:$8 sps:$4 sm:$0xff]  }
  0x27   :  { %2042 = vmatpush1.bf16.msra.mxu1 %v3122_v38  ;;  %v34_v38 = vld [vmem:[%s4690_s0 + $0x68] sm:$0xff] }
  0x28   :  { %2247 = vmatpush1.bf16.msra.mxu0 %v3123_v39  ;;  %2043 = vmatprep.subr.bf16.mxu1 %v3124_v40  ;;  %v3204_v39 = vld [vmem:[%s4689_s1 + $0x174] ss:$8 sps:$4 sm:$0xff]  }
  0x29   :  { %2248 = vmatprep.subr.bf16.mxu0 %v3126_v41  ;;  %v3207_v40 = vld [vmem:[%s4689_s1 + $0x674] ss:$8 sps:$4 sm:$0xff]   ;;  %v55_v41 = vpack.c.bf16 %v34_v38, %v34_v38  ;;  %v3280_v38 = vld [vmem:[%s4689_s1 + $0x240] ss:$8 sps:$4 sm:$0xff]  }
  0x2b   :  { %2044 = vmatpush1.bf16.msra.mxu1 %v3128_v42  ;;  %v3202_v42 = vld [vmem:[%s4689_s1 + $0x170] ss:$8 sps:$4 sm:$0xff]  }
  0x2c   :  { %2249 = vmatpush1.bf16.msra.mxu0 %v3129_v43  ;;  %2045 = vmatprep.subr.bf16.mxu1 %v3130_v44  ;;  %v3205_v43 = vld [vmem:[%s4689_s1 + $0x670] ss:$8 sps:$4 sm:$0xff]   ;;  %v3210_v44 = vld [vmem:[%s4689_s1 + $0x184] ss:$8 sps:$4 sm:$0xff]  }
  0x2d   :  { %2250 = vmatprep.subr.bf16.mxu0 %v3132_v45  ;;  %v3213_v45 = vld [vmem:[%s4689_s1 + $0x684] ss:$8 sps:$4 sm:$0xff]  }
  0x2f   :  { %2046 = vmatpush1.bf16.msra.mxu1 %v3134_v47  ;;  %v3211_v47 = vld [vmem:[%s4689_s1 + $0x680] ss:$8 sps:$4 sm:$0xff]  }
  0x30   :  { %2251 = vmatpush1.bf16.msra.mxu0 %v3135_v49  ;;  %2047 = vmatprep.subr.bf16.mxu1 %v3136_v51  ;;  %v3219_v49 = vld [vmem:[%s4689_s1 + $0x694] ss:$8 sps:$4 sm:$0xff]   ;;  %v3217_v51 = vld [vmem:[%s4689_s1 + $0x690] ss:$8 sps:$4 sm:$0xff]  }
  0x31   :  { %2252 = vmatprep.subr.bf16.mxu0 %v3138_v52  ;;  %v3222_v52 = vld [vmem:[%s4689_s1 + $0x1a4] ss:$8 sps:$4 sm:$0xff]  }
  0x33   :  { %2048 = vmatpush1.bf16.msra.mxu1 %v3140_v54  ;;  %v3220_v54 = vld [vmem:[%s4689_s1 + $0x1a0] ss:$8 sps:$4 sm:$0xff]  }
  0x34   :  { %2253 = vmatpush1.bf16.msra.mxu0 %v3141_v55  ;;  %2049 = vmatprep.subr.bf16.mxu1 %v3142_v56  ;;  %v3223_v55 = vld [vmem:[%s4689_s1 + $0x6a0] ss:$8 sps:$4 sm:$0xff]   ;;  %v3228_v56 = vld [vmem:[%s4689_s1 + $0x1b4] ss:$8 sps:$4 sm:$0xff]  }
  0x35   :  { %2254 = vmatprep.subr.bf16.mxu0 %v3144_v57  ;;  %v3231_v57 = vld [vmem:[%s4689_s1 + $0x6b4] ss:$8 sps:$4 sm:$0xff]  }
  0x37   :  { %2050 = vmatpush1.bf16.msra.mxu1 %v3146_v58  ;;  %v3226_v58 = vld [vmem:[%s4689_s1 + $0x1b0] ss:$8 sps:$4 sm:$0xff]  }
  0x38   :  { %2255 = vmatpush1.bf16.msra.mxu0 %v3147_v59  ;;  %2051 = vmatprep.subr.bf16.mxu1 %v3148_v60  ;;  %v3229_v59 = vld [vmem:[%s4689_s1 + $0x6b0] ss:$8 sps:$4 sm:$0xff]   ;;  %v3234_v60 = vld [vmem:[%s4689_s1 + $0x1c4] ss:$8 sps:$4 sm:$0xff]  }
  0x39   :  { %2256 = vmatprep.subr.bf16.mxu0 %v3150_v61  ;;  %v3237_v61 = vld [vmem:[%s4689_s1 + $0x6c4] ss:$8 sps:$4 sm:$0xff]  }
  0x3b   :  { %2052 = vmatpush1.bf16.msra.mxu1 %v3152_v62  ;;  %v3232_v62 = vld [vmem:[%s4689_s1 + $0x1c0] ss:$8 sps:$4 sm:$0xff]  }
  0x3c   :  { %2257 = vmatpush1.bf16.msra.mxu0 %v3153_v63  ;;  %2053 = vmatprep.subr.bf16.mxu1 %v3154_v0  ;;  %v3235_v63 = vld [vmem:[%s4689_s1 + $0x6c0] ss:$8 sps:$4 sm:$0xff]   ;;  %v3240_v0 = vld [vmem:[%s4689_s1 + $0x1d4] ss:$8 sps:$4 sm:$0xff]  }
  0x3d   :  { %2258 = vmatprep.subr.bf16.mxu0 %v3156_v1  ;;  %v3243_v1 = vld [vmem:[%s4689_s1 + $0x6d4] ss:$8 sps:$4 sm:$0xff]  }
  0x3f   :  { %2054 = vmatpush1.bf16.msra.mxu1 %v3158_v2  ;;  %v3238_v2 = vld [vmem:[%s4689_s1 + $0x1d0] ss:$8 sps:$4 sm:$0xff]  }
  0x40   :  { %2259 = vmatpush1.bf16.msra.mxu0 %v3159_v3  ;;  %2064 = vmatprep.subr.bf16.mxu1 %v3162_v4  ;;  %v3241_v3 = vld [vmem:[%s4689_s1 + $0x6d0] ss:$8 sps:$4 sm:$0xff]   ;;  %v3246_v4 = vld [vmem:[%s4689_s1 + $0x1e4] ss:$8 sps:$4 sm:$0xff]  }
  0x41   :  { %2269 = vmatprep.subr.bf16.mxu0 %v3165_v7  ;;  %v3247_v7 = vld [vmem:[%s4689_s1 + $0x6e0] ss:$8 sps:$4 sm:$0xff]  }
  0x42   :  { %2056 = vmatmul.mubr.bf16.vlgmr.msra.gmra.mrb[0].mxu1 %v42_v10  ;;  %v3250_v10 = vld [vmem:[%s4689_s1 + $0x1f0] ss:$8 sps:$4 sm:$0xff]  }
  0x43   :  { %2261 = vmatmul.mubr.bf16.vlgmr.msra.gmra.mrb[0].mxu0 %v52_v11  ;;  %2065 = vmatpush1.bf16.msra.mxu1 %v3160_v8  ;;  %v3252_v8 = vld [vmem:[%s4689_s1 + $0x1f4] ss:$8 sps:$4 sm:$0xff]   ;;  %v3253_v11 = vld [vmem:[%s4689_s1 + $0x6f0] ss:$8 sps:$4 sm:$0xff]  }
  0x44   :  { %2270 = vmatpush1.bf16.msra.mxu0 %v3163_v9  ;;  %2066 = vmatprep.subr.bf16.mxu1 %v3168_v12  ;;  %v3255_v9 = vld [vmem:[%s4689_s1 + $0x6f4] ss:$8 sps:$4 sm:$0xff]   ;;  %v3258_v12 = vld [vmem:[%s4689_s1 + $0x204] ss:$8 sps:$4 sm:$0xff]  }
  0x45   :  { %2271 = vmatprep.subr.bf16.mxu0 %v3171_v13  ;;  %2096 = vmatprep.mubr.bf16.mxu1 %v45_v36  ;;  %v23_v13 = vld [vmem:[%s4690_s0 + $0x10] sm:$0xff]  ;;  %v3282_v36 = vld [vmem:[%s4689_s1 + $0x244] ss:$8 sps:$4 sm:$0xff]  }
  0x46   :  { %2301 = vmatprep.mubr.bf16.mxu0 %v55_v41  ;;  %v3291_v41 = vld [vmem:[%s4689_s1 + $0x754] ss:$8 sps:$4 sm:$0xff]  }
  0x47   :  { %2067 = vmatpush1.bf16.msra.mxu1 %v3166_v14  ;;  %v33_v14 = vld [vmem:[%s4690_s0 + $0x60] sm:$0xff] }
  0x48   :  { %2272 = vmatpush1.bf16.msra.mxu0 %v3169_v15  ;;  %2068 = vmatprep.subr.bf16.mxu1 %v3174_v16  ;;  %v3261_v15 = vld [vmem:[%s4689_s1 + $0x704] ss:$8 sps:$4 sm:$0xff]   ;;  %v3256_v16 = vld [vmem:[%s4689_s1 + $0x200] ss:$8 sps:$4 sm:$0xff]  }
  0x49   :  { %2273 = vmatprep.subr.bf16.mxu0 %v3177_v17  ;;  %v3259_v17 = vld [vmem:[%s4689_s1 + $0x700] ss:$8 sps:$4 sm:$0xff]  }
  0x4b   :  { %2069 = vmatpush1.bf16.msra.mxu1 %v3172_v18  ;;  %v44_v18 = vpack.c.bf16 %v23_v13, %v23_v13  ;;  %v3345_v13 = vld [vmem:[%s4689_s1 + $0x7e4] ss:$8 sps:$4 sm:$0xff]  }
  0x4c   :  { %2274 = vmatpush1.bf16.msra.mxu0 %v3175_v19  ;;  %2070 = vmatprep.subr.bf16.mxu1 %v3180_v20  ;;  %v54_v19 = vpack.c.bf16 %v33_v14, %v33_v14  ;;  %v3264_v20 = vld [vmem:[%s4689_s1 + $0x214] ss:$8 sps:$4 sm:$0xff]   ;;  %v3340_v14 = vld [vmem:[%s4689_s1 + $0x2e0] ss:$8 sps:$4 sm:$0xff]  }
  0x4d   :  { %2275 = vmatprep.subr.bf16.mxu0 %v3183_v21  ;;  %v3267_v21 = vld [vmem:[%s4689_s1 + $0x714] ss:$8 sps:$4 sm:$0xff]  }
  0x4f   :  { %2071 = vmatpush1.bf16.msra.mxu1 %v3178_v22  ;;  %v26_v22 = vld [vmem:[%s4690_s0 + $0x28] sm:$0xff] }
  0x50   :  { %2276 = vmatpush1.bf16.msra.mxu0 %v3181_v23  ;;  %2072 = vmatprep.subr.bf16.mxu1 %v3186_v24  ;;  %v3262_v23 = vld [vmem:[%s4689_s1 + $0x210] ss:$8 sps:$4 sm:$0xff]   ;;  %v47_v24 = vpack.c.bf16 %v26_v22, %v26_v22 }
  0x51   :  { %2277 = vmatprep.subr.bf16.mxu0 %v3189_v25  ;;  %v3265_v25 = vld [vmem:[%s4689_s1 + $0x710] ss:$8 sps:$4 sm:$0xff]  }
  0x52   :  { %v35_v22 = vld [vmem:[%s4690_s0 + $0x70] sm:$0xff] }
  0x53   :  { %2073 = vmatpush1.bf16.msra.mxu1 %v3184_v26  ;;  %v36_v26 = vld [vmem:[%s4690_s0 + $0x78] sm:$0xff] }
  0x54   :  { %2278 = vmatpush1.bf16.msra.mxu0 %v3187_v27  ;;  %2074 = vmatprep.subr.bf16.mxu1 %v3192_v28  ;;  %v3270_v27 = vld [vmem:[%s4689_s1 + $0x224] ss:$8 sps:$4 sm:$0xff]  }
  0x55   :  { %2279 = vmatprep.subr.bf16.mxu0 %v3195_v29  ;;  %v3273_v28 = vld [vmem:[%s4689_s1 + $0x724] ss:$8 sps:$4 sm:$0xff]   ;;  %v57_v29 = vpack.c.bf16 %v36_v26, %v36_v26 }
  0x57   :  { %2075 = vmatpush1.bf16.msra.mxu1 %v3190_v30  ;;  %v3268_v30 = vld [vmem:[%s4689_s1 + $0x220] ss:$8 sps:$4 sm:$0xff]  }
  0x58   :  { %2280 = vmatpush1.bf16.msra.mxu0 %v3193_v31  ;;  %2076 = vmatprep.subr.bf16.mxu1 %v3198_v32  ;;  %v3271_v31 = vld [vmem:[%s4689_s1 + $0x720] ss:$8 sps:$4 sm:$0xff]   ;;  %v3276_v32 = vld [vmem:[%s4689_s1 + $0x234] ss:$8 sps:$4 sm:$0xff]  }
  0x59   :  { %2281 = vmatprep.subr.bf16.mxu0 %v3201_v33  ;;  %v3279_v33 = vld [vmem:[%s4689_s1 + $0x734] ss:$8 sps:$4 sm:$0xff]  }
  0x5b   :  { %2077 = vmatpush1.bf16.msra.mxu1 %v3196_v35  ;;  %v3277_v35 = vld [vmem:[%s4689_s1 + $0x730] ss:$8 sps:$4 sm:$0xff]  }
  0x5c   :  { %2282 = vmatpush1.bf16.msra.mxu0 %v3199_v37  ;;  %2078 = vmatprep.subr.bf16.mxu1 %v3204_v39  ;;  %v3285_v37 = vld [vmem:[%s4689_s1 + $0x744] ss:$8 sps:$4 sm:$0xff]   ;;  %v3283_v39 = vld [vmem:[%s4689_s1 + $0x740] ss:$8 sps:$4 sm:$0xff]  }
  0x5d   :  { %2283 = vmatprep.subr.bf16.mxu0 %v3207_v40  ;;  %v3288_v40 = vld [vmem:[%s4689_s1 + $0x254] ss:$8 sps:$4 sm:$0xff]  }
  0x5f   :  { %2079 = vmatpush1.bf16.msra.mxu1 %v3202_v42  ;;  %v3286_v42 = vld [vmem:[%s4689_s1 + $0x250] ss:$8 sps:$4 sm:$0xff]  }
  0x60   :  { %2284 = vmatpush1.bf16.msra.mxu0 %v3205_v43  ;;  %2080 = vmatprep.subr.bf16.mxu1 %v3210_v44  ;;  %v3289_v43 = vld [vmem:[%s4689_s1 + $0x750] ss:$8 sps:$4 sm:$0xff]   ;;  %v3294_v44 = vld [vmem:[%s4689_s1 + $0x264] ss:$8 sps:$4 sm:$0xff]  }
  0x61   :  { %2285 = vmatprep.subr.bf16.mxu0 %v3213_v45  ;;  %v3297_v45 = vld [vmem:[%s4689_s1 + $0x764] ss:$8 sps:$4 sm:$0xff]  }
  0x63   :  { %2081 = vmatpush1.bf16.msra.mxu1 %v3208_v46  ;;  %v3292_v46 = vld [vmem:[%s4689_s1 + $0x260] ss:$8 sps:$4 sm:$0xff]  }
  0x64   :  { %2286 = vmatpush1.bf16.msra.mxu0 %v3211_v47  ;;  %2082 = vmatprep.subr.bf16.mxu1 %v3216_v48  ;;  %v3295_v47 = vld [vmem:[%s4689_s1 + $0x760] ss:$8 sps:$4 sm:$0xff]   ;;  %v3300_v48 = vld [vmem:[%s4689_s1 + $0x274] ss:$8 sps:$4 sm:$0xff]  }
  0x65   :  { %2287 = vmatprep.subr.bf16.mxu0 %v3219_v49  ;;  %v3303_v49 = vld [vmem:[%s4689_s1 + $0x774] ss:$8 sps:$4 sm:$0xff]  }
  0x67   :  { %2083 = vmatpush1.bf16.msra.mxu1 %v3214_v50  ;;  %v3298_v50 = vld [vmem:[%s4689_s1 + $0x270] ss:$8 sps:$4 sm:$0xff]  }
  0x68   :  { %2288 = vmatpush1.bf16.msra.mxu0 %v3217_v51  ;;  %2084 = vmatprep.subr.bf16.mxu1 %v3222_v52  ;;  %v3301_v51 = vld [vmem:[%s4689_s1 + $0x770] ss:$8 sps:$4 sm:$0xff]   ;;  %v3306_v52 = vld [vmem:[%s4689_s1 + $0x284] ss:$8 sps:$4 sm:$0xff]  }
  0x69   :  { %2289 = vmatprep.subr.bf16.mxu0 %v3225_v53  ;;  %v3309_v53 = vld [vmem:[%s4689_s1 + $0x784] ss:$8 sps:$4 sm:$0xff]  }
  0x6b   :  { %2085 = vmatpush1.bf16.msra.mxu1 %v3220_v54  ;;  %v3304_v54 = vld [vmem:[%s4689_s1 + $0x280] ss:$8 sps:$4 sm:$0xff]  }
  0x6c   :  { %2290 = vmatpush1.bf16.msra.mxu0 %v3223_v55  ;;  %2086 = vmatprep.subr.bf16.mxu1 %v3228_v56  ;;  %v3307_v55 = vld [vmem:[%s4689_s1 + $0x780] ss:$8 sps:$4 sm:$0xff]   ;;  %v3312_v56 = vld [vmem:[%s4689_s1 + $0x294] ss:$8 sps:$4 sm:$0xff]  }
  0x6d   :  { %2291 = vmatprep.subr.bf16.mxu0 %v3231_v57  ;;  %v3315_v57 = vld [vmem:[%s4689_s1 + $0x794] ss:$8 sps:$4 sm:$0xff]  }
  0x6f   :  { %2087 = vmatpush1.bf16.msra.mxu1 %v3226_v58  ;;  %v3310_v58 = vld [vmem:[%s4689_s1 + $0x290] ss:$8 sps:$4 sm:$0xff]  }
  0x70   :  { %2292 = vmatpush1.bf16.msra.mxu0 %v3229_v59  ;;  %2088 = vmatprep.subr.bf16.mxu1 %v3234_v60  ;;  %v3313_v59 = vld [vmem:[%s4689_s1 + $0x790] ss:$8 sps:$4 sm:$0xff]   ;;  %v3318_v60 = vld [vmem:[%s4689_s1 + $0x2a4] ss:$8 sps:$4 sm:$0xff]  }
  0x71   :  { %2293 = vmatprep.subr.bf16.mxu0 %v3237_v61  ;;  %v3321_v61 = vld [vmem:[%s4689_s1 + $0x7a4] ss:$8 sps:$4 sm:$0xff]  }
  0x73   :  { %2089 = vmatpush1.bf16.msra.mxu1 %v3232_v62  ;;  %v3316_v62 = vld [vmem:[%s4689_s1 + $0x2a0] ss:$8 sps:$4 sm:$0xff]  }
  0x74   :  { %2294 = vmatpush1.bf16.msra.mxu0 %v3235_v63  ;;  %2090 = vmatprep.subr.bf16.mxu1 %v3240_v0  ;;  %v3319_v63 = vld [vmem:[%s4689_s1 + $0x7a0] ss:$8 sps:$4 sm:$0xff]   ;;  %v3324_v0 = vld [vmem:[%s4689_s1 + $0x2b4] ss:$8 sps:$4 sm:$0xff]  }
  0x75   :  { %2295 = vmatprep.subr.bf16.mxu0 %v3243_v1  ;;  %v3327_v1 = vld [vmem:[%s4689_s1 + $0x7b4] ss:$8 sps:$4 sm:$0xff]  }
  0x77   :  { %2091 = vmatpush1.bf16.msra.mxu1 %v3238_v2  ;;  %v3322_v2 = vld [vmem:[%s4689_s1 + $0x2b0] ss:$8 sps:$4 sm:$0xff]  }
  0x78   :  { %2296 = vmatpush1.bf16.msra.mxu0 %v3241_v3  ;;  %2092 = vmatprep.subr.bf16.mxu1 %v3246_v4  ;;  %v3325_v3 = vld [vmem:[%s4689_s1 + $0x7b0] ss:$8 sps:$4 sm:$0xff]   ;;  %v3330_v4 = vld [vmem:[%s4689_s1 + $0x2c4] ss:$8 sps:$4 sm:$0xff]  }
  0x79   :  { %2297 = vmatprep.subr.bf16.mxu0 %v3249_v5  ;;  %v3333_v5 = vld [vmem:[%s4689_s1 + $0x7c4] ss:$8 sps:$4 sm:$0xff]  }
  0x7b   :  { %2093 = vmatpush1.bf16.msra.mxu1 %v3244_v6  ;;  %v3328_v6 = vld [vmem:[%s4689_s1 + $0x2c0] ss:$8 sps:$4 sm:$0xff]  }
  0x7c   :  { %2298 = vmatpush1.bf16.msra.mxu0 %v3247_v7  ;;  %2094 = vmatprep.subr.bf16.mxu1 %v3252_v8  ;;  %v3331_v7 = vld [vmem:[%s4689_s1 + $0x7c0] ss:$8 sps:$4 sm:$0xff]   ;;  %v3336_v8 = vld [vmem:[%s4689_s1 + $0x2d4] ss:$8 sps:$4 sm:$0xff]  }
  0x7d   :  { %2299 = vmatprep.subr.bf16.mxu0 %v3255_v9  ;;  %v3339_v9 = vld [vmem:[%s4689_s1 + $0x7d4] ss:$8 sps:$4 sm:$0xff]  }
  0x7f   :  { %2095 = vmatpush1.bf16.msra.mxu1 %v3250_v10  ;;  %v3334_v10 = vld [vmem:[%s4689_s1 + $0x2d0] ss:$8 sps:$4 sm:$0xff]  }
  0x80   :  { %2300 = vmatpush1.bf16.msra.mxu0 %v3253_v11  ;;  %2105 = vmatprep.subr.bf16.mxu1 %v3258_v12  ;;  %v3337_v11 = vld [vmem:[%s4689_s1 + $0x7d0] ss:$8 sps:$4 sm:$0xff]   ;;  %v3342_v12 = vld [vmem:[%s4689_s1 + $0x2e4] ss:$8 sps:$4 sm:$0xff]  }
  0x81   :  { %2310 = vmatprep.subr.bf16.mxu0 %v3261_v15  ;;  %v3343_v15 = vld [vmem:[%s4689_s1 + $0x7e0] ss:$8 sps:$4 sm:$0xff]  }
  0x82   :  { %2097 = vmatmul.mubr.bf16.vlgmr.msra.gmra.mrb[0].mxu1 %v44_v18  ;;  %v3346_v18 = vld [vmem:[%s4689_s1 + $0x2f0] ss:$8 sps:$4 sm:$0xff]  }
  0x83   :  { %2302 = vmatmul.mubr.bf16.vlgmr.msra.gmra.mrb[0].mxu0 %v54_v19  ;;  %2106 = vmatpush1.bf16.msra.mxu1 %v3256_v16  ;;  %v3348_v16 = vld [vmem:[%s4689_s1 + $0x2f4] ss:$8 sps:$4 sm:$0xff]   ;;  %v3349_v19 = vld [vmem:[%s4689_s1 + $0x7f0] ss:$8 sps:$4 sm:$0xff]  }
  0x84   :  { %2311 = vmatpush1.bf16.msra.mxu0 %v3259_v17  ;;  %2107 = vmatprep.subr.bf16.mxu1 %v3264_v20  ;;  %v3351_v17 = vld [vmem:[%s4689_s1 + $0x7f4] ss:$8 sps:$4 sm:$0xff]   ;;  %v3354_v20 = vld [vmem:[%s4689_s1 + $0x304] ss:$8 sps:$4 sm:$0xff]  }
  0x85   :  { %2312 = vmatprep.subr.bf16.mxu0 %v3267_v21  ;;  %2137 = vmatprep.mubr.bf16.mxu1 %v47_v24  ;;  %v25_v21 = vld [vmem:[%s4690_s0 + $0x20] sm:$0xff] }
  0x86   :  { %2342 = vmatprep.mubr.bf16.mxu0 %v57_v29  ;;  %v3352_v24 = vld [vmem:[%s4689_s1 + $0x300] ss:$8 sps:$4 sm:$0xff]   ;;  %v46_v26 = vpack.c.bf16 %v25_v21, %v25_v21  ;;  %v3441_v21 = vld [vmem:[%s4689_s1 + $0x8e4] ss:$8 sps:$4 sm:$0xff]  }
  0x87   :  { %2108 = vmatpush1.bf16.msra.mxu1 %v3262_v23  ;;  %v3357_v23 = vld [vmem:[%s4689_s1 + $0x804] ss:$8 sps:$4 sm:$0xff]  }
  0x88   :  { %2313 = vmatpush1.bf16.msra.mxu0 %v3265_v25  ;;  %2109 = vmatprep.subr.bf16.mxu1 %v3270_v27  ;;  %v3355_v25 = vld [vmem:[%s4689_s1 + $0x800] ss:$8 sps:$4 sm:$0xff]   ;;  %v56_v27 = vpack.c.bf16 %v35_v22, %v35_v22 }
  0x89   :  { %2314 = vmatprep.subr.bf16.mxu0 %v3273_v28  ;;  %v28_v28 = vld [vmem:[%s4690_s0 + $0x38] sm:$0xff]  ;;  %v38_v29 = vld [vmem:[%s4690_s0 + $0x88] sm:$0xff] }
  0x8a   :  { %v3436_v22 = vld [vmem:[%s4689_s1 + $0x3e0] ss:$8 sps:$4 sm:$0xff]  }
  0x8b   :  { %2110 = vmatpush1.bf16.msra.mxu1 %v3268_v30  ;;  %v3360_v30 = vld [vmem:[%s4689_s1 + $0x314] ss:$8 sps:$4 sm:$0xff]  }
  0x8c   :  { %2315 = vmatpush1.bf16.msra.mxu0 %v3271_v31  ;;  %2111 = vmatprep.subr.bf16.mxu1 %v3276_v32  ;;  %v3363_v31 = vld [vmem:[%s4689_s1 + $0x814] ss:$8 sps:$4 sm:$0xff]   ;;  %v49_v32 = vpack.c.bf16 %v28_v28, %v28_v28 }
  0x8d   :  { %2316 = vmatprep.subr.bf16.mxu0 %v3279_v33  ;;  %v59_v33 = vpack.c.bf16 %v38_v29, %v38_v29  ;;  %v27_v28 = vld [vmem:[%s4690_s0 + $0x30] sm:$0xff]  ;;  %v37_v29 = vld [vmem:[%s4690_s0 + $0x80] sm:$0xff] }
  0x8f   :  { %2112 = vmatpush1.bf16.msra.mxu1 %v3274_v34  ;;  %v3358_v34 = vld [vmem:[%s4689_s1 + $0x310] ss:$8 sps:$4 sm:$0xff]  }
  0x90   :  { %2317 = vmatpush1.bf16.msra.mxu0 %v3277_v35  ;;  %2113 = vmatprep.subr.bf16.mxu1 %v3282_v36  ;;  %v3361_v35 = vld [vmem:[%s4689_s1 + $0x810] ss:$8 sps:$4 sm:$0xff]   ;;  %v3366_v36 = vld [vmem:[%s4689_s1 + $0x324] ss:$8 sps:$4 sm:$0xff]  }
  0x91   :  { %2318 = vmatprep.subr.bf16.mxu0 %v3285_v37  ;;  %v3369_v37 = vld [vmem:[%s4689_s1 + $0x824] ss:$8 sps:$4 sm:$0xff]  }
  0x93   :  { %2114 = vmatpush1.bf16.msra.mxu1 %v3280_v38  ;;  %v3364_v38 = vld [vmem:[%s4689_s1 + $0x320] ss:$8 sps:$4 sm:$0xff]  }
  0x94   :  { %2319 = vmatpush1.bf16.msra.mxu0 %v3283_v39  ;;  %2115 = vmatprep.subr.bf16.mxu1 %v3288_v40  ;;  %v3367_v39 = vld [vmem:[%s4689_s1 + $0x820] ss:$8 sps:$4 sm:$0xff]   ;;  %v3372_v40 = vld [vmem:[%s4689_s1 + $0x334] ss:$8 sps:$4 sm:$0xff]  }
  0x95   :  { %2320 = vmatprep.subr.bf16.mxu0 %v3291_v41  ;;  %v3375_v41 = vld [vmem:[%s4689_s1 + $0x834] ss:$8 sps:$4 sm:$0xff]  }
  0x97   :  { %2116 = vmatpush1.bf16.msra.mxu1 %v3286_v42  ;;  %v3370_v42 = vld [vmem:[%s4689_s1 + $0x330] ss:$8 sps:$4 sm:$0xff]  }
  0x98   :  { %2321 = vmatpush1.bf16.msra.mxu0 %v3289_v43  ;;  %2117 = vmatprep.subr.bf16.mxu1 %v3294_v44  ;;  %v3373_v43 = vld [vmem:[%s4689_s1 + $0x830] ss:$8 sps:$4 sm:$0xff]   ;;  %v3378_v44 = vld [vmem:[%s4689_s1 + $0x344] ss:$8 sps:$4 sm:$0xff]  }
  0x99   :  { %2322 = vmatprep.subr.bf16.mxu0 %v3297_v45  ;;  %v3381_v45 = vld [vmem:[%s4689_s1 + $0x844] ss:$8 sps:$4 sm:$0xff]  }
  0x9b   :  { %2118 = vmatpush1.bf16.msra.mxu1 %v3292_v46  ;;  %v3376_v46 = vld [vmem:[%s4689_s1 + $0x340] ss:$8 sps:$4 sm:$0xff]  }
  0x9c   :  { %2323 = vmatpush1.bf16.msra.mxu0 %v3295_v47  ;;  %2119 = vmatprep.subr.bf16.mxu1 %v3300_v48  ;;  %v3379_v47 = vld [vmem:[%s4689_s1 + $0x840] ss:$8 sps:$4 sm:$0xff]   ;;  %v3384_v48 = vld [vmem:[%s4689_s1 + $0x354] ss:$8 sps:$4 sm:$0xff]  }
  0x9d   :  { %2324 = vmatprep.subr.bf16.mxu0 %v3303_v49  ;;  %v3387_v49 = vld [vmem:[%s4689_s1 + $0x854] ss:$8 sps:$4 sm:$0xff]  }
  0x9f   :  { %2120 = vmatpush1.bf16.msra.mxu1 %v3298_v50  ;;  %v3382_v50 = vld [vmem:[%s4689_s1 + $0x350] ss:$8 sps:$4 sm:$0xff]  }
  0xa0   :  { %2325 = vmatpush1.bf16.msra.mxu0 %v3301_v51  ;;  %2121 = vmatprep.subr.bf16.mxu1 %v3306_v52  ;;  %v3385_v51 = vld [vmem:[%s4689_s1 + $0x850] ss:$8 sps:$4 sm:$0xff]   ;;  %v3390_v52 = vld [vmem:[%s4689_s1 + $0x364] ss:$8 sps:$4 sm:$0xff]  }
  0xa1   :  { %2326 = vmatprep.subr.bf16.mxu0 %v3309_v53  ;;  %v3393_v53 = vld [vmem:[%s4689_s1 + $0x864] ss:$8 sps:$4 sm:$0xff]  }
  0xa3   :  { %2122 = vmatpush1.bf16.msra.mxu1 %v3304_v54  ;;  %v3388_v54 = vld [vmem:[%s4689_s1 + $0x360] ss:$8 sps:$4 sm:$0xff]  }
  0xa4   :  { %2327 = vmatpush1.bf16.msra.mxu0 %v3307_v55  ;;  %2123 = vmatprep.subr.bf16.mxu1 %v3312_v56  ;;  %v3391_v55 = vld [vmem:[%s4689_s1 + $0x860] ss:$8 sps:$4 sm:$0xff]   ;;  %v3396_v56 = vld [vmem:[%s4689_s1 + $0x374] ss:$8 sps:$4 sm:$0xff]  }
  0xa5   :  { %2328 = vmatprep.subr.bf16.mxu0 %v3315_v57  ;;  %v3399_v57 = vld [vmem:[%s4689_s1 + $0x874] ss:$8 sps:$4 sm:$0xff]  }
  0xa7   :  { %2124 = vmatpush1.bf16.msra.mxu1 %v3310_v58  ;;  %v3394_v58 = vld [vmem:[%s4689_s1 + $0x370] ss:$8 sps:$4 sm:$0xff]  }
  0xa8   :  { %2329 = vmatpush1.bf16.msra.mxu0 %v3313_v59  ;;  %2125 = vmatprep.subr.bf16.mxu1 %v3318_v60  ;;  %v3397_v59 = vld [vmem:[%s4689_s1 + $0x870] ss:$8 sps:$4 sm:$0xff]   ;;  %v3402_v60 = vld [vmem:[%s4689_s1 + $0x384] ss:$8 sps:$4 sm:$0xff]  }
  0xa9   :  { %2330 = vmatprep.subr.bf16.mxu0 %v3321_v61  ;;  %v3405_v61 = vld [vmem:[%s4689_s1 + $0x884] ss:$8 sps:$4 sm:$0xff]  }
  0xab   :  { %2126 = vmatpush1.bf16.msra.mxu1 %v3316_v62  ;;  %v3400_v62 = vld [vmem:[%s4689_s1 + $0x380] ss:$8 sps:$4 sm:$0xff]  }
  0xac   :  { %2331 = vmatpush1.bf16.msra.mxu0 %v3319_v63  ;;  %2127 = vmatprep.subr.bf16.mxu1 %v3324_v0  ;;  %v3403_v63 = vld [vmem:[%s4689_s1 + $0x880] ss:$8 sps:$4 sm:$0xff]   ;;  %v3408_v0 = vld [vmem:[%s4689_s1 + $0x394] ss:$8 sps:$4 sm:$0xff]  }
  0xad   :  { %2332 = vmatprep.subr.bf16.mxu0 %v3327_v1  ;;  %v3411_v1 = vld [vmem:[%s4689_s1 + $0x894] ss:$8 sps:$4 sm:$0xff]  }
  0xaf   :  { %2128 = vmatpush1.bf16.msra.mxu1 %v3322_v2  ;;  %v3406_v2 = vld [vmem:[%s4689_s1 + $0x390] ss:$8 sps:$4 sm:$0xff]  }
  0xb0   :  { %2333 = vmatpush1.bf16.msra.mxu0 %v3325_v3  ;;  %2129 = vmatprep.subr.bf16.mxu1 %v3330_v4  ;;  %v3409_v3 = vld [vmem:[%s4689_s1 + $0x890] ss:$8 sps:$4 sm:$0xff]   ;;  %v3414_v4 = vld [vmem:[%s4689_s1 + $0x3a4] ss:$8 sps:$4 sm:$0xff]  }
  0xb1   :  { %2334 = vmatprep.subr.bf16.mxu0 %v3333_v5  ;;  %v3417_v5 = vld [vmem:[%s4689_s1 + $0x8a4] ss:$8 sps:$4 sm:$0xff]  }
  0xb3   :  { %2130 = vmatpush1.bf16.msra.mxu1 %v3328_v6  ;;  %v3412_v6 = vld [vmem:[%s4689_s1 + $0x3a0] ss:$8 sps:$4 sm:$0xff]  }
  0xb4   :  { %2335 = vmatpush1.bf16.msra.mxu0 %v3331_v7  ;;  %2131 = vmatprep.subr.bf16.mxu1 %v3336_v8  ;;  %v3415_v7 = vld [vmem:[%s4689_s1 + $0x8a0] ss:$8 sps:$4 sm:$0xff]   ;;  %v3420_v8 = vld [vmem:[%s4689_s1 + $0x3b4] ss:$8 sps:$4 sm:$0xff]  }
  0xb5   :  { %2336 = vmatprep.subr.bf16.mxu0 %v3339_v9  ;;  %v3423_v9 = vld [vmem:[%s4689_s1 + $0x8b4] ss:$8 sps:$4 sm:$0xff]  }
  0xb7   :  { %2132 = vmatpush1.bf16.msra.mxu1 %v3334_v10  ;;  %v3418_v10 = vld [vmem:[%s4689_s1 + $0x3b0] ss:$8 sps:$4 sm:$0xff]  }
  0xb8   :  { %2337 = vmatpush1.bf16.msra.mxu0 %v3337_v11  ;;  %2133 = vmatprep.subr.bf16.mxu1 %v3342_v12  ;;  %v3421_v11 = vld [vmem:[%s4689_s1 + $0x8b0] ss:$8 sps:$4 sm:$0xff]   ;;  %v3426_v12 = vld [vmem:[%s4689_s1 + $0x3c4] ss:$8 sps:$4 sm:$0xff]  }
  0xb9   :  { %2338 = vmatprep.subr.bf16.mxu0 %v3345_v13  ;;  %v3429_v13 = vld [vmem:[%s4689_s1 + $0x8c4] ss:$8 sps:$4 sm:$0xff]  }
  0xbb   :  { %2134 = vmatpush1.bf16.msra.mxu1 %v3340_v14  ;;  %v3424_v14 = vld [vmem:[%s4689_s1 + $0x3c0] ss:$8 sps:$4 sm:$0xff]  }
  0xbc   :  { %2339 = vmatpush1.bf16.msra.mxu0 %v3343_v15  ;;  %2135 = vmatprep.subr.bf16.mxu1 %v3348_v16  ;;  %v3427_v15 = vld [vmem:[%s4689_s1 + $0x8c0] ss:$8 sps:$4 sm:$0xff]   ;;  %v3432_v16 = vld [vmem:[%s4689_s1 + $0x3d4] ss:$8 sps:$4 sm:$0xff]  }
  0xbd   :  { %2340 = vmatprep.subr.bf16.mxu0 %v3351_v17  ;;  %v3435_v17 = vld [vmem:[%s4689_s1 + $0x8d4] ss:$8 sps:$4 sm:$0xff]  }
  0xbf   :  { %2136 = vmatpush1.bf16.msra.mxu1 %v3346_v18  ;;  %v3430_v18 = vld [vmem:[%s4689_s1 + $0x3d0] ss:$8 sps:$4 sm:$0xff]  }
  0xc0   :  { %2341 = vmatpush1.bf16.msra.mxu0 %v3349_v19  ;;  %2146 = vmatprep.subr.bf16.mxu1 %v3354_v20  ;;  %v3433_v19 = vld [vmem:[%s4689_s1 + $0x8d0] ss:$8 sps:$4 sm:$0xff]   ;;  %v3438_v20 = vld [vmem:[%s4689_s1 + $0x3e4] ss:$8 sps:$4 sm:$0xff]  }
  0xc1   :  { %2351 = vmatprep.subr.bf16.mxu0 %v3357_v23  ;;  %v3439_v23 = vld [vmem:[%s4689_s1 + $0x8e0] ss:$8 sps:$4 sm:$0xff]  }
  0xc2   :  { %2138 = vmatmul.mubr.bf16.vlgmr.msra.gmra.mrb[0].mxu1 %v46_v26  ;;  %v3442_v26 = vld [vmem:[%s4689_s1 + $0x3f0] ss:$8 sps:$4 sm:$0xff]  }
  0xc3   :  { %2343 = vmatmul.mubr.bf16.vlgmr.msra.gmra.mrb[0].mxu0 %v56_v27  ;;  %2147 = vmatpush1.bf16.msra.mxu1 %v3352_v24  ;;  %v3444_v24 = vld [vmem:[%s4689_s1 + $0x3f4] ss:$8 sps:$4 sm:$0xff]   ;;  %v3445_v27 = vld [vmem:[%s4689_s1 + $0x8f0] ss:$8 sps:$4 sm:$0xff]  }
  0xc4   :  { %2352 = vmatpush1.bf16.msra.mxu0 %v3355_v25  ;;  %2148 = vmatprep.subr.bf16.mxu1 %v3360_v30  ;;  %v3447_v25 = vld [vmem:[%s4689_s1 + $0x8f4] ss:$8 sps:$4 sm:$0xff]   ;;  %v3450_v30 = vld [vmem:[%s4689_s1 + $0x404] ss:$8 sps:$4 sm:$0xff]  }
  0xc5   :  { %2353 = vmatprep.subr.bf16.mxu0 %v3363_v31  ;;  %2178 = vmatprep.mubr.bf16.mxu1 %v49_v32  ;;  %v3453_v31 = vld [vmem:[%s4689_s1 + $0x904] ss:$8 sps:$4 sm:$0xff]   ;;  %v48_v32 = vpack.c.bf16 %v27_v28, %v27_v28 }
  0xc6   :  { %2383 = vmatprep.mubr.bf16.mxu0 %v59_v33  ;;  %v58_v33 = vpack.c.bf16 %v37_v29, %v37_v29  ;;  %v3534_v28 = vld [vmem:[%s4689_s1 + $0x4e4] ss:$8 sps:$4 sm:$0xff]  }
  0xc7   :  { %2149 = vmatpush1.bf16.msra.mxu1 %v3358_v34  ;;  %v30_v34 = vld [vmem:[%s4690_s0 + $0x48] sm:$0xff] }
  0xc8   :  { %2354 = vmatpush1.bf16.msra.mxu0 %v3361_v35  ;;  %2150 = vmatprep.subr.bf16.mxu1 %v3366_v36  ;;  %v40_v35 = vld [vmem:[%s4690_s0 + $0x98] sm:$0xff]  ;;  %v3448_v36 = vld [vmem:[%s4689_s1 + $0x400] ss:$8 sps:$4 sm:$0xff]   ;;  %v3537_v29 = vld [vmem:[%s4689_s1 + $0x9e4] ss:$8 sps:$4 sm:$0xff]  }
  0xc9   :  { %2355 = vmatprep.subr.bf16.mxu0 %v3369_v37  ;;  %v3451_v37 = vld [vmem:[%s4689_s1 + $0x900] ss:$8 sps:$4 sm:$0xff]  }
  0xcb   :  { %2151 = vmatpush1.bf16.msra.mxu1 %v3364_v38  ;;  %v3456_v38 = vld [vmem:[%s4689_s1 + $0x414] ss:$8 sps:$4 sm:$0xff]  }
  0xcc   :  { %2356 = vmatpush1.bf16.msra.mxu0 %v3367_v39  ;;  %2152 = vmatprep.subr.bf16.mxu1 %v3372_v40  ;;  %v3459_v39 = vld [vmem:[%s4689_s1 + $0x914] ss:$8 sps:$4 sm:$0xff]   ;;  %v51_v40 = vpack.c.bf16 %v30_v34, %v30_v34  ;;  %v3538_v34 = vld [vmem:[%s4689_s1 + $0x4f0] ss:$8 sps:$4 sm:$0xff]  }
  0xcd   :  { %2357 = vmatprep.subr.bf16.mxu0 %v3375_v41  ;;  %v61_v41 = vpack.c.bf16 %v40_v35, %v40_v35  ;;  %v3541_v35 = vld [vmem:[%s4689_s1 + $0x9f0] ss:$8 sps:$4 sm:$0xff]  }
  0xcf   :  { %2153 = vmatpush1.bf16.msra.mxu1 %v3370_v42  ;;  %v3454_v42 = vld [vmem:[%s4689_s1 + $0x410] ss:$8 sps:$4 sm:$0xff]  }
  0xd0   :  { %2358 = vmatpush1.bf16.msra.mxu0 %v3373_v43  ;;  %2154 = vmatprep.subr.bf16.mxu1 %v3378_v44  ;;  %v3457_v43 = vld [vmem:[%s4689_s1 + $0x910] ss:$8 sps:$4 sm:$0xff]   ;;  %v3462_v44 = vld [vmem:[%s4689_s1 + $0x424] ss:$8 sps:$4 sm:$0xff]  }
  0xd1   :  { %2359 = vmatprep.subr.bf16.mxu0 %v3381_v45  ;;  %v3465_v45 = vld [vmem:[%s4689_s1 + $0x924] ss:$8 sps:$4 sm:$0xff]  }
  0xd3   :  { %2155 = vmatpush1.bf16.msra.mxu1 %v3376_v46  ;;  %v3460_v46 = vld [vmem:[%s4689_s1 + $0x420] ss:$8 sps:$4 sm:$0xff]  }
  0xd4   :  { %2360 = vmatpush1.bf16.msra.mxu0 %v3379_v47  ;;  %2156 = vmatprep.subr.bf16.mxu1 %v3384_v48  ;;  %v3463_v47 = vld [vmem:[%s4689_s1 + $0x920] ss:$8 sps:$4 sm:$0xff]   ;;  %v3468_v48 = vld [vmem:[%s4689_s1 + $0x434] ss:$8 sps:$4 sm:$0xff]  }
  0xd5   :  { %2361 = vmatprep.subr.bf16.mxu0 %v3387_v49  ;;  %v3471_v49 = vld [vmem:[%s4689_s1 + $0x934] ss:$8 sps:$4 sm:$0xff]  }
  0xd7   :  { %2157 = vmatpush1.bf16.msra.mxu1 %v3382_v50  ;;  %v3466_v50 = vld [vmem:[%s4689_s1 + $0x430] ss:$8 sps:$4 sm:$0xff]  }
  0xd8   :  { %2362 = vmatpush1.bf16.msra.mxu0 %v3385_v51  ;;  %2158 = vmatprep.subr.bf16.mxu1 %v3390_v52  ;;  %v3469_v51 = vld [vmem:[%s4689_s1 + $0x930] ss:$8 sps:$4 sm:$0xff]   ;;  %v3474_v52 = vld [vmem:[%s4689_s1 + $0x444] ss:$8 sps:$4 sm:$0xff]  }
  0xd9   :  { %2363 = vmatprep.subr.bf16.mxu0 %v3393_v53  ;;  %v3477_v53 = vld [vmem:[%s4689_s1 + $0x944] ss:$8 sps:$4 sm:$0xff]  }
  0xdb   :  { %2159 = vmatpush1.bf16.msra.mxu1 %v3388_v54  ;;  %v3472_v54 = vld [vmem:[%s4689_s1 + $0x440] ss:$8 sps:$4 sm:$0xff]  }
  0xdc   :  { %2364 = vmatpush1.bf16.msra.mxu0 %v3391_v55  ;;  %2160 = vmatprep.subr.bf16.mxu1 %v3396_v56  ;;  %v3475_v55 = vld [vmem:[%s4689_s1 + $0x940] ss:$8 sps:$4 sm:$0xff]   ;;  %v3480_v56 = vld [vmem:[%s4689_s1 + $0x454] ss:$8 sps:$4 sm:$0xff]  }
  0xdd   :  { %2365 = vmatprep.subr.bf16.mxu0 %v3399_v57  ;;  %v3483_v57 = vld [vmem:[%s4689_s1 + $0x954] ss:$8 sps:$4 sm:$0xff]  }
  0xdf   :  { %2161 = vmatpush1.bf16.msra.mxu1 %v3394_v58  ;;  %v3478_v58 = vld [vmem:[%s4689_s1 + $0x450] ss:$8 sps:$4 sm:$0xff]  }
  0xe0   :  { %2366 = vmatpush1.bf16.msra.mxu0 %v3397_v59  ;;  %2162 = vmatprep.subr.bf16.mxu1 %v3402_v60  ;;  %v3481_v59 = vld [vmem:[%s4689_s1 + $0x950] ss:$8 sps:$4 sm:$0xff]   ;;  %v3486_v60 = vld [vmem:[%s4689_s1 + $0x464] ss:$8 sps:$4 sm:$0xff]  }
  0xe1   :  { %2367 = vmatprep.subr.bf16.mxu0 %v3405_v61  ;;  %v3489_v61 = vld [vmem:[%s4689_s1 + $0x964] ss:$8 sps:$4 sm:$0xff]  }
  0xe3   :  { %2163 = vmatpush1.bf16.msra.mxu1 %v3400_v62  ;;  %v3484_v62 = vld [vmem:[%s4689_s1 + $0x460] ss:$8 sps:$4 sm:$0xff]  }
  0xe4   :  { %2368 = vmatpush1.bf16.msra.mxu0 %v3403_v63  ;;  %2164 = vmatprep.subr.bf16.mxu1 %v3408_v0  ;;  %v3487_v63 = vld [vmem:[%s4689_s1 + $0x960] ss:$8 sps:$4 sm:$0xff]   ;;  %v3492_v0 = vld [vmem:[%s4689_s1 + $0x474] ss:$8 sps:$4 sm:$0xff]  }
  0xe5   :  { %2369 = vmatprep.subr.bf16.mxu0 %v3411_v1  ;;  %v3495_v1 = vld [vmem:[%s4689_s1 + $0x974] ss:$8 sps:$4 sm:$0xff]  }
  0xe7   :  { %2165 = vmatpush1.bf16.msra.mxu1 %v3406_v2  ;;  %v3490_v2 = vld [vmem:[%s4689_s1 + $0x470] ss:$8 sps:$4 sm:$0xff]  }
  0xe8   :  { %2370 = vmatpush1.bf16.msra.mxu0 %v3409_v3  ;;  %2166 = vmatprep.subr.bf16.mxu1 %v3414_v4  ;;  %v3493_v3 = vld [vmem:[%s4689_s1 + $0x970] ss:$8 sps:$4 sm:$0xff]   ;;  %v3498_v4 = vld [vmem:[%s4689_s1 + $0x484] ss:$8 sps:$4 sm:$0xff]  }
  0xe9   :  { %2371 = vmatprep.subr.bf16.mxu0 %v3417_v5  ;;  %v3501_v5 = vld [vmem:[%s4689_s1 + $0x984] ss:$8 sps:$4 sm:$0xff]  }
  0xeb   :  { %2167 = vmatpush1.bf16.msra.mxu1 %v3412_v6  ;;  %v3496_v6 = vld [vmem:[%s4689_s1 + $0x480] ss:$8 sps:$4 sm:$0xff]  }
  0xec   :  { %2372 = vmatpush1.bf16.msra.mxu0 %v3415_v7  ;;  %2168 = vmatprep.subr.bf16.mxu1 %v3420_v8  ;;  %v3499_v7 = vld [vmem:[%s4689_s1 + $0x980] ss:$8 sps:$4 sm:$0xff]   ;;  %v3504_v8 = vld [vmem:[%s4689_s1 + $0x494] ss:$8 sps:$4 sm:$0xff]  }
  0xed   :  { %2373 = vmatprep.subr.bf16.mxu0 %v3423_v9  ;;  %v3507_v9 = vld [vmem:[%s4689_s1 + $0x994] ss:$8 sps:$4 sm:$0xff]  }
  0xef   :  { %2169 = vmatpush1.bf16.msra.mxu1 %v3418_v10  ;;  %v3502_v10 = vld [vmem:[%s4689_s1 + $0x490] ss:$8 sps:$4 sm:$0xff]  }
  0xf0   :  { %2374 = vmatpush1.bf16.msra.mxu0 %v3421_v11  ;;  %2170 = vmatprep.subr.bf16.mxu1 %v3426_v12  ;;  %v3505_v11 = vld [vmem:[%s4689_s1 + $0x990] ss:$8 sps:$4 sm:$0xff]   ;;  %v3510_v12 = vld [vmem:[%s4689_s1 + $0x4a4] ss:$8 sps:$4 sm:$0xff]  }
  0xf1   :  { %2375 = vmatprep.subr.bf16.mxu0 %v3429_v13  ;;  %v3513_v13 = vld [vmem:[%s4689_s1 + $0x9a4] ss:$8 sps:$4 sm:$0xff]  }
  0xf3   :  { %2171 = vmatpush1.bf16.msra.mxu1 %v3424_v14  ;;  %v3508_v14 = vld [vmem:[%s4689_s1 + $0x4a0] ss:$8 sps:$4 sm:$0xff]  }
  0xf4   :  { %2376 = vmatpush1.bf16.msra.mxu0 %v3427_v15  ;;  %2172 = vmatprep.subr.bf16.mxu1 %v3432_v16  ;;  %v3511_v15 = vld [vmem:[%s4689_s1 + $0x9a0] ss:$8 sps:$4 sm:$0xff]   ;;  %v3516_v16 = vld [vmem:[%s4689_s1 + $0x4b4] ss:$8 sps:$4 sm:$0xff]  }
  0xf5   :  { %2377 = vmatprep.subr.bf16.mxu0 %v3435_v17  ;;  %v3519_v17 = vld [vmem:[%s4689_s1 + $0x9b4] ss:$8 sps:$4 sm:$0xff]  }
  0xf7   :  { %2173 = vmatpush1.bf16.msra.mxu1 %v3430_v18  ;;  %v3514_v18 = vld [vmem:[%s4689_s1 + $0x4b0] ss:$8 sps:$4 sm:$0xff]  }
  0xf8   :  { %2378 = vmatpush1.bf16.msra.mxu0 %v3433_v19  ;;  %2174 = vmatprep.subr.bf16.mxu1 %v3438_v20  ;;  %v3517_v19 = vld [vmem:[%s4689_s1 + $0x9b0] ss:$8 sps:$4 sm:$0xff]   ;;  %v3522_v20 = vld [vmem:[%s4689_s1 + $0x4c4] ss:$8 sps:$4 sm:$0xff]  }
  0xf9   :  { %2379 = vmatprep.subr.bf16.mxu0 %v3441_v21  ;;  %v3525_v21 = vld [vmem:[%s4689_s1 + $0x9c4] ss:$8 sps:$4 sm:$0xff]  }
  0xfb   :  { %2175 = vmatpush1.bf16.msra.mxu1 %v3436_v22  ;;  %v3520_v22 = vld [vmem:[%s4689_s1 + $0x4c0] ss:$8 sps:$4 sm:$0xff]  }
  0xfc   :  { %2380 = vmatpush1.bf16.msra.mxu0 %v3439_v23  ;;  %2176 = vmatprep.subr.bf16.mxu1 %v3444_v24  ;;  %v3523_v23 = vld [vmem:[%s4689_s1 + $0x9c0] ss:$8 sps:$4 sm:$0xff]   ;;  %v3528_v24 = vld [vmem:[%s4689_s1 + $0x4d4] ss:$8 sps:$4 sm:$0xff]  }
  0xfd   :  { %2381 = vmatprep.subr.bf16.mxu0 %v3447_v25  ;;  %v3531_v25 = vld [vmem:[%s4689_s1 + $0x9d4] ss:$8 sps:$4 sm:$0xff]  }
  0xff   :  { %2177 = vmatpush1.bf16.msra.mxu1 %v3442_v26  ;;  %v3526_v26 = vld [vmem:[%s4689_s1 + $0x4d0] ss:$8 sps:$4 sm:$0xff]  }
 0x100   :  { %2382 = vmatpush1.bf16.msra.mxu0 %v3445_v27  ;;  %2187 = vmatprep.subr.bf16.mxu1 %v3450_v30  ;;  %v3529_v27 = vld [vmem:[%s4689_s1 + $0x9d0] ss:$8 sps:$4 sm:$0xff]   ;;  %v3532_v30 = vld [vmem:[%s4689_s1 + $0x4e0] ss:$8 sps:$4 sm:$0xff]  }
 0x101   :  { %2392 = vmatprep.subr.bf16.mxu0 %v3453_v31  ;;  %v3535_v31 = vld [vmem:[%s4689_s1 + $0x9e0] ss:$8 sps:$4 sm:$0xff]  }
 0x102   :  { %2179 = vmatmul.mubr.bf16.vlgmr.msra.gmra.mrb[0].mxu1 %v48_v32  ;;  %v3540_v32 = vld [vmem:[%s4689_s1 + $0x4f4] ss:$8 sps:$4 sm:$0xff]  }
 0x103   :  { %2384 = vmatmul.mubr.bf16.vlgmr.msra.gmra.mrb[0].mxu0 %v58_v33  ;;  %2188 = vmatpush1.bf16.msra.mxu1 %v3448_v36  ;;  %v3543_v33 = vld [vmem:[%s4689_s1 + $0x9f4] ss:$8 sps:$4 sm:$0xff]   ;;  %v29_v36 = vld [vmem:[%s4690_s0 + $0x40] sm:$0xff] }
 0x104   :  { %2393 = vmatpush1.bf16.msra.mxu0 %v3451_v37  ;;  %2189 = vmatprep.subr.bf16.mxu1 %v3456_v38  ;;  %v39_v37 = vld [vmem:[%s4690_s0 + $0x90] sm:$0xff]  ;;  %v3546_v38 = vld [vmem:[%s4689_s1 + $0xa04] ss:$8 sps:$4 sm:$0xff]  }
 0x105   :  { %2394 = vmatprep.subr.bf16.mxu0 %v3459_v39  ;;  %2219 = vmatprep.mubr.bf16.mxu1 %v51_v40  ;;  %v3550_v39 = vld [vmem:[%s4691_s3 + $0x40] sm:$0xff]   ;;  %v50_v40 = vpack.c.bf16 %v29_v36, %v29_v36 }
 0x106   :  { %2424 = vmatprep.mubr.bf16.mxu0 %v61_v41  ;;  %v60_v41 = vpack.c.bf16 %v39_v37, %v39_v37 }
 0x107   :  { %2190 = vmatpush1.bf16.msra.mxu1 %v3454_v42  ;;  %v3544_v42 = vld [vmem:[%s4689_s1 + $0xa00] ss:$8 sps:$4 sm:$0xff]  }
 0x108   :  { %2395 = vmatpush1.bf16.msra.mxu0 %v3457_v43  ;;  %2191 = vmatprep.subr.bf16.mxu1 %v3462_v44  ;;  %v3549_v43 = vld [vmem:[%s4689_s1 + $0xa14] ss:$8 sps:$4 sm:$0xff]   ;;  %v3551_v44 = vld [vmem:[%s4691_s3] sm:$0xff]  }
 0x109   :  { %2396 = vmatprep.subr.bf16.mxu0 %v3465_v45  ;;  %v3552_v45 = vld [vmem:[%s4691_s3 + $0x48] sm:$0xff]  }
 0x10b   :  { %2192 = vmatpush1.bf16.msra.mxu1 %v3460_v46  ;;  %v3547_v46 = vld [vmem:[%s4689_s1 + $0xa10] ss:$8 sps:$4 sm:$0xff]  }
 0x10c   :  { %2397 = vmatpush1.bf16.msra.mxu0 %v3463_v47  ;;  %2193 = vmatprep.subr.bf16.mxu1 %v3468_v48  ;;  %v3566_v47 = vmov 0   ;;  %v3553_v48 = vld [vmem:[%s4691_s3 + $0x8] sm:$0xff]  }
 0x10d   :  { %2398 = vmatprep.subr.bf16.mxu0 %v3471_v49  ;;  %v3554_v49 = vld [vmem:[%s4691_s3 + $0x50] sm:$0xff]  }
 0x10f   :  { %2194 = vmatpush1.bf16.msra.mxu1 %v3466_v50  ;;  %v41_v50 = vld [vmem:[%s4690_s0 + $0xa0] sm:$0xff] }
 0x110   :  { %2399 = vmatpush1.bf16.msra.mxu0 %v3469_v51  ;;  %2195 = vmatprep.subr.bf16.mxu1 %v3474_v52  ;;  %v3555_v51 = vld [vmem:[%s4691_s3 + $0x10] sm:$0xff]   ;;  %v62_v52 = vpack.c.bf16 %v41_v50, %v41_v50 }
 0x111   :  { %2400 = vmatprep.subr.bf16.mxu0 %v3477_v53  ;;  %v3556_v53 = vld [vmem:[%s4691_s3 + $0x58] sm:$0xff]  }
 0x113   :  { %2196 = vmatpush1.bf16.msra.mxu1 %v3472_v54  ;;  %v3557_v54 = vld [vmem:[%s4691_s3 + $0x18] sm:$0xff]  }
 0x114   :  { %2401 = vmatpush1.bf16.msra.mxu0 %v3475_v55  ;;  %2197 = vmatprep.subr.bf16.mxu1 %v3480_v56  ;;  %v3558_v55 = vld [vmem:[%s4691_s3 + $0x60] sm:$0xff]  }
 0x115   :  { %2402 = vmatprep.subr.bf16.mxu0 %v3483_v57  ;;  %v3559_v56 = vld [vmem:[%s4691_s3 + $0x20] sm:$0xff]   ;;  %v3560_v57 = vld [vmem:[%s4691_s3 + $0x68] sm:$0xff]  }
 0x117   :  { %2198 = vmatpush1.bf16.msra.mxu1 %v3478_v58  ;;  %v3561_v58 = vld [vmem:[%s4691_s3 + $0x28] sm:$0xff]  }
 0x118   :  { %2403 = vmatpush1.bf16.msra.mxu0 %v3481_v59  ;;  %2199 = vmatprep.subr.bf16.mxu1 %v3486_v60  ;;  %v3562_v59 = vld [vmem:[%s4691_s3 + $0x70] sm:$0xff]  }
 0x119   :  { %2404 = vmatprep.subr.bf16.mxu0 %v3489_v61  ;;  %v3563_v60 = vld [vmem:[%s4691_s3 + $0x30] sm:$0xff]   ;;  %v3564_v61 = vld [vmem:[%s4691_s3 + $0x78] sm:$0xff]  }
 0x11b   :  { %2200 = vmatpush1.bf16.msra.mxu1 %v3484_v62  ;;  %v3565_v62 = vld [vmem:[%s4691_s3 + $0x38] sm:$0xff]  }
 0x11c   :  { %2405 = vmatpush1.bf16.msra.mxu0 %v3487_v63  ;;  %2201 = vmatprep.subr.bf16.mxu1 %v3492_v0  ;;  %v389_v63 = vlaneseq }
 0x11d   :  { %2406 = vmatprep.subr.bf16.mxu0 %v3495_v1 }
 0x11e   :  { %v390_v0 = vshrl.u32 %v389_v63, 7 }
 0x11f   :  { %2202 = vmatpush1.bf16.msra.mxu1 %v3490_v2 }
 0x120   :  { %2407 = vmatpush1.bf16.msra.mxu0 %v3493_v3  ;;  %2203 = vmatprep.subr.bf16.mxu1 %v3498_v4  ;;  %v391_v4 = vsub.s32 0, %v390_v0 }
 0x121   :  { %2408 = vmatprep.subr.bf16.mxu0 %v3501_v5 }
 0x123   :  { %2204 = vmatpush1.bf16.msra.mxu1 %v3496_v6  ;;  %v387_v6 = vld [vmem:[%s4692_s2] sm:$0x3] }
 0x124   :  { %2409 = vmatpush1.bf16.msra.mxu0 %v3499_v7  ;;  %2205 = vmatprep.subr.bf16.mxu1 %v3504_v8  ;;  %v395_v7 = vsub.s32 1, %v390_v0  ;;  %v392_v8 = vrot.slane %v387_v6, %v391_v4 }
 0x125   :  { %2410 = vmatprep.subr.bf16.mxu0 %v3507_v9 }
 0x126   :  { %v396_v9 = vrot.slane %v387_v6, %v395_v7 }
 0x127   :  { %2206 = vmatpush1.bf16.msra.mxu1 %v3502_v10 }
 0x128   :  { %2411 = vmatpush1.bf16.msra.mxu0 %v3505_v11  ;;  %2207 = vmatprep.subr.bf16.mxu1 %v3510_v12 }
 0x129   :  { %2412 = vmatprep.subr.bf16.mxu0 %v3513_v13 }
 0x12b   :  { %2208 = vmatpush1.bf16.msra.mxu1 %v3508_v14 }
 0x12c   :  { %2413 = vmatpush1.bf16.msra.mxu0 %v3511_v15  ;;  %2209 = vmatprep.subr.bf16.mxu1 %v3516_v16 }
 0x12d   :  { %2414 = vmatprep.subr.bf16.mxu0 %v3519_v17 }
 0x12f   :  { %2210 = vmatpush1.bf16.msra.mxu1 %v3514_v18 }
 0x130   :  { %2415 = vmatpush1.bf16.msra.mxu0 %v3517_v19  ;;  %2211 = vmatprep.subr.bf16.mxu1 %v3522_v20 }
 0x131   :  { %2416 = vmatprep.subr.bf16.mxu0 %v3525_v21 }
 0x133   :  { %2212 = vmatpush1.bf16.msra.mxu1 %v3520_v22 }
 0x134   :  { %2417 = vmatpush1.bf16.msra.mxu0 %v3523_v23  ;;  %2213 = vmatprep.subr.bf16.mxu1 %v3528_v24  ;;  %v2984_v23 = vld [vmem:[%s4693_s4] ss:$0 sm:$0xff] }
 0x135   :  { %2418 = vmatprep.subr.bf16.mxu0 %v3531_v25 }
 0x137   :  { %2214 = vmatpush1.bf16.msra.mxu1 %v3526_v26 }
 0x138   :  { %2419 = vmatpush1.bf16.msra.mxu0 %v3529_v27  ;;  %2215 = vmatprep.subr.bf16.mxu1 %v3534_v28 }
 0x139   :  { %2420 = vmatprep.subr.bf16.mxu0 %v3537_v29 }
 0x13b   :  { %2216 = vmatpush1.bf16.msra.mxu1 %v3532_v30 }
 0x13c   :  { %2421 = vmatpush1.bf16.msra.mxu0 %v3535_v31  ;;  %2217 = vmatprep.subr.bf16.mxu1 %v3540_v32 }
 0x13d   :  { %2422 = vmatprep.subr.bf16.mxu0 %v3543_v33 }
 0x13f   :  { %2218 = vmatpush1.bf16.msra.mxu1 %v3538_v34 }
 0x140   :  { %2423 = vmatpush1.bf16.msra.mxu0 %v3541_v35  ;;  %3001 = vmatprep.subr.bf16.mxu1 %v3550_v39 }
 0x141   :  { %2433 = vmatprep.subr.bf16.mxu0 %v3546_v38 }
 0x142   :  { %2220 = vmatmul.mubr.bf16.vlgmr.msra.gmra.mrb[0].mxu1 %v50_v40 }
 0x143   :  { %2425 = vmatmul.mubr.bf16.vlgmr.msra.gmra.mrb[0].mxu0 %v60_v41  ;;  %3002 = vmatpush3.bf16.msra.mxu1 %v3551_v44 }
 0x144   :  { %2434 = vmatpush1.bf16.msra.mxu0 %v3544_v42  ;;  %2465 = vmatprep.mubr.bf16.mxu0 %v3566_v47 }
 0x145   :  { %2435 = vmatprep.subr.bf16.mxu0 %v3549_v43  ;;  %3003 = vmatprep.subr.bf16.mxu1 %v3552_v45 }
 0x147   :  { %3004 = vmatpush3.bf16.msra.mxu1 %v3553_v48 }
 0x148   :  { %2436 = vmatpush1.bf16.msra.mxu0 %v3547_v46  ;;  %3005 = vmatprep.subr.bf16.mxu1 %v3554_v49 }
 0x14b   :  { %3006 = vmatpush3.bf16.msra.mxu1 %v3555_v51 }
 0x14c   :  { %3007 = vmatprep.subr.bf16.mxu1 %v3556_v53 }
 0x14f   :  { %2983 = vmatmul.mubr.msk.bf16.vlgmr.msra.gmra.mrb[0].mxu0 %vm2019_vm0, %v62_v52  ;;  %3008 = vmatpush3.bf16.msra.mxu1 %v3557_v54 }
 0x150   :  { %3009 = vmatprep.subr.bf16.mxu1 %v3558_v55 }
 0x153   :  { %3010 = vmatpush3.bf16.msra.mxu1 %v3559_v56 }
 0x154   :  { %3011 = vmatprep.subr.bf16.mxu1 %v3560_v57 }
 0x157   :  { %3012 = vmatpush3.bf16.msra.mxu1 %v3561_v58 }
 0x158   :  { %3013 = vmatprep.subr.bf16.mxu1 %v3562_v59 }
 0x15b   :  { %3014 = vmatpush3.bf16.msra.mxu1 %v3563_v60 }
 0x15c   :  { %3015 = vmatprep.subr.bf16.mxu1 %v3564_v61 }
 0x15f   :  { %3016 = vmatpush3.bf16.msra.mxu1 %v3565_v62 }
 0x215   :  { %v2221_v1 = vpop.f32.mrb[0].mxu1 }
 0x216   :  { %v2223_v2 = vpop.f32.mrb[1].mxu1  ;;  %v3023_v10 = vadd.f32 %v2221_v1, %v392_v8 }
 0x217   :  { %v2225_v3 = vpop.f32.mrb[2].mxu1  ;;  %v3025_v11 = vadd.f32 %v2223_v2, %v396_v9 }
 0x218   :  { %v2226_v5 = vpop.f32.mrb[3].mxu1 }
 0x222   :  { %v2467_v12 = vpop.f32.mrb[0].mxu0 }
 0x223   :  { %v3024_v13 = vadd.f32 %v3023_v10, %v2467_v12  ;;  %v2469_v14 = vpop.f32.mrb[1].mxu0 }
 0x224   :  { %v3026_v15 = vadd.f32 %v3025_v11, %v2469_v14  ;;  %v2471_v16 = vpop.f32.mrb[2].mxu0 }
 0x225   :  { %v2474_v17 = vmax.f32 %v3024_v13, 0.0  ;;  %v2472_v18 = vpop.f32.mrb[3].mxu0 }
 0x226   :  { %v2475_v19 = vmax.f32 %v3026_v15, 0.0 }
 0x227   :  { %v2476_v21 = vpack.c.bf16 %v2474_v17, %v2474_v17 }
 0x228   :  { %v2477_v20 = vpack.c.bf16 %v2475_v19, %v2475_v19 }
 0x22a   :  { %2645 = vmatprep.mubr.bf16.mxu1 %v2477_v20 }
 0x22b   :  { %2646 = vmatmul.mubr.bf16.vlgmr.msra.gmra.mrb[4].mxu1 %v2476_v21 }
 0x2fe   :  { %v3017_v22 = vpop.f32.mrb[4].mxu1 }
 0x2ff   :  { %v3018_v24 = vpop.f32.mrb[5].mxu1 }
 0x300   :  { %v3019_v25 = vadd.f32 %v3018_v24, %v3017_v22  ;;  %v3020_v26 = vpop.f32.mrb[6].mxu1 }
 0x301   :  { %v3021_v27 = vpop.f32.mrb[7].mxu1 }
 0x302   :  { %v2648_v28 = vadd.f32 %v3019_v25, %v2984_v23 }
 0x304   :  { %2654 = vst.msk [vmem:[%s4694_s5] sm:$0xff] %vm2653_vm1, %v2648_v28 }

</bundles_post_ra>
